<compile_context>
chip_gen: v5e
topology: v5e:2x2
jax: 0.10.0
libtpu: 0.0.40
codegen_flags: <defaults>
</compile_context>

<pallas_src>
import functools

import jax
import jax.numpy as jnp
from jax.experimental import pallas as pl
from jax.experimental.pallas import tpu as pltpu

NUM_CLASSES = 10


# ----------------------------------------------------------------------------
# Kernel 1: fused conv1 + ReLU + pool1 + conv2 + ReLU + pool2   (per batch tile)
# ----------------------------------------------------------------------------
def _conv_stack_kernel(a1_ref, w1_ref, b1_ref, w2_ref, b2_ref, o_ref, *, tb):
    """Per batch-tile of `tb` images.

    a1_ref : (tb, 169, 36) bf16  pooled-window im2col of the 28x28 image:
             row r = p*13+q (pool1 output coords), col = s*9 + (dy*3+dx) holds
             pixel x[2p + s//2 + dy, 2q + s%2 + dx]  (s = 2x2 window member).
    w1_ref : (36, 128) bf16  block_diag(4 x conv1 weight (9,32)) -> lane-dense N.
    b1_ref : (1, 128)  f32   conv1 bias tiled 4x.
    w2_ref : (288, 64) bf16  conv2 weight, rows ordered (dy, dx, cin).
    b2_ref : (1, 64)   f32   conv2 bias.
    o_ref  : (tb, 5, 320) bf16  pooled conv2 output, flattened (h, w*64 + c).
    """
    w1 = w1_ref[...]
    b1 = b1_ref[...]
    w2 = w2_ref[...]
    b2 = b2_ref[...]

    for t in range(tb):
        a1 = a1_ref[t]                                                   # (169,36)

        # conv1 for all four pool-window members at once (four 32-lane groups).
        y1 = jnp.dot(a1, w1, preferred_element_type=jnp.float32) + b1    # (169,128)
        y1 = jnp.maximum(y1, 0.0)
        # maxpool1 == max over the 4 window members (ReLU and max commute).
        p1 = jnp.maximum(jnp.maximum(y1[:, 0:32], y1[:, 32:64]),
                         jnp.maximum(y1[:, 64:96], y1[:, 96:128]))       # (169,32)
        # Pad rows so every shifted slice below is a full contiguous slice.
        p1 = jnp.concatenate([p1, jnp.zeros((7, 32), jnp.float32)],
                             axis=0)                                     # (176,32)

        # In-kernel im2col for conv2: 9 shifted CONTIGUOUS row slices of the
        # flattened (h*13+w, c) pool1 output.  Row r = i*13 + j of y2 equals
        # conv2 output (i, j) for j <= 10; rows with j in {11,12} wrap into the
        # next image row and are never read by the pool below.
        a2 = jnp.concatenate(
            [p1[dy * 13 + dx: dy * 13 + dx + 143, :]
             for dy in range(3) for dx in range(3)],
            axis=1).astype(jnp.bfloat16)                                 # (143,288)
        y2 = jnp.dot(a2, w2, preferred_element_type=jnp.float32) + b2    # (143,64)
        y2 = jnp.maximum(y2, 0.0)

        # maxpool2 (floor mode: 11 -> 5), emitted as a lane-dense (5,320) slab
        # whose flattening is exactly (h, w, c) order.
        rows = []
        for p in range(5):
            r0 = y2[(2 * p) * 13: (2 * p) * 13 + 10, :]                  # i = 2p
            r1 = y2[(2 * p + 1) * 13: (2 * p + 1) * 13 + 10, :]          # i = 2p+1
            m = jnp.maximum(r0, r1)                                      # (10,64)
            rows.append(jnp.concatenate(
                [jnp.maximum(m[2 * q: 2 * q + 1, :], m[2 * q + 1: 2 * q + 2, :])
                 for q in range(5)], axis=1))                            # (1,320)
        o_ref[t] = jnp.concatenate(rows, axis=0).astype(o_ref.dtype)     # (5,320)


def _conv_stack(a1, w1big, b1big, w2m, b2, *, tb):
    B = a1.shape[0]
    flops = 2 * B * (169 * 36 * 128 + 143 * 288 * 64)
    bytes_accessed = (a1.size * 2 + w1big.size * 2 + w2m.size * 2
                      + (b1big.size + b2.size) * 4 + B * 5 * 320 * 2)
    return pl.pallas_call(
        functools.partial(_conv_stack_kernel, tb=tb),
        out_shape=jax.ShapeDtypeStruct((B, 5, 320), jnp.bfloat16),
        grid=(pl.cdiv(B, tb),),
        in_specs=[
            pl.BlockSpec((tb, 169, 36), lambda i: (i, 0, 0)),
            pl.BlockSpec((36, 128), lambda i: (0, 0)),
            pl.BlockSpec((1, 128), lambda i: (0, 0)),
            pl.BlockSpec((288, 64), lambda i: (0, 0)),
            pl.BlockSpec((1, 64), lambda i: (0, 0)),
        ],
        out_specs=pl.BlockSpec((tb, 5, 320), lambda i: (i, 0, 0)),
        compiler_params=pltpu.CompilerParams(
            dimension_semantics=("parallel",),
            vmem_limit_bytes=32 * 1024 * 1024),
        cost_estimate=pl.CostEstimate(flops=flops, transcendentals=0,
                                      bytes_accessed=bytes_accessed),
    )(a1, w1big, b1big, w2m, b2)


# ----------------------------------------------------------------------------
# Kernel 2: fused fc1 + ReLU + fc2 (fc2 padded to 128 lanes -> lane-dense store)
# ----------------------------------------------------------------------------
def _mlp_kernel(x_ref, w1_ref, b1_ref, w2_ref, b2_ref, o_ref):
    h = jnp.dot(x_ref[...], w1_ref[...], preferred_element_type=jnp.float32)
    h = jnp.maximum(h + b1_ref[...], 0.0).astype(jnp.bfloat16)           # (TM,64)
    o = jnp.dot(h, w2_ref[...], preferred_element_type=jnp.float32) + b2_ref[...]
    o_ref[...] = o                                                       # (TM,128)


def _mlp(x, w1, b1, w2, b2, *, tm):
    B = x.shape[0]
    flops = 2 * B * (1600 * 64 + 64 * 128)
    bytes_accessed = x.size * 2 + w1.size * 2 + w2.size * 2 + B * 128 * 4
    return pl.pallas_call(
        _mlp_kernel,
        out_shape=jax.ShapeDtypeStruct((B, 128), jnp.float32),
        grid=(pl.cdiv(B, tm),),
        in_specs=[
            pl.BlockSpec((tm, 1600), lambda i: (i, 0)),
            pl.BlockSpec((1600, 64), lambda i: (0, 0)),
            pl.BlockSpec((1, 64), lambda i: (0, 0)),
            pl.BlockSpec((64, 128), lambda i: (0, 0)),
            pl.BlockSpec((1, 128), lambda i: (0, 0)),
        ],
        out_specs=pl.BlockSpec((tm, 128), lambda i: (i, 0)),
        compiler_params=pltpu.CompilerParams(
            dimension_semantics=("parallel",),
            vmem_limit_bytes=32 * 1024 * 1024),
        cost_estimate=pl.CostEstimate(flops=flops, transcendentals=0,
                                      bytes_accessed=bytes_accessed),
    )(x, w1, b1, w2, b2)


# ----------------------------------------------------------------------------
# Wrapper glue (XLA): input window-gather + weight repacking
# ----------------------------------------------------------------------------
def _pool_im2col_28(x):
    """x: (B, 28, 28) f32 -> (B, 169, 36) bf16 pooled-window im2col."""
    B = x.shape[0]
    cols = []
    for s in range(4):                      # 2x2 pool-window member
        oy, ox = divmod(s, 2)
        for dy in range(3):                 # conv1 kernel offsets
            for dx in range(3):
                cols.append(x[:, oy + dy: oy + dy + 25: 2,
                              ox + dx: ox + dx + 25: 2])                 # (B,13,13)
    a1 = jnp.stack(cols, axis=-1)                                        # (B,13,13,36)
    return a1.reshape(B, 169, 36).astype(jnp.bfloat16)


def init_params(key):
    k1, k2, k3, k4 = jax.random.split(key, 4)
    scale = 0.05
    return {
        "conv1_w": scale * jax.random.normal(k1, (32, 1, 3, 3), jnp.float32),
        "conv1_b": jnp.zeros((32,), jnp.float32),
        "conv2_w": scale * jax.random.normal(k2, (64, 32, 3, 3), jnp.float32),
        "conv2_b": jnp.zeros((64,), jnp.float32),
        "fc1_w": scale * jax.random.normal(k3, (1600, 64), jnp.float32),  # torch W.T
        "fc1_b": jnp.zeros((64,), jnp.float32),
        "fc2_w": scale * jax.random.normal(k4, (64, NUM_CLASSES), jnp.float32),
        "fc2_b": jnp.zeros((NUM_CLASSES,), jnp.float32),
    }


@jax.jit
def forward(params, x_nchw):
    x = x_nchw.astype(jnp.float32)[:, 0, :, :]                           # (B,28,28)
    B = x.shape[0]

    # ---- weight repacking (tiny, done on device under jit) ----
    w1m = jnp.transpose(params["conv1_w"], (2, 3, 1, 0)).reshape(9, 32)  # (dy,dx)
    w1big = jnp.zeros((36, 128), jnp.float32)
    for s in range(4):
        w1big = w1big.at[s * 9:(s + 1) * 9, s * 32:(s + 1) * 32].set(w1m)
    w1big = w1big.astype(jnp.bfloat16)                                   # (36,128)
    b1big = jnp.tile(params["conv1_b"], 4).reshape(1, 128)

    w2m = jnp.transpose(params["conv2_w"], (2, 3, 1, 0)).reshape(288, 64)
    w2m = w2m.astype(jnp.bfloat16)                                       # (dy,dx,cin)
    b2 = params["conv2_b"].reshape(1, 64)

    # fc1 weight rows: torch (c,h,w) flatten order -> our (h,w,c) order, so the
    # NCHW-order flatten/transpose of the activations is not needed at all.
    w_fc1 = params["fc1_w"].reshape(64, 5, 5, 64).transpose(1, 2, 0, 3)
    w_fc1 = w_fc1.reshape(1600, 64).astype(jnp.bfloat16)
    b_fc1 = params["fc1_b"].reshape(1, 64)
    w_fc2 = jnp.zeros((64, 128), jnp.bfloat16).at[:, :NUM_CLASSES].set(
        params["fc2_w"].astype(jnp.bfloat16))
    b_fc2 = jnp.zeros((1, 128), jnp.float32).at[0, :NUM_CLASSES].set(
        params["fc2_b"])

    # ---- stage 1: conv1+pool1+conv2+pool2, one fused Pallas kernel ----
    a1 = _pool_im2col_28(x)                                              # (B,169,36)
    tb = max(1, min(4, B))
    feat = _conv_stack(a1, w1big, b1big, w2m, b2, tb=tb)                 # (B,5,320)
    feat = feat.reshape(B, 1600)                                         # (h,w,c)

    # ---- stage 2: fc1+fc2, one fused Pallas kernel, 128-lane padded output ----
    tm = max(1, min(256, B))
    logits = _mlp(feat, w_fc1, b_fc1, w_fc2, b_fc2, tm=tm)               # (B,128)
    return logits[:, :NUM_CLASSES]


if __name__ == "__main__":
    key = jax.random.PRNGKey(0)
    pkey, xkey = jax.random.split(key)
    params = init_params(pkey)

    # fc1 expects 64*5*5 features => spatial size must be 28x28 (MNIST-like).
    x = jax.random.normal(xkey, (2, 1, 28, 28), jnp.float32)

    logits = forward(params, x)
    jax.block_until_ready(logits)
    assert logits.shape == (2, NUM_CLASSES) and logits.dtype == jnp.float32
    print("KERNEL_OK")
</pallas_src>

<mosaic_0001>
module attributes {stable_mosaic.version = 11 : i64} {
  func.func @_conv_stack_kernel(%arg0: i32, %arg1: memref<2x169x36xbf16, #tpu.memory_space<vmem>>, %arg2: memref<36x128xbf16, #tpu.memory_space<vmem>>, %arg3: memref<1x128xf32, #tpu.memory_space<vmem>>, %arg4: memref<288x64xbf16, #tpu.memory_space<vmem>>, %arg5: memref<1x64xf32, #tpu.memory_space<vmem>>, %arg6: memref<2x5x320xbf16, #tpu.memory_space<vmem>>) attributes {dimension_semantics = [#tpu.dimension_semantics<parallel>], iteration_bounds = array<i64: 1>, scalar_prefetch = 0 : i64, scratch_operands = 0 : i64, tpu.core_type = #tpu.core_type<tc>, window_params = [{transform_indices = @transform_0, window_bounds = array<i64: 2, 169, 36>}, {pipeline_mode = #tpu.pipeline_mode<synchronous>, transform_indices = @transform_1, window_bounds = array<i64: 36, 128>}, {pipeline_mode = #tpu.pipeline_mode<synchronous>, transform_indices = @transform_2, window_bounds = array<i64: 1, 128>}, {pipeline_mode = #tpu.pipeline_mode<synchronous>, transform_indices = @transform_3, window_bounds = array<i64: 288, 64>}, {pipeline_mode = #tpu.pipeline_mode<synchronous>, transform_indices = @transform_4, window_bounds = array<i64: 1, 64>}, {transform_indices = @transform_5, window_bounds = array<i64: 2, 5, 320>}]} {
    %c0 = arith.constant 0 : index
    %c0_0 = arith.constant 0 : index
    %0 = vector.load %arg2[%c0, %c0_0] : memref<36x128xbf16, #tpu.memory_space<vmem>>, vector<36x128xbf16>
    %c0_1 = arith.constant 0 : index
    %c0_2 = arith.constant 0 : index
    %1 = vector.load %arg3[%c0_1, %c0_2] : memref<1x128xf32, #tpu.memory_space<vmem>>, vector<1x128xf32>
    %c0_3 = arith.constant 0 : index
    %c0_4 = arith.constant 0 : index
    %2 = vector.load %arg4[%c0_3, %c0_4] : memref<288x64xbf16, #tpu.memory_space<vmem>>, vector<288x64xbf16>
    %c0_5 = arith.constant 0 : index
    %c0_6 = arith.constant 0 : index
    %3 = vector.load %arg5[%c0_5, %c0_6] : memref<1x64xf32, #tpu.memory_space<vmem>>, vector<1x64xf32>
    %c0_7 = arith.constant 0 : index
    %c0_8 = arith.constant 0 : index
    %c0_9 = arith.constant 0 : index
    %4 = vector.load %arg1[%c0_7, %c0_8, %c0_9] : memref<2x169x36xbf16, #tpu.memory_space<vmem>>, vector<1x169x36xbf16>
    %5 = vector.shape_cast %4 : vector<1x169x36xbf16> to vector<169x36xbf16>
    %cst = arith.constant dense<0.000000e+00> : vector<169x128xf32>
    %6 = tpu.matmul %5, %0, %cst {dimension_numbers = #tpu.dot_dimension_numbers<[1], [0], [0], [1], [0, 0, 1, 1], [], []>} : vector<169x36xbf16>, vector<36x128xbf16>, vector<169x128xf32> -> vector<169x128xf32>
    %7 = vector.broadcast %1 : vector<1x128xf32> to vector<169x128xf32>
    %8 = arith.addf %6, %7 : vector<169x128xf32>
    %cst_10 = arith.constant 0.000000e+00 : f32
    %9 = vector.broadcast %cst_10 : f32 to vector<169x128xf32>
    %10 = arith.maximumf %8, %9 : vector<169x128xf32>
    %11 = vector.extract_strided_slice %10 {offsets = [0, 0], sizes = [169, 32], strides = [1, 1]} : vector<169x128xf32> to vector<169x32xf32>
    %12 = vector.extract_strided_slice %10 {offsets = [0, 32], sizes = [169, 32], strides = [1, 1]} : vector<169x128xf32> to vector<169x32xf32>
    %13 = arith.maximumf %11, %12 : vector<169x32xf32>
    %14 = vector.extract_strided_slice %10 {offsets = [0, 64], sizes = [169, 32], strides = [1, 1]} : vector<169x128xf32> to vector<169x32xf32>
    %15 = vector.extract_strided_slice %10 {offsets = [0, 96], sizes = [169, 32], strides = [1, 1]} : vector<169x128xf32> to vector<169x32xf32>
    %16 = arith.maximumf %14, %15 : vector<169x32xf32>
    %17 = arith.maximumf %13, %16 : vector<169x32xf32>
    %cst_11 = arith.constant 0.000000e+00 : f32
    %18 = vector.broadcast %cst_11 : f32 to vector<7x32xf32>
    %19 = tpu.concatenate %17, %18 in 0 : vector<169x32xf32>, vector<7x32xf32> -> vector<176x32xf32>
    %20 = vector.extract_strided_slice %19 {offsets = [0, 0], sizes = [143, 32], strides = [1, 1]} : vector<176x32xf32> to vector<143x32xf32>
    %21 = vector.extract_strided_slice %19 {offsets = [1, 0], sizes = [143, 32], strides = [1, 1]} : vector<176x32xf32> to vector<143x32xf32>
    %22 = vector.extract_strided_slice %19 {offsets = [2, 0], sizes = [143, 32], strides = [1, 1]} : vector<176x32xf32> to vector<143x32xf32>
    %23 = vector.extract_strided_slice %19 {offsets = [13, 0], sizes = [143, 32], strides = [1, 1]} : vector<176x32xf32> to vector<143x32xf32>
    %24 = vector.extract_strided_slice %19 {offsets = [14, 0], sizes = [143, 32], strides = [1, 1]} : vector<176x32xf32> to vector<143x32xf32>
    %25 = vector.extract_strided_slice %19 {offsets = [15, 0], sizes = [143, 32], strides = [1, 1]} : vector<176x32xf32> to vector<143x32xf32>
    %26 = vector.extract_strided_slice %19 {offsets = [26, 0], sizes = [143, 32], strides = [1, 1]} : vector<176x32xf32> to vector<143x32xf32>
    %27 = vector.extract_strided_slice %19 {offsets = [27, 0], sizes = [143, 32], strides = [1, 1]} : vector<176x32xf32> to vector<143x32xf32>
    %28 = vector.extract_strided_slice %19 {offsets = [28, 0], sizes = [143, 32], strides = [1, 1]} : vector<176x32xf32> to vector<143x32xf32>
    %29 = tpu.concatenate %20, %21, %22, %23, %24, %25, %26, %27, %28 in 1 : vector<143x32xf32>, vector<143x32xf32>, vector<143x32xf32>, vector<143x32xf32>, vector<143x32xf32>, vector<143x32xf32>, vector<143x32xf32>, vector<143x32xf32>, vector<143x32xf32> -> vector<143x288xf32>
    %30 = arith.truncf %29 : vector<143x288xf32> to vector<143x288xbf16>
    %cst_12 = arith.constant dense<0.000000e+00> : vector<143x64xf32>
    %31 = tpu.matmul %30, %2, %cst_12 {dimension_numbers = #tpu.dot_dimension_numbers<[1], [0], [0], [1], [0, 0, 1, 1], [], []>} : vector<143x288xbf16>, vector<288x64xbf16>, vector<143x64xf32> -> vector<143x64xf32>
    %32 = vector.broadcast %3 : vector<1x64xf32> to vector<143x64xf32>
    %33 = arith.addf %31, %32 : vector<143x64xf32>
    %cst_13 = arith.constant 0.000000e+00 : f32
    %34 = vector.broadcast %cst_13 : f32 to vector<143x64xf32>
    %35 = arith.maximumf %33, %34 : vector<143x64xf32>
    %36 = vector.extract_strided_slice %35 {offsets = [0, 0], sizes = [10, 64], strides = [1, 1]} : vector<143x64xf32> to vector<10x64xf32>
    %37 = vector.extract_strided_slice %35 {offsets = [13, 0], sizes = [10, 64], strides = [1, 1]} : vector<143x64xf32> to vector<10x64xf32>
    %38 = arith.maximumf %36, %37 : vector<10x64xf32>
    %39 = vector.extract_strided_slice %38 {offsets = [0, 0], sizes = [1, 64], strides = [1, 1]} : vector<10x64xf32> to vector<1x64xf32>
    %40 = vector.extract_strided_slice %38 {offsets = [1, 0], sizes = [1, 64], strides = [1, 1]} : vector<10x64xf32> to vector<1x64xf32>
    %41 = arith.maximumf %39, %40 : vector<1x64xf32>
    %42 = vector.extract_strided_slice %38 {offsets = [2, 0], sizes = [1, 64], strides = [1, 1]} : vector<10x64xf32> to vector<1x64xf32>
    %43 = vector.extract_strided_slice %38 {offsets = [3, 0], sizes = [1, 64], strides = [1, 1]} : vector<10x64xf32> to vector<1x64xf32>
    %44 = arith.maximumf %42, %43 : vector<1x64xf32>
    %45 = vector.extract_strided_slice %38 {offsets = [4, 0], sizes = [1, 64], strides = [1, 1]} : vector<10x64xf32> to vector<1x64xf32>
    %46 = vector.extract_strided_slice %38 {offsets = [5, 0], sizes = [1, 64], strides = [1, 1]} : vector<10x64xf32> to vector<1x64xf32>
    %47 = arith.maximumf %45, %46 : vector<1x64xf32>
    %48 = vector.extract_strided_slice %38 {offsets = [6, 0], sizes = [1, 64], strides = [1, 1]} : vector<10x64xf32> to vector<1x64xf32>
    %49 = vector.extract_strided_slice %38 {offsets = [7, 0], sizes = [1, 64], strides = [1, 1]} : vector<10x64xf32> to vector<1x64xf32>
    %50 = arith.maximumf %48, %49 : vector<1x64xf32>
    %51 = vector.extract_strided_slice %38 {offsets = [8, 0], sizes = [1, 64], strides = [1, 1]} : vector<10x64xf32> to vector<1x64xf32>
    %52 = vector.extract_strided_slice %38 {offsets = [9, 0], sizes = [1, 64], strides = [1, 1]} : vector<10x64xf32> to vector<1x64xf32>
    %53 = arith.maximumf %51, %52 : vector<1x64xf32>
    %54 = tpu.concatenate %41, %44, %47, %50, %53 in 1 : vector<1x64xf32>, vector<1x64xf32>, vector<1x64xf32>, vector<1x64xf32>, vector<1x64xf32> -> vector<1x320xf32>
    %55 = vector.extract_strided_slice %35 {offsets = [26, 0], sizes = [10, 64], strides = [1, 1]} : vector<143x64xf32> to vector<10x64xf32>
    %56 = vector.extract_strided_slice %35 {offsets = [39, 0], sizes = [10, 64], strides = [1, 1]} : vector<143x64xf32> to vector<10x64xf32>
    %57 = arith.maximumf %55, %56 : vector<10x64xf32>
    %58 = vector.extract_strided_slice %57 {offsets = [0, 0], sizes = [1, 64], strides = [1, 1]} : vector<10x64xf32> to vector<1x64xf32>
    %59 = vector.extract_strided_slice %57 {offsets = [1, 0], sizes = [1, 64], strides = [1, 1]} : vector<10x64xf32> to vector<1x64xf32>
    %60 = arith.maximumf %58, %59 : vector<1x64xf32>
    %61 = vector.extract_strided_slice %57 {offsets = [2, 0], sizes = [1, 64], strides = [1, 1]} : vector<10x64xf32> to vector<1x64xf32>
    %62 = vector.extract_strided_slice %57 {offsets = [3, 0], sizes = [1, 64], strides = [1, 1]} : vector<10x64xf32> to vector<1x64xf32>
    %63 = arith.maximumf %61, %62 : vector<1x64xf32>
    %64 = vector.extract_strided_slice %57 {offsets = [4, 0], sizes = [1, 64], strides = [1, 1]} : vector<10x64xf32> to vector<1x64xf32>
    %65 = vector.extract_strided_slice %57 {offsets = [5, 0], sizes = [1, 64], strides = [1, 1]} : vector<10x64xf32> to vector<1x64xf32>
    %66 = arith.maximumf %64, %65 : vector<1x64xf32>
    %67 = vector.extract_strided_slice %57 {offsets = [6, 0], sizes = [1, 64], strides = [1, 1]} : vector<10x64xf32> to vector<1x64xf32>
    %68 = vector.extract_strided_slice %57 {offsets = [7, 0], sizes = [1, 64], strides = [1, 1]} : vector<10x64xf32> to vector<1x64xf32>
    %69 = arith.maximumf %67, %68 : vector<1x64xf32>
    %70 = vector.extract_strided_slice %57 {offsets = [8, 0], sizes = [1, 64], strides = [1, 1]} : vector<10x64xf32> to vector<1x64xf32>
    %71 = vector.extract_strided_slice %57 {offsets = [9, 0], sizes = [1, 64], strides = [1, 1]} : vector<10x64xf32> to vector<1x64xf32>
    %72 = arith.maximumf %70, %71 : vector<1x64xf32>
    %73 = tpu.concatenate %60, %63, %66, %69, %72 in 1 : vector<1x64xf32>, vector<1x64xf32>, vector<1x64xf32>, vector<1x64xf32>, vector<1x64xf32> -> vector<1x320xf32>
    %74 = vector.extract_strided_slice %35 {offsets = [52, 0], sizes = [10, 64], strides = [1, 1]} : vector<143x64xf32> to vector<10x64xf32>
    %75 = vector.extract_strided_slice %35 {offsets = [65, 0], sizes = [10, 64], strides = [1, 1]} : vector<143x64xf32> to vector<10x64xf32>
    %76 = arith.maximumf %74, %75 : vector<10x64xf32>
    %77 = vector.extract_strided_slice %76 {offsets = [0, 0], sizes = [1, 64], strides = [1, 1]} : vector<10x64xf32> to vector<1x64xf32>
    %78 = vector.extract_strided_slice %76 {offsets = [1, 0], sizes = [1, 64], strides = [1, 1]} : vector<10x64xf32> to vector<1x64xf32>
    %79 = arith.maximumf %77, %78 : vector<1x64xf32>
    %80 = vector.extract_strided_slice %76 {offsets = [2, 0], sizes = [1, 64], strides = [1, 1]} : vector<10x64xf32> to vector<1x64xf32>
    %81 = vector.extract_strided_slice %76 {offsets = [3, 0], sizes = [1, 64], strides = [1, 1]} : vector<10x64xf32> to vector<1x64xf32>
    %82 = arith.maximumf %80, %81 : vector<1x64xf32>
    %83 = vector.extract_strided_slice %76 {offsets = [4, 0], sizes = [1, 64], strides = [1, 1]} : vector<10x64xf32> to vector<1x64xf32>
    %84 = vector.extract_strided_slice %76 {offsets = [5, 0], sizes = [1, 64], strides = [1, 1]} : vector<10x64xf32> to vector<1x64xf32>
    %85 = arith.maximumf %83, %84 : vector<1x64xf32>
    %86 = vector.extract_strided_slice %76 {offsets = [6, 0], sizes = [1, 64], strides = [1, 1]} : vector<10x64xf32> to vector<1x64xf32>
    %87 = vector.extract_strided_slice %76 {offsets = [7, 0], sizes = [1, 64], strides = [1, 1]} : vector<10x64xf32> to vector<1x64xf32>
    %88 = arith.maximumf %86, %87 : vector<1x64xf32>
    %89 = vector.extract_strided_slice %76 {offsets = [8, 0], sizes = [1, 64], strides = [1, 1]} : vector<10x64xf32> to vector<1x64xf32>
    %90 = vector.extract_strided_slice %76 {offsets = [9, 0], sizes = [1, 64], strides = [1, 1]} : vector<10x64xf32> to vector<1x64xf32>
    %91 = arith.maximumf %89, %90 : vector<1x64xf32>
    %92 = tpu.concatenate %79, %82, %85, %88, %91 in 1 : vector<1x64xf32>, vector<1x64xf32>, vector<1x64xf32>, vector<1x64xf32>, vector<1x64xf32> -> vector<1x320xf32>
    %93 = vector.extract_strided_slice %35 {offsets = [78, 0], sizes = [10, 64], strides = [1, 1]} : vector<143x64xf32> to vector<10x64xf32>
    %94 = vector.extract_strided_slice %35 {offsets = [91, 0], sizes = [10, 64], strides = [1, 1]} : vector<143x64xf32> to vector<10x64xf32>
    %95 = arith.maximumf %93, %94 : vector<10x64xf32>
    %96 = vector.extract_strided_slice %95 {offsets = [0, 0], sizes = [1, 64], strides = [1, 1]} : vector<10x64xf32> to vector<1x64xf32>
    %97 = vector.extract_strided_slice %95 {offsets = [1, 0], sizes = [1, 64], strides = [1, 1]} : vector<10x64xf32> to vector<1x64xf32>
    %98 = arith.maximumf %96, %97 : vector<1x64xf32>
    %99 = vector.extract_strided_slice %95 {offsets = [2, 0], sizes = [1, 64], strides = [1, 1]} : vector<10x64xf32> to vector<1x64xf32>
    %100 = vector.extract_strided_slice %95 {offsets = [3, 0], sizes = [1, 64], strides = [1, 1]} : vector<10x64xf32> to vector<1x64xf32>
    %101 = arith.maximumf %99, %100 : vector<1x64xf32>
    %102 = vector.extract_strided_slice %95 {offsets = [4, 0], sizes = [1, 64], strides = [1, 1]} : vector<10x64xf32> to vector<1x64xf32>
    %103 = vector.extract_strided_slice %95 {offsets = [5, 0], sizes = [1, 64], strides = [1, 1]} : vector<10x64xf32> to vector<1x64xf32>
    %104 = arith.maximumf %102, %103 : vector<1x64xf32>
    %105 = vector.extract_strided_slice %95 {offsets = [6, 0], sizes = [1, 64], strides = [1, 1]} : vector<10x64xf32> to vector<1x64xf32>
    %106 = vector.extract_strided_slice %95 {offsets = [7, 0], sizes = [1, 64], strides = [1, 1]} : vector<10x64xf32> to vector<1x64xf32>
    %107 = arith.maximumf %105, %106 : vector<1x64xf32>
    %108 = vector.extract_strided_slice %95 {offsets = [8, 0], sizes = [1, 64], strides = [1, 1]} : vector<10x64xf32> to vector<1x64xf32>
    %109 = vector.extract_strided_slice %95 {offsets = [9, 0], sizes = [1, 64], strides = [1, 1]} : vector<10x64xf32> to vector<1x64xf32>
    %110 = arith.maximumf %108, %109 : vector<1x64xf32>
    %111 = tpu.concatenate %98, %101, %104, %107, %110 in 1 : vector<1x64xf32>, vector<1x64xf32>, vector<1x64xf32>, vector<1x64xf32>, vector<1x64xf32> -> vector<1x320xf32>
    %112 = vector.extract_strided_slice %35 {offsets = [104, 0], sizes = [10, 64], strides = [1, 1]} : vector<143x64xf32> to vector<10x64xf32>
    %113 = vector.extract_strided_slice %35 {offsets = [117, 0], sizes = [10, 64], strides = [1, 1]} : vector<143x64xf32> to vector<10x64xf32>
    %114 = arith.maximumf %112, %113 : vector<10x64xf32>
    %115 = vector.extract_strided_slice %114 {offsets = [0, 0], sizes = [1, 64], strides = [1, 1]} : vector<10x64xf32> to vector<1x64xf32>
    %116 = vector.extract_strided_slice %114 {offsets = [1, 0], sizes = [1, 64], strides = [1, 1]} : vector<10x64xf32> to vector<1x64xf32>
    %117 = arith.maximumf %115, %116 : vector<1x64xf32>
    %118 = vector.extract_strided_slice %114 {offsets = [2, 0], sizes = [1, 64], strides = [1, 1]} : vector<10x64xf32> to vector<1x64xf32>
    %119 = vector.extract_strided_slice %114 {offsets = [3, 0], sizes = [1, 64], strides = [1, 1]} : vector<10x64xf32> to vector<1x64xf32>
    %120 = arith.maximumf %118, %119 : vector<1x64xf32>
    %121 = vector.extract_strided_slice %114 {offsets = [4, 0], sizes = [1, 64], strides = [1, 1]} : vector<10x64xf32> to vector<1x64xf32>
    %122 = vector.extract_strided_slice %114 {offsets = [5, 0], sizes = [1, 64], strides = [1, 1]} : vector<10x64xf32> to vector<1x64xf32>
    %123 = arith.maximumf %121, %122 : vector<1x64xf32>
    %124 = vector.extract_strided_slice %114 {offsets = [6, 0], sizes = [1, 64], strides = [1, 1]} : vector<10x64xf32> to vector<1x64xf32>
    %125 = vector.extract_strided_slice %114 {offsets = [7, 0], sizes = [1, 64], strides = [1, 1]} : vector<10x64xf32> to vector<1x64xf32>
    %126 = arith.maximumf %124, %125 : vector<1x64xf32>
    %127 = vector.extract_strided_slice %114 {offsets = [8, 0], sizes = [1, 64], strides = [1, 1]} : vector<10x64xf32> to vector<1x64xf32>
    %128 = vector.extract_strided_slice %114 {offsets = [9, 0], sizes = [1, 64], strides = [1, 1]} : vector<10x64xf32> to vector<1x64xf32>
    %129 = arith.maximumf %127, %128 : vector<1x64xf32>
    %130 = tpu.concatenate %117, %120, %123, %126, %129 in 1 : vector<1x64xf32>, vector<1x64xf32>, vector<1x64xf32>, vector<1x64xf32>, vector<1x64xf32> -> vector<1x320xf32>
    %131 = tpu.concatenate %54, %73, %92, %111, %130 in 0 : vector<1x320xf32>, vector<1x320xf32>, vector<1x320xf32>, vector<1x320xf32>, vector<1x320xf32> -> vector<5x320xf32>
    %132 = arith.truncf %131 : vector<5x320xf32> to vector<5x320xbf16>
    %c0_14 = arith.constant 0 : index
    %c0_15 = arith.constant 0 : index
    %c0_16 = arith.constant 0 : index
    %133 = vector.load %arg6[%c0_14, %c0_15, %c0_16] : memref<2x5x320xbf16, #tpu.memory_space<vmem>>, vector<1x5x320xbf16>
    %134 = vector.shape_cast %133 : vector<1x5x320xbf16> to vector<5x320xbf16>
    %135 = vector.shape_cast %132 : vector<5x320xbf16> to vector<1x5x320xbf16>
    tpu.vector_store %arg6[%c0_14, %c0_15, %c0_16], %135 {strides = array<i32>} : memref<2x5x320xbf16, #tpu.memory_space<vmem>>, vector<1x5x320xbf16>,
    %c1 = arith.constant 1 : index
    %c0_17 = arith.constant 0 : index
    %c0_18 = arith.constant 0 : index
    %136 = vector.load %arg1[%c1, %c0_17, %c0_18] : memref<2x169x36xbf16, #tpu.memory_space<vmem>>, vector<1x169x36xbf16>
    %137 = vector.shape_cast %136 : vector<1x169x36xbf16> to vector<169x36xbf16>
    %cst_19 = arith.constant dense<0.000000e+00> : vector<169x128xf32>
    %138 = tpu.matmul %137, %0, %cst_19 {dimension_numbers = #tpu.dot_dimension_numbers<[1], [0], [0], [1], [0, 0, 1, 1], [], []>} : vector<169x36xbf16>, vector<36x128xbf16>, vector<169x128xf32> -> vector<169x128xf32>
    %139 = vector.broadcast %1 : vector<1x128xf32> to vector<169x128xf32>
    %140 = arith.addf %138, %139 : vector<169x128xf32>
    %cst_20 = arith.constant 0.000000e+00 : f32
    %141 = vector.broadcast %cst_20 : f32 to vector<169x128xf32>
    %142 = arith.maximumf %140, %141 : vector<169x128xf32>
    %143 = vector.extract_strided_slice %142 {offsets = [0, 0], sizes = [169, 32], strides = [1, 1]} : vector<169x128xf32> to vector<169x32xf32>
    %144 = vector.extract_strided_slice %142 {offsets = [0, 32], sizes = [169, 32], strides = [1, 1]} : vector<169x128xf32> to vector<169x32xf32>
    %145 = arith.maximumf %143, %144 : vector<169x32xf32>
    %146 = vector.extract_strided_slice %142 {offsets = [0, 64], sizes = [169, 32], strides = [1, 1]} : vector<169x128xf32> to vector<169x32xf32>
    %147 = vector.extract_strided_slice %142 {offsets = [0, 96], sizes = [169, 32], strides = [1, 1]} : vector<169x128xf32> to vector<169x32xf32>
    %148 = arith.maximumf %146, %147 : vector<169x32xf32>
    %149 = arith.maximumf %145, %148 : vector<169x32xf32>
    %cst_21 = arith.constant 0.000000e+00 : f32
    %150 = vector.broadcast %cst_21 : f32 to vector<7x32xf32>
    %151 = tpu.concatenate %149, %150 in 0 : vector<169x32xf32>, vector<7x32xf32> -> vector<176x32xf32>
    %152 = vector.extract_strided_slice %151 {offsets = [0, 0], sizes = [143, 32], strides = [1, 1]} : vector<176x32xf32> to vector<143x32xf32>
    %153 = vector.extract_strided_slice %151 {offsets = [1, 0], sizes = [143, 32], strides = [1, 1]} : vector<176x32xf32> to vector<143x32xf32>
    %154 = vector.extract_strided_slice %151 {offsets = [2, 0], sizes = [143, 32], strides = [1, 1]} : vector<176x32xf32> to vector<143x32xf32>
    %155 = vector.extract_strided_slice %151 {offsets = [13, 0], sizes = [143, 32], strides = [1, 1]} : vector<176x32xf32> to vector<143x32xf32>
    %156 = vector.extract_strided_slice %151 {offsets = [14, 0], sizes = [143, 32], strides = [1, 1]} : vector<176x32xf32> to vector<143x32xf32>
    %157 = vector.extract_strided_slice %151 {offsets = [15, 0], sizes = [143, 32], strides = [1, 1]} : vector<176x32xf32> to vector<143x32xf32>
    %158 = vector.extract_strided_slice %151 {offsets = [26, 0], sizes = [143, 32], strides = [1, 1]} : vector<176x32xf32> to vector<143x32xf32>
    %159 = vector.extract_strided_slice %151 {offsets = [27, 0], sizes = [143, 32], strides = [1, 1]} : vector<176x32xf32> to vector<143x32xf32>
    %160 = vector.extract_strided_slice %151 {offsets = [28, 0], sizes = [143, 32], strides = [1, 1]} : vector<176x32xf32> to vector<143x32xf32>
    %161 = tpu.concatenate %152, %153, %154, %155, %156, %157, %158, %159, %160 in 1 : vector<143x32xf32>, vector<143x32xf32>, vector<143x32xf32>, vector<143x32xf32>, vector<143x32xf32>, vector<143x32xf32>, vector<143x32xf32>, vector<143x32xf32>, vector<143x32xf32> -> vector<143x288xf32>
    %162 = arith.truncf %161 : vector<143x288xf32> to vector<143x288xbf16>
    %cst_22 = arith.constant dense<0.000000e+00> : vector<143x64xf32>
    %163 = tpu.matmul %162, %2, %cst_22 {dimension_numbers = #tpu.dot_dimension_numbers<[1], [0], [0], [1], [0, 0, 1, 1], [], []>} : vector<143x288xbf16>, vector<288x64xbf16>, vector<143x64xf32> -> vector<143x64xf32>
    %164 = vector.broadcast %3 : vector<1x64xf32> to vector<143x64xf32>
    %165 = arith.addf %163, %164 : vector<143x64xf32>
    %cst_23 = arith.constant 0.000000e+00 : f32
    %166 = vector.broadcast %cst_23 : f32 to vector<143x64xf32>
    %167 = arith.maximumf %165, %166 : vector<143x64xf32>
    %168 = vector.extract_strided_slice %167 {offsets = [0, 0], sizes = [10, 64], strides = [1, 1]} : vector<143x64xf32> to vector<10x64xf32>
    %169 = vector.extract_strided_slice %167 {offsets = [13, 0], sizes = [10, 64], strides = [1, 1]} : vector<143x64xf32> to vector<10x64xf32>
    %170 = arith.maximumf %168, %169 : vector<10x64xf32>
    %171 = vector.extract_strided_slice %170 {offsets = [0, 0], sizes = [1, 64], strides = [1, 1]} : vector<10x64xf32> to vector<1x64xf32>
    %172 = vector.extract_strided_slice %170 {offsets = [1, 0], sizes = [1, 64], strides = [1, 1]} : vector<10x64xf32> to vector<1x64xf32>
    %173 = arith.maximumf %171, %172 : vector<1x64xf32>
    %174 = vector.extract_strided_slice %170 {offsets = [2, 0], sizes = [1, 64], strides = [1, 1]} : vector<10x64xf32> to vector<1x64xf32>
    %175 = vector.extract_strided_slice %170 {offsets = [3, 0], sizes = [1, 64], strides = [1, 1]} : vector<10x64xf32> to vector<1x64xf32>
    %176 = arith.maximumf %174, %175 : vector<1x64xf32>
    %177 = vector.extract_strided_slice %170 {offsets = [4, 0], sizes = [1, 64], strides = [1, 1]} : vector<10x64xf32> to vector<1x64xf32>
    %178 = vector.extract_strided_slice %170 {offsets = [5, 0], sizes = [1, 64], strides = [1, 1]} : vector<10x64xf32> to vector<1x64xf32>
    %179 = arith.maximumf %177, %178 : vector<1x64xf32>
    %180 = vector.extract_strided_slice %170 {offsets = [6, 0], sizes = [1, 64], strides = [1, 1]} : vector<10x64xf32> to vector<1x64xf32>
    %181 = vector.extract_strided_slice %170 {offsets = [7, 0], sizes = [1, 64], strides = [1, 1]} : vector<10x64xf32> to vector<1x64xf32>
    %182 = arith.maximumf %180, %181 : vector<1x64xf32>
    %183 = vector.extract_strided_slice %170 {offsets = [8, 0], sizes = [1, 64], strides = [1, 1]} : vector<10x64xf32> to vector<1x64xf32>
    %184 = vector.extract_strided_slice %170 {offsets = [9, 0], sizes = [1, 64], strides = [1, 1]} : vector<10x64xf32> to vector<1x64xf32>
    %185 = arith.maximumf %183, %184 : vector<1x64xf32>
    %186 = tpu.concatenate %173, %176, %179, %182, %185 in 1 : vector<1x64xf32>, vector<1x64xf32>, vector<1x64xf32>, vector<1x64xf32>, vector<1x64xf32> -> vector<1x320xf32>
    %187 = vector.extract_strided_slice %167 {offsets = [26, 0], sizes = [10, 64], strides = [1, 1]} : vector<143x64xf32> to vector<10x64xf32>
    %188 = vector.extract_strided_slice %167 {offsets = [39, 0], sizes = [10, 64], strides = [1, 1]} : vector<143x64xf32> to vector<10x64xf32>
    %189 = arith.maximumf %187, %188 : vector<10x64xf32>
    %190 = vector.extract_strided_slice %189 {offsets = [0, 0], sizes = [1, 64], strides = [1, 1]} : vector<10x64xf32> to vector<1x64xf32>
    %191 = vector.extract_strided_slice %189 {offsets = [1, 0], sizes = [1, 64], strides = [1, 1]} : vector<10x64xf32> to vector<1x64xf32>
    %192 = arith.maximumf %190, %191 : vector<1x64xf32>
    %193 = vector.extract_strided_slice %189 {offsets = [2, 0], sizes = [1, 64], strides = [1, 1]} : vector<10x64xf32> to vector<1x64xf32>
    %194 = vector.extract_strided_slice %189 {offsets = [3, 0], sizes = [1, 64], strides = [1, 1]} : vector<10x64xf32> to vector<1x64xf32>
    %195 = arith.maximumf %193, %194 : vector<1x64xf32>
    %196 = vector.extract_strided_slice %189 {offsets = [4, 0], sizes = [1, 64], strides = [1, 1]} : vector<10x64xf32> to vector<1x64xf32>
    %197 = vector.extract_strided_slice %189 {offsets = [5, 0], sizes = [1, 64], strides = [1, 1]} : vector<10x64xf32> to vector<1x64xf32>
    %198 = arith.maximumf %196, %197 : vector<1x64xf32>
    %199 = vector.extract_strided_slice %189 {offsets = [6, 0], sizes = [1, 64], strides = [1, 1]} : vector<10x64xf32> to vector<1x64xf32>
    %200 = vector.extract_strided_slice %189 {offsets = [7, 0], sizes = [1, 64], strides = [1, 1]} : vector<10x64xf32> to vector<1x64xf32>
    %201 = arith.maximumf %199, %200 : vector<1x64xf32>
    %202 = vector.extract_strided_slice %189 {offsets = [8, 0], sizes = [1, 64], strides = [1, 1]} : vector<10x64xf32> to vector<1x64xf32>
    %203 = vector.extract_strided_slice %189 {offsets = [9, 0], sizes = [1, 64], strides = [1, 1]} : vector<10x64xf32> to vector<1x64xf32>
    %204 = arith.maximumf %202, %203 : vector<1x64xf32>
    %205 = tpu.concatenate %192, %195, %198, %201, %204 in 1 : vector<1x64xf32>, vector<1x64xf32>, vector<1x64xf32>, vector<1x64xf32>, vector<1x64xf32> -> vector<1x320xf32>
    %206 = vector.extract_strided_slice %167 {offsets = [52, 0], sizes = [10, 64], strides = [1, 1]} : vector<143x64xf32> to vector<10x64xf32>
    %207 = vector.extract_strided_slice %167 {offsets = [65, 0], sizes = [10, 64], strides = [1, 1]} : vector<143x64xf32> to vector<10x64xf32>
    %208 = arith.maximumf %206, %207 : vector<10x64xf32>
    %209 = vector.extract_strided_slice %208 {offsets = [0, 0], sizes = [1, 64], strides = [1, 1]} : vector<10x64xf32> to vector<1x64xf32>
    %210 = vector.extract_strided_slice %208 {offsets = [1, 0], sizes = [1, 64], strides = [1, 1]} : vector<10x64xf32> to vector<1x64xf32>
    %211 = arith.maximumf %209, %210 : vector<1x64xf32>
    %212 = vector.extract_strided_slice %208 {offsets = [2, 0], sizes = [1, 64], strides = [1, 1]} : vector<10x64xf32> to vector<1x64xf32>
    %213 = vector.extract_strided_slice %208 {offsets = [3, 0], sizes = [1, 64], strides = [1, 1]} : vector<10x64xf32> to vector<1x64xf32>
    %214 = arith.maximumf %212, %213 : vector<1x64xf32>
    %215 = vector.extract_strided_slice %208 {offsets = [4, 0], sizes = [1, 64], strides = [1, 1]} : vector<10x64xf32> to vector<1x64xf32>
    %216 = vector.extract_strided_slice %208 {offsets = [5, 0], sizes = [1, 64], strides = [1, 1]} : vector<10x64xf32> to vector<1x64xf32>
    %217 = arith.maximumf %215, %216 : vector<1x64xf32>
    %218 = vector.extract_strided_slice %208 {offsets = [6, 0], sizes = [1, 64], strides = [1, 1]} : vector<10x64xf32> to vector<1x64xf32>
    %219 = vector.extract_strided_slice %208 {offsets = [7, 0], sizes = [1, 64], strides = [1, 1]} : vector<10x64xf32> to vector<1x64xf32>
    %220 = arith.maximumf %218, %219 : vector<1x64xf32>
    %221 = vector.extract_strided_slice %208 {offsets = [8, 0], sizes = [1, 64], strides = [1, 1]} : vector<10x64xf32> to vector<1x64xf32>
    %222 = vector.extract_strided_slice %208 {offsets = [9, 0], sizes = [1, 64], strides = [1, 1]} : vector<10x64xf32> to vector<1x64xf32>
    %223 = arith.maximumf %221, %222 : vector<1x64xf32>
    %224 = tpu.concatenate %211, %214, %217, %220, %223 in 1 : vector<1x64xf32>, vector<1x64xf32>, vector<1x64xf32>, vector<1x64xf32>, vector<1x64xf32> -> vector<1x320xf32>
    %225 = vector.extract_strided_slice %167 {offsets = [78, 0], sizes = [10, 64], strides = [1, 1]} : vector<143x64xf32> to vector<10x64xf32>
    %226 = vector.extract_strided_slice %167 {offsets = [91, 0], sizes = [10, 64], strides = [1, 1]} : vector<143x64xf32> to vector<10x64xf32>
    %227 = arith.maximumf %225, %226 : vector<10x64xf32>
    %228 = vector.extract_strided_slice %227 {offsets = [0, 0], sizes = [1, 64], strides = [1, 1]} : vector<10x64xf32> to vector<1x64xf32>
    %229 = vector.extract_strided_slice %227 {offsets = [1, 0], sizes = [1, 64], strides = [1, 1]} : vector<10x64xf32> to vector<1x64xf32>
    %230 = arith.maximumf %228, %229 : vector<1x64xf32>
    %231 = vector.extract_strided_slice %227 {offsets = [2, 0], sizes = [1, 64], strides = [1, 1]} : vector<10x64xf32> to vector<1x64xf32>
    %232 = vector.extract_strided_slice %227 {offsets = [3, 0], sizes = [1, 64], strides = [1, 1]} : vector<10x64xf32> to vector<1x64xf32>
    %233 = arith.maximumf %231, %232 : vector<1x64xf32>
    %234 = vector.extract_strided_slice %227 {offsets = [4, 0], sizes = [1, 64], strides = [1, 1]} : vector<10x64xf32> to vector<1x64xf32>
    %235 = vector.extract_strided_slice %227 {offsets = [5, 0], sizes = [1, 64], strides = [1, 1]} : vector<10x64xf32> to vector<1x64xf32>
    %236 = arith.maximumf %234, %235 : vector<1x64xf32>
    %237 = vector.extract_strided_slice %227 {offsets = [6, 0], sizes = [1, 64], strides = [1, 1]} : vector<10x64xf32> to vector<1x64xf32>
    %238 = vector.extract_strided_slice %227 {offsets = [7, 0], sizes = [1, 64], strides = [1, 1]} : vector<10x64xf32> to vector<1x64xf32>
    %239 = arith.maximumf %237, %238 : vector<1x64xf32>
    %240 = vector.extract_strided_slice %227 {offsets = [8, 0], sizes = [1, 64], strides = [1, 1]} : vector<10x64xf32> to vector<1x64xf32>
    %241 = vector.extract_strided_slice %227 {offsets = [9, 0], sizes = [1, 64], strides = [1, 1]} : vector<10x64xf32> to vector<1x64xf32>
    %242 = arith.maximumf %240, %241 : vector<1x64xf32>
    %243 = tpu.concatenate %230, %233, %236, %239, %242 in 1 : vector<1x64xf32>, vector<1x64xf32>, vector<1x64xf32>, vector<1x64xf32>, vector<1x64xf32> -> vector<1x320xf32>
    %244 = vector.extract_strided_slice %167 {offsets = [104, 0], sizes = [10, 64], strides = [1, 1]} : vector<143x64xf32> to vector<10x64xf32>
    %245 = vector.extract_strided_slice %167 {offsets = [117, 0], sizes = [10, 64], strides = [1, 1]} : vector<143x64xf32> to vector<10x64xf32>
    %246 = arith.maximumf %244, %245 : vector<10x64xf32>
    %247 = vector.extract_strided_slice %246 {offsets = [0, 0], sizes = [1, 64], strides = [1, 1]} : vector<10x64xf32> to vector<1x64xf32>
    %248 = vector.extract_strided_slice %246 {offsets = [1, 0], sizes = [1, 64], strides = [1, 1]} : vector<10x64xf32> to vector<1x64xf32>
    %249 = arith.maximumf %247, %248 : vector<1x64xf32>
    %250 = vector.extract_strided_slice %246 {offsets = [2, 0], sizes = [1, 64], strides = [1, 1]} : vector<10x64xf32> to vector<1x64xf32>
    %251 = vector.extract_strided_slice %246 {offsets = [3, 0], sizes = [1, 64], strides = [1, 1]} : vector<10x64xf32> to vector<1x64xf32>
    %252 = arith.maximumf %250, %251 : vector<1x64xf32>
    %253 = vector.extract_strided_slice %246 {offsets = [4, 0], sizes = [1, 64], strides = [1, 1]} : vector<10x64xf32> to vector<1x64xf32>
    %254 = vector.extract_strided_slice %246 {offsets = [5, 0], sizes = [1, 64], strides = [1, 1]} : vector<10x64xf32> to vector<1x64xf32>
    %255 = arith.maximumf %253, %254 : vector<1x64xf32>
    %256 = vector.extract_strided_slice %246 {offsets = [6, 0], sizes = [1, 64], strides = [1, 1]} : vector<10x64xf32> to vector<1x64xf32>
    %257 = vector.extract_strided_slice %246 {offsets = [7, 0], sizes = [1, 64], strides = [1, 1]} : vector<10x64xf32> to vector<1x64xf32>
    %258 = arith.maximumf %256, %257 : vector<1x64xf32>
    %259 = vector.extract_strided_slice %246 {offsets = [8, 0], sizes = [1, 64], strides = [1, 1]} : vector<10x64xf32> to vector<1x64xf32>
    %260 = vector.extract_strided_slice %246 {offsets = [9, 0], sizes = [1, 64], strides = [1, 1]} : vector<10x64xf32> to vector<1x64xf32>
    %261 = arith.maximumf %259, %260 : vector<1x64xf32>
    %262 = tpu.concatenate %249, %252, %255, %258, %261 in 1 : vector<1x64xf32>, vector<1x64xf32>, vector<1x64xf32>, vector<1x64xf32>, vector<1x64xf32> -> vector<1x320xf32>
    %263 = tpu.concatenate %186, %205, %224, %243, %262 in 0 : vector<1x320xf32>, vector<1x320xf32>, vector<1x320xf32>, vector<1x320xf32>, vector<1x320xf32> -> vector<5x320xf32>
    %264 = arith.truncf %263 : vector<5x320xf32> to vector<5x320xbf16>
    %c1_24 = arith.constant 1 : index
    %c0_25 = arith.constant 0 : index
    %c0_26 = arith.constant 0 : index
    %265 = vector.load %arg6[%c1_24, %c0_25, %c0_26] : memref<2x5x320xbf16, #tpu.memory_space<vmem>>, vector<1x5x320xbf16>
    %266 = vector.shape_cast %265 : vector<1x5x320xbf16> to vector<5x320xbf16>
    %267 = vector.shape_cast %264 : vector<5x320xbf16> to vector<1x5x320xbf16>
    tpu.vector_store %arg6[%c1_24, %c0_25, %c0_26], %267 {strides = array<i32>} : memref<2x5x320xbf16, #tpu.memory_space<vmem>>, vector<1x5x320xbf16>,
    return
  }
  func.func @transform_0(%arg0: i32) -> (i32, i32, i32) {
    %c0_i32 = arith.constant 0 : i32
    %c0_i32_0 = arith.constant 0 : i32
    %c0_i32_1 = arith.constant 0 : i32
    return %arg0, %c0_i32, %c0_i32_0 : i32, i32, i32
  }
  func.func @transform_1(%arg0: i32) -> (i32, i32) {
    %c0_i32 = arith.constant 0 : i32
    %c0_i32_0 = arith.constant 0 : i32
    %c0_i32_1 = arith.constant 0 : i32
    return %c0_i32, %c0_i32_0 : i32, i32
  }
  func.func @transform_2(%arg0: i32) -> (i32, i32) {
    %c0_i32 = arith.constant 0 : i32
    %c0_i32_0 = arith.constant 0 : i32
    %c0_i32_1 = arith.constant 0 : i32
    return %c0_i32, %c0_i32_0 : i32, i32
  }
  func.func @transform_3(%arg0: i32) -> (i32, i32) {
    %c0_i32 = arith.constant 0 : i32
    %c0_i32_0 = arith.constant 0 : i32
    %c0_i32_1 = arith.constant 0 : i32
    return %c0_i32, %c0_i32_0 : i32, i32
  }
  func.func @transform_4(%arg0: i32) -> (i32, i32) {
    %c0_i32 = arith.constant 0 : i32
    %c0_i32_0 = arith.constant 0 : i32
    %c0_i32_1 = arith.constant 0 : i32
    return %c0_i32, %c0_i32_0 : i32, i32
  }
  func.func @transform_5(%arg0: i32) -> (i32, i32, i32) {
    %c0_i32 = arith.constant 0 : i32
    %c0_i32_0 = arith.constant 0 : i32
    %c0_i32_1 = arith.constant 0 : i32
    return %arg0, %c0_i32, %c0_i32_0 : i32, i32, i32
  }
}

module attributes {stable_mosaic.version = 11 : i64} {
  func.func @_mlp_kernel(%arg0: i32, %arg1: memref<2x1600xbf16, #tpu.memory_space<vmem>>, %arg2: memref<1600x64xbf16, #tpu.memory_space<vmem>>, %arg3: memref<1x64xf32, #tpu.memory_space<vmem>>, %arg4: memref<64x128xbf16, #tpu.memory_space<vmem>>, %arg5: memref<1x128xf32, #tpu.memory_space<vmem>>, %arg6: memref<2x128xf32, #tpu.memory_space<vmem>>) attributes {dimension_semantics = [#tpu.dimension_semantics<parallel>], iteration_bounds = array<i64: 1>, scalar_prefetch = 0 : i64, scratch_operands = 0 : i64, tpu.core_type = #tpu.core_type<tc>, window_params = [{transform_indices = @transform_0, window_bounds = array<i64: 2, 1600>}, {pipeline_mode = #tpu.pipeline_mode<synchronous>, transform_indices = @transform_1, window_bounds = array<i64: 1600, 64>}, {pipeline_mode = #tpu.pipeline_mode<synchronous>, transform_indices = @transform_2, window_bounds = array<i64: 1, 64>}, {pipeline_mode = #tpu.pipeline_mode<synchronous>, transform_indices = @transform_3, window_bounds = array<i64: 64, 128>}, {pipeline_mode = #tpu.pipeline_mode<synchronous>, transform_indices = @transform_4, window_bounds = array<i64: 1, 128>}, {transform_indices = @transform_5, window_bounds = array<i64: 2, 128>}]} {
    %c0 = arith.constant 0 : index
    %c0_0 = arith.constant 0 : index
    %0 = vector.load %arg1[%c0, %c0_0] : memref<2x1600xbf16, #tpu.memory_space<vmem>>, vector<2x1600xbf16>
    %c0_1 = arith.constant 0 : index
    %c0_2 = arith.constant 0 : index
    %1 = vector.load %arg2[%c0_1, %c0_2] : memref<1600x64xbf16, #tpu.memory_space<vmem>>, vector<1600x64xbf16>
    %cst = arith.constant dense<0.000000e+00> : vector<2x64xf32>
    %2 = tpu.matmul %0, %1, %cst {dimension_numbers = #tpu.dot_dimension_numbers<[1], [0], [0], [1], [0, 0, 1, 1], [], []>} : vector<2x1600xbf16>, vector<1600x64xbf16>, vector<2x64xf32> -> vector<2x64xf32>
    %c0_3 = arith.constant 0 : index
    %c0_4 = arith.constant 0 : index
    %3 = vector.load %arg3[%c0_3, %c0_4] : memref<1x64xf32, #tpu.memory_space<vmem>>, vector<1x64xf32>
    %4 = vector.broadcast %3 : vector<1x64xf32> to vector<2x64xf32>
    %5 = arith.addf %2, %4 : vector<2x64xf32>
    %cst_5 = arith.constant 0.000000e+00 : f32
    %6 = vector.broadcast %cst_5 : f32 to vector<2x64xf32>
    %7 = arith.maximumf %5, %6 : vector<2x64xf32>
    %8 = arith.truncf %7 : vector<2x64xf32> to vector<2x64xbf16>
    %c0_6 = arith.constant 0 : index
    %c0_7 = arith.constant 0 : index
    %9 = vector.load %arg4[%c0_6, %c0_7] : memref<64x128xbf16, #tpu.memory_space<vmem>>, vector<64x128xbf16>
    %cst_8 = arith.constant dense<0.000000e+00> : vector<2x128xf32>
    %10 = tpu.matmul %8, %9, %cst_8 {dimension_numbers = #tpu.dot_dimension_numbers<[1], [0], [0], [1], [0, 0, 1, 1], [], []>} : vector<2x64xbf16>, vector<64x128xbf16>, vector<2x128xf32> -> vector<2x128xf32>
    %c0_9 = arith.constant 0 : index
    %c0_10 = arith.constant 0 : index
    %11 = vector.load %arg5[%c0_9, %c0_10] : memref<1x128xf32, #tpu.memory_space<vmem>>, vector<1x128xf32>
    %12 = vector.broadcast %11 : vector<1x128xf32> to vector<2x128xf32>
    %13 = arith.addf %10, %12 : vector<2x128xf32>
    %c0_11 = arith.constant 0 : index
    %c0_12 = arith.constant 0 : index
    %14 = vector.load %arg6[%c0_11, %c0_12] : memref<2x128xf32, #tpu.memory_space<vmem>>, vector<2x128xf32>
    tpu.vector_store %arg6[%c0_11, %c0_12], %13 {strides = array<i32>} : memref<2x128xf32, #tpu.memory_space<vmem>>, vector<2x128xf32>,
    return
  }
  func.func @transform_0(%arg0: i32) -> (i32, i32) {
    %c0_i32 = arith.constant 0 : i32
    %c0_i32_0 = arith.constant 0 : i32
    return %arg0, %c0_i32 : i32, i32
  }
  func.func @transform_1(%arg0: i32) -> (i32, i32) {
    %c0_i32 = arith.constant 0 : i32
    %c0_i32_0 = arith.constant 0 : i32
    %c0_i32_1 = arith.constant 0 : i32
    return %c0_i32, %c0_i32_0 : i32, i32
  }
  func.func @transform_2(%arg0: i32) -> (i32, i32) {
    %c0_i32 = arith.constant 0 : i32
    %c0_i32_0 = arith.constant 0 : i32
    %c0_i32_1 = arith.constant 0 : i32
    return %c0_i32, %c0_i32_0 : i32, i32
  }
  func.func @transform_3(%arg0: i32) -> (i32, i32) {
    %c0_i32 = arith.constant 0 : i32
    %c0_i32_0 = arith.constant 0 : i32
    %c0_i32_1 = arith.constant 0 : i32
    return %c0_i32, %c0_i32_0 : i32, i32
  }
  func.func @transform_4(%arg0: i32) -> (i32, i32) {
    %c0_i32 = arith.constant 0 : i32
    %c0_i32_0 = arith.constant 0 : i32
    %c0_i32_1 = arith.constant 0 : i32
    return %c0_i32, %c0_i32_0 : i32, i32
  }
  func.func @transform_5(%arg0: i32) -> (i32, i32) {
    %c0_i32 = arith.constant 0 : i32
    %c0_i32_0 = arith.constant 0 : i32
    return %arg0, %c0_i32 : i32, i32
  }
}

</mosaic_0001>

<bundles_post_ra>
// kernel: tile.8
= control target key start
LH: loop header
LB: loop body
LE: loop exit
PB: predicated region body
PF: predicated region fallthrough
CT: control target
= control target key end

     0   :  { %s22_s0 = inlined_call_operand.vmem [shape: f32[32], index: 0, kind: input, shape index: {}]   ;;  %s23_s1 = inlined_call_operand.vmem [shape: f32[4,32], index: 1, kind: output, shape index: {}]  }
   0x1   :  { %v4_v0 = vld [vmem:[%s22_s0] ss:$0 sm:$0xff] }
   0x2   :  { %5 = vst [vmem:[%s23_s1] sm:$0xf] %v4_v0 }

// kernel: tile.9
= control target key start
LH: loop header
LB: loop body
LE: loop exit
PB: predicated region body
PF: predicated region fallthrough
CT: control target
= control target key end

     0   :  { %s37_s8 = smov 32   ;;  %s38_s9 = smov 64   ;;  %vm7_vm0 = vcmask 261120   ;;  %vm13_vm1 = vcmask 1048320   ;;  %vm19_vm2 = vcmask 785920   ;;  %vm25_vm3 = vcmask 523520   ;;  %s55_s0 = inlined_call_operand.vmem [shape: f32[4,32], index: 0, kind: input, shape index: {}]   ;;  %s56_s1 = inlined_call_operand.vmem [shape: f32[1,128], index: 1, kind: output, shape index: {}]  }
   0x1   :  { %v4_v0 = vld [vmem:[%s55_s0] sm:$0xf]  ;;  %s36_s0 = smov 96  }
   0x2   :  { %5 = vst [vmem:[#allocation1] sm:$0xf] %v4_v0 }
   0x9   :  { %v10_v1 = vld [vmem:[#allocation1 + $0x3] sm:$0x1]   ;;  %v22_v2 = vld [vmem:[#allocation1 + $0x1] sm:$0x1]   ;;  %v16_v3 = vld [vmem:[#allocation1 + $0x2] sm:$0x1]  }
   0xa   :  { %11 = vrot.lane.b32.xlu0 %v10_v1, %s36_s0  ;;  %23 = vrot.lane.b32.xlu1 %v22_v2, %s37_s8  ;;  %v6_v4 = vld [vmem:[#allocation1] sm:$0x1]  }
   0xb   :  { %8 = vst.msk [vmem:[#allocation0] sm:$0x1] %vm7_vm0, %v6_v4  }
  0x12   :  { %17 = vrot.lane.b32.xlu0 %v16_v3, %s38_s9 }
  0x7c   :  { %v12_v5 = vpop.permute.xlu0 %11   ;;  %v24_v6 = vpop.permute.xlu1 %23  }
  0x7d   :  { %14 = vst.msk [vmem:[#allocation0] sm:$0x1] %vm13_vm1, %v12_v5  }
  0x84   :  { %v18_v7 = vpop.permute.xlu0 %17  }
  0x85   :  { %20 = vst.msk [vmem:[#allocation0] sm:$0x1] %vm19_vm2, %v18_v7  }
  0x86   :  { %26 = vst.msk [vmem:[#allocation0] sm:$0x1] %vm25_vm3, %v24_v6  }
  0x8d   :  { %v29_v8 = vld [vmem:[#allocation0] sm:$0x1] }
  0x8e   :  { %32 = vst [vmem:[%s56_s1] sm:$0x1] %v29_v8 }

// kernel: forward.2
= control target key start
LH: loop header
LB: loop body
LE: loop exit
PB: predicated region body
PF: predicated region fallthrough
CT: control target
= control target key end

     0   :  { %vm7038_vm0 = vcmask 1041408   ;;  %vm159_vm1 = vcmask 293888   ;;  %s4354_s18 = smov 96   ;;  %s4355_s25 = smov 64   ;;  %vm523_vm2 = vcmask 1046528   ;;  %vm614_vm3 = vcmask 1045504   ;;  %s7031_s1 = inlined_call_operand.vmem [shape: bf16[36,128], index: 1, kind: input, shape index: {}]   ;;  %s7032_s2 = inlined_call_operand.vmem [shape: f32[1,128], index: 2, kind: input, shape index: {}]   ;;  %s7033_s0 = inlined_call_operand.vmem [shape: bf16[2,169,36], index: 0, kind: input, shape index: {}]   ;;  %s7034_s3 = inlined_call_operand.vmem [shape: bf16[288,64], index: 3, kind: input, shape index: {}]   ;;  %s7035_s4 = inlined_call_operand.vmem [shape: f32[1,64], index: 4, kind: input, shape index: {}]   ;;  %s7036_s5 = inlined_call_operand.vmem [shape: bf16[2,5,320], index: 5, kind: output, shape index: {}]  }
   0x1   :  { %v25_v0 = vld [vmem:[%s7031_s1 + $0x10] sm:$0x3]  ;;  %v4397_v4 = vld [vmem:[%s7031_s1 + $0x8] sm:$0xff]  ;;  %v4403_v5 = vld [vmem:[%s7031_s1] sm:$0xff]  ;;  %s4356_s1 = smov 32   ;;  %vm707_vm4 = vcmask 1042432  }
   0x2   :  { %v153_v1 = vunpack.c.l.b16 %v25_v0  ;;  %v3594_v6 = vld [vmem:[%s7033_s0] sm:$0xff]  ;;  %v3595_v7 = vld [vmem:[%s7033_s0 + $0x8] sm:$0xff]  ;;  %v3596_v8 = vld [vmem:[%s7033_s0 + $0x10] sm:$0xff]  ;;  %vm1054_vm5 = vcmask 1043456   ;;  %vm1110_vm6 = vcmask 261120   ;;  %vm503_vm7 = vcmask 1040384  }
   0x3   :  { %v3597_v9 = vld [vmem:[%s7033_s0 + $0x18] sm:$0xff]  ;;  %v3598_v10 = vld [vmem:[%s7033_s0 + $0x20] sm:$0xff]  ;;  %v3599_v11 = vld [vmem:[%s7033_s0 + $0x28] sm:$0xff]  ;;  %vm962_vm8 = vcmask 1044480   ;;  %vm1129_vm9 = vcmask 523264   ;;  %vm7037_vm10 = vcmask 785408  }
   0x4   :  { %v156_v2 = vpack.c.b16 %v153_v1, %v153_v1  ;;  %v3600_v12 = vld [vmem:[%s7033_s0 + $0x30] sm:$0xff]  ;;  %v3601_v13 = vld [vmem:[%s7033_s0 + $0x38] sm:$0xff]  ;;  %v3602_v14 = vld [vmem:[%s7033_s0 + $0x40] sm:$0xff]  ;;  %vm1761_vm11 = vsmask.f32 2304  ;;  %vm1770_vm12 = vcmask 518144  }
   0x5   :  { %v4444_v16 = vld [vmem:[%s7032_s2] ss:$0 sm:$0xff]  ;;  %v3603_v23 = vld [vmem:[%s7033_s0 + $0x48] sm:$0xff]  ;;  %v3382_v30 = vld [vmem:[%s7033_s0 + $0x50] sm:$0xf]  ;;  %vm1763_vm14 = vcmask 1046532  }
   0x6   :  { %v4391_v3 = vsel %vm7038_vm0, %v156_v2, 0  ;;  %v3604_v31 = vld [vmem:[%s7033_s0 + $0x50] sm:$0x10]  ;;  %vm5799_vm13 = vmand %vm1770_vm12, %vm1761_vm11  ;;  %vm1764_vm15 = vsmask.f32 6400 }
   0x7   :  { %202 = vmatpush.bf16.msra.mxu0 %v4391_v3  ;;  %v3383_v33 = vor.u32 %v3604_v31, %v3382_v30  ;;  %vm5923_vm12 = vmand %vm707_vm4, %vm1761_vm11 }
   0xb   :  { %203 = vmatpush.bf16.msra.mxu0 %v4397_v4 }
   0xf   :  { %204 = vmatpush.bf16.msra.mxu0 %v4403_v5 }
  0x12   :  { %3392 = vmatmul.msk.bf16.vlgmr.msra.gmra.mxu0 %vm159_vm1, %v3594_v6 }
  0x22   :  { %3393 = vmatmul.msk.bf16.gmra.mxu0 %vm159_vm1, %v3595_v7 }
  0x32   :  { %3394 = vmatmul.msk.bf16.gmra.mxu0 %vm159_vm1, %v3596_v8 }
  0x42   :  { %3395 = vmatmul.msk.bf16.gmra.mxu0 %vm159_vm1, %v3597_v9 }
  0x52   :  { %3396 = vmatmul.msk.bf16.gmra.mxu0 %vm159_vm1, %v3598_v10 }
  0x62   :  { %3397 = vmatmul.msk.bf16.gmra.mxu0 %vm159_vm1, %v3599_v11 }
  0x72   :  { %3398 = vmatmul.msk.bf16.gmra.mxu0 %vm159_vm1, %v3600_v12 }
  0x82   :  { %3399 = vmatmul.msk.bf16.gmra.mxu0 %vm159_vm1, %v3601_v13 }
  0x8f   :  { %v206_v15 = vpop.f32.mrf.mxu0 }
  0x90   :  { %v4448_v17 = vadd.f32 %v4444_v16, %v206_v15 }
  0x92   :  { %3400 = vmatmul.msk.bf16.gmra.mxu0 %vm159_vm1, %v3602_v14  ;;  %v261_v20 = vmax.f32 %v4448_v17, 0.0 }
  0x97   :  { %v208_v18 = vpop.f32.mrf.mxu0 }
  0x98   :  { %v4451_v19 = vadd.f32 %v4444_v16, %v208_v18 }
  0x9a   :  { %v262_v21 = vmax.f32 %v4451_v19, 0.0 }
  0x9c   :  { %v3619_v22 = vpack.i.bf16 %v262_v21, %v261_v20 }
  0x9e   :  { %3620 = vrot.lane.b32.xlu0 %v3619_v22, %s4354_s18 }
  0x9f   :  { %v211_v24 = vpop.f32.mrf.mxu0 }
  0xa0   :  { %v4465_v25 = vadd.f32 %v4444_v16, %v211_v24 }
  0xa2   :  { %3401 = vmatmul.msk.bf16.gmra.mxu0 %vm159_vm1, %v3603_v23  ;;  %v263_v28 = vmax.f32 %v4465_v25, 0.0 }
  0xa7   :  { %v213_v26 = vpop.f32.mrf.mxu0 }
  0xa8   :  { %v4468_v27 = vadd.f32 %v4444_v16, %v213_v26 }
  0xaa   :  { %v264_v29 = vmax.f32 %v4468_v27, 0.0 }
  0xac   :  { %v3624_v32 = vpack.i.bf16 %v264_v29, %v263_v28 }
  0xae   :  { %3625 = vrot.lane.b32.xlu0 %v3624_v32, %s4354_s18 }
  0xaf   :  { %v216_v34 = vpop.f32.mrf.mxu0 }
  0xb0   :  { %v4485_v35 = vadd.f32 %v4444_v16, %v216_v34 }
  0xb2   :  { %3402 = vmatmul.msk.bf16.gmra.mxu0 %vm159_vm1, %v3383_v33  ;;  %v265_v38 = vmax.f32 %v4485_v35, 0.0 }
  0xb7   :  { %v218_v36 = vpop.f32.mrf.mxu0 }
  0xb8   :  { %v4488_v37 = vadd.f32 %v4444_v16, %v218_v36 }
  0xba   :  { %v266_v39 = vmax.f32 %v4488_v37, 0.0 }
  0xbc   :  { %v3629_v40 = vpack.i.bf16 %v266_v39, %v265_v38 }
  0xbe   :  { %3630 = vrot.lane.b32.xlu1 %v3629_v40, %s4354_s18 }
  0xbf   :  { %v221_v41 = vpop.f32.mrf.mxu0 }
  0xc0   :  { %v4498_v42 = vadd.f32 %v4444_v16, %v221_v41 }
  0xc2   :  { %v267_v45 = vmax.f32 %v4498_v42, 0.0 }
  0xc7   :  { %v223_v43 = vpop.f32.mrf.mxu0 }
  0xc8   :  { %v4501_v44 = vadd.f32 %v4444_v16, %v223_v43 }
  0xca   :  { %v268_v46 = vmax.f32 %v4501_v44, 0.0 }
  0xcc   :  { %v3634_v47 = vpack.i.bf16 %v268_v46, %v267_v45 }
  0xce   :  { %3635 = vrot.lane.b32.xlu1 %v3634_v47, %s4354_s18 }
  0xcf   :  { %v226_v48 = vpop.f32.mrf.mxu0 }
  0xd0   :  { %v4511_v49 = vadd.f32 %v4444_v16, %v226_v48 }
  0xd2   :  { %v269_v52 = vmax.f32 %v4511_v49, 0.0 }
  0xd7   :  { %v228_v50 = vpop.f32.mrf.mxu0 }
  0xd8   :  { %v4514_v51 = vadd.f32 %v4444_v16, %v228_v50 }
  0xda   :  { %v270_v53 = vmax.f32 %v4514_v51, 0.0 }
  0xdc   :  { %v3639_v54 = vpack.i.bf16 %v270_v53, %v269_v52 }
  0xde   :  { %3640 = vrot.lane.b32.xlu2 %v3639_v54, %s4354_s18 }
  0xdf   :  { %v231_v55 = vpop.f32.mrf.mxu0 }
  0xe0   :  { %v4524_v56 = vadd.f32 %v4444_v16, %v231_v55 }
  0xe2   :  { %v271_v59 = vmax.f32 %v4524_v56, 0.0 }
  0xe7   :  { %v233_v57 = vpop.f32.mrf.mxu0 }
  0xe8   :  { %v4527_v58 = vadd.f32 %v4444_v16, %v233_v57 }
  0xea   :  { %v272_v60 = vmax.f32 %v4527_v58, 0.0 }
  0xec   :  { %v3644_v61 = vpack.i.bf16 %v272_v60, %v271_v59 }
  0xee   :  { %3645 = vrot.lane.b32.xlu2 %v3644_v61, %s4354_s18 }
  0xef   :  { %v236_v62 = vpop.f32.mrf.mxu0 }
  0xf0   :  { %v4537_v63 = vadd.f32 %v4444_v16, %v236_v62 }
  0xf2   :  { %v273_v2 = vmax.f32 %v4537_v63, 0.0 }
  0xf7   :  { %v238_v0 = vpop.f32.mrf.mxu0 }
  0xf8   :  { %v4540_v1 = vadd.f32 %v4444_v16, %v238_v0 }
  0xfa   :  { %v274_v6 = vmax.f32 %v4540_v1, 0.0 }
  0xfc   :  { %v3649_v7 = vpack.i.bf16 %v274_v6, %v273_v2 }
  0xfe   :  { %3650 = vrot.lane.b32.xlu0 %v3649_v7, %s4354_s18 }
  0xff   :  { %v241_v8 = vpop.f32.mrf.mxu0 }
 0x100   :  { %v4550_v9 = vadd.f32 %v4444_v16, %v241_v8 }
 0x102   :  { %v275_v12 = vmax.f32 %v4550_v9, 0.0 }
 0x107   :  { %v243_v10 = vpop.f32.mrf.mxu0 }
 0x108   :  { %v4553_v11 = vadd.f32 %v4444_v16, %v243_v10 }
 0x10a   :  { %v276_v13 = vmax.f32 %v4553_v11, 0.0  ;;  %v3592_v11 = vld [vmem:[%s7034_s3 + $0x80] sm:$0xff] }
 0x10c   :  { %v3654_v14 = vpack.i.bf16 %v276_v13, %v275_v12 }
 0x10e   :  { %3655 = vrot.lane.b32.xlu1 %v3654_v14, %s4354_s18 }
 0x10f   :  { %v246_v15 = vpop.f32.mrf.mxu0 }
 0x110   :  { %v3621_v18 = vpop.permute.xlu0 %3620  ;;  %v4573_v31 = vadd.f32 %v4444_v16, %v246_v15 }
 0x111   :  { %v3623_v22 = vunpack.i.h.bf16 %v3621_v18  ;;  %v3622_v23 = vunpack.i.l.bf16 %v3621_v18 }
 0x112   :  { %v277_v19 = vmax.f32 %v4573_v31, 0.0 }
 0x113   :  { %v4564_v24 = vmax.f32 %v262_v21, %v3623_v22  ;;  %v4568_v26 = vmax.f32 %v261_v20, %v3622_v23 }
 0x115   :  { %v3659_v30 = vpack.i.bf16 %v4564_v24, %v4568_v26 }
 0x117   :  { %v248_v32 = vpop.f32.mrf.mxu0  ;;  %3660 = vrot.lane.b32.xlu2 %v3659_v30, %s4355_s25 }
 0x118   :  { %v4577_v33 = vadd.f32 %v4444_v16, %v248_v32 }
 0x11a   :  { %v278_v21 = vmax.f32 %v4577_v33, 0.0 }
 0x11c   :  { %v3664_v17 = vpack.i.bf16 %v278_v21, %v277_v19 }
 0x11f   :  { %v251_v20 = vpop.f32.mrf.mxu0  ;;  %3665 = vrot.lane.b32.xlu2 %v3664_v17, %s4354_s18 }
 0x120   :  { %v3626_v34 = vpop.permute.xlu0 %3625  ;;  %v4597_v48 = vadd.f32 %v4444_v16, %v251_v20 }
 0x121   :  { %v3628_v36 = vunpack.i.h.bf16 %v3626_v34  ;;  %v3627_v40 = vunpack.i.l.bf16 %v3626_v34 }
 0x122   :  { %v279_v27 = vmax.f32 %v4597_v48, 0.0 }
 0x123   :  { %v4588_v41 = vmax.f32 %v264_v29, %v3628_v36  ;;  %v4592_v43 = vmax.f32 %v263_v28, %v3627_v40 }
 0x125   :  { %v3669_v47 = vpack.i.bf16 %v4588_v41, %v4592_v43 }
 0x127   :  { %v253_v50 = vpop.f32.mrf.mxu0  ;;  %3670 = vrot.lane.b32.xlu0 %v3669_v47, %s4355_s25 }
 0x128   :  { %v4601_v54 = vadd.f32 %v4444_v16, %v253_v50 }
 0x12a   :  { %v280_v29 = vmax.f32 %v4601_v54, 0.0 }
 0x12c   :  { %v3674_v25 = vpack.i.bf16 %v280_v29, %v279_v27 }
 0x12f   :  { %v256_v28 = vpop.f32.mrf.mxu0  ;;  %3675 = vrot.lane.b32.xlu0 %v3674_v25, %s4354_s18 }
 0x130   :  { %v3631_v55 = vpop.permute.xlu1 %3630  ;;  %v4621_v8 = vadd.f32 %v4444_v16, %v256_v28 }
 0x131   :  { %v3633_v57 = vunpack.i.h.bf16 %v3631_v55  ;;  %v3632_v61 = vunpack.i.l.bf16 %v3631_v55 }
 0x132   :  { %v281_v18 = vmax.f32 %v4621_v8, 0.0 }
 0x133   :  { %v4612_v62 = vmax.f32 %v266_v39, %v3633_v57  ;;  %v4616_v0 = vmax.f32 %v265_v38, %v3632_v61 }
 0x135   :  { %v3679_v7 = vpack.i.bf16 %v4612_v62, %v4616_v0 }
 0x137   :  { %v258_v10 = vpop.f32.mrf.mxu0  ;;  %3680 = vrot.lane.b32.xlu1 %v3679_v7, %s4355_s25 }
 0x138   :  { %v4625_v14 = vadd.f32 %v4444_v16, %v258_v10  ;;  %v3641_v15 = vpop.permute.xlu2 %3640 }
 0x139   :  { %v3643_v37 = vunpack.i.h.bf16 %v3641_v15  ;;  %v3642_v39 = vunpack.i.l.bf16 %v3641_v15 }
 0x13a   :  { %v282_v35 = vmax.f32 %v4625_v14, 0.0 }
 0x13b   :  { %v4631_v38 = vmax.f32 %v270_v53, %v3643_v37  ;;  %v4635_v22 = vmax.f32 %v269_v52, %v3642_v39 }
 0x13c   :  { %v3684_v16 = vpack.i.bf16 %v282_v35, %v281_v18 }
 0x13d   :  { %v3694_v23 = vpack.i.bf16 %v4631_v38, %v4635_v22 }
 0x13f   :  { %3685 = vrot.lane.b32.xlu1 %v3684_v16, %s4354_s18  ;;  %3695 = vrot.lane.b32.xlu0 %v3694_v23, %s4355_s25 }
 0x140   :  { %v3636_v30 = vpop.permute.xlu1 %3635 }
 0x141   :  { %v3638_v51 = vunpack.i.h.bf16 %v3636_v30  ;;  %v3637_v53 = vunpack.i.l.bf16 %v3636_v30 }
 0x143   :  { %v4647_v49 = vmax.f32 %v268_v46, %v3638_v51  ;;  %v4651_v52 = vmax.f32 %v267_v45, %v3637_v53 }
 0x145   :  { %v3689_v32 = vpack.i.bf16 %v4647_v49, %v4651_v52 }
 0x147   :  { %3690 = vrot.lane.b32.xlu2 %v3689_v32, %s4355_s25 }
 0x148   :  { %v3646_v17 = vpop.permute.xlu2 %3645 }
 0x149   :  { %v3648_v20 = vunpack.i.h.bf16 %v3646_v17  ;;  %v3647_v34 = vunpack.i.l.bf16 %v3646_v17 }
 0x14b   :  { %v4658_v36 = vmax.f32 %v272_v60, %v3648_v20  ;;  %v4662_v44 = vmax.f32 %v271_v59, %v3647_v34 }
 0x14d   :  { %v3699_v42 = vpack.i.bf16 %v4658_v36, %v4662_v44 }
 0x14f   :  { %3700 = vrot.lane.b32.xlu1 %v3699_v42, %s4355_s25 }
 0x170   :  { %v3651_v45 = vpop.permute.xlu0 %3650 }
 0x171   :  { %v3653_v46 = vunpack.i.h.bf16 %v3651_v45  ;;  %v3652_v40 = vunpack.i.l.bf16 %v3651_v45  ;;  %v3661_v47 = vpop.permute.xlu2 %3660 }
 0x172   :  { %v3663_v9 = vunpack.i.h.bf16 %v3661_v47 }
 0x173   :  { %v4669_v50 = vmax.f32 %v274_v6, %v3653_v46  ;;  %v4673_v58 = vmax.f32 %v273_v2, %v3652_v40 }
 0x175   :  { %v3704_v56 = vpack.i.bf16 %v4669_v50, %v4673_v58 }
 0x177   :  { %3705 = vrot.lane.b32.xlu2 %v3704_v56, %s4355_s25 }
 0x179   :  { %v3666_v59 = vpop.permute.xlu2 %3665 }
 0x17a   :  { %v3668_v60 = vunpack.i.h.bf16 %v3666_v59  ;;  %v3667_v25 = vunpack.i.l.bf16 %v3666_v59 }
 0x17c   :  { %v4680_v28 = vmax.f32 %v278_v21, %v3668_v60  ;;  %v4684_v1 = vmax.f32 %v277_v19, %v3667_v25  ;;  %v3593_v19 = vld [vmem:[%s7034_s3 + $0x88] sm:$0xff] }
 0x17d   :  { %1496 = vmatpush.bf16.msra.mxu3 %v3593_v19  ;;  %3065 = vmatpush.bf16.msrb.mxu0 %v3593_v19 }
 0x17e   :  { %v3714_v63 = vpack.i.bf16 %v4680_v28, %v4684_v1 }
 0x180   :  { %v3656_v2 = vpop.permute.xlu1 %3655  ;;  %3715 = vrot.lane.b32.xlu1 %v3714_v63, %s4355_s25 }
 0x181   :  { %v3658_v6 = vunpack.i.h.bf16 %v3656_v2  ;;  %v3657_v55 = vunpack.i.l.bf16 %v3656_v2  ;;  %1497 = vmatpush.bf16.msra.mxu3 %v3592_v11  ;;  %3066 = vmatpush.bf16.msrb.mxu0 %v3592_v11 }
 0x183   :  { %v4691_v57 = vmax.f32 %v276_v13, %v3658_v6  ;;  %v4695_v33 = vmax.f32 %v275_v12, %v3657_v55  ;;  %v3662_v12 = vunpack.i.l.bf16 %v3661_v47  ;;  %v4709_v13 = vmax.f32 %v4564_v24, %v3663_v9 }
 0x185   :  { %v3709_v31 = vpack.i.bf16 %v4691_v57, %v4695_v33  ;;  %1891 = vmatpush.bf16.msrb.mxu3 %v4391_v3  ;;  %v4712_v21 = vmax.f32 %v4568_v26, %v3662_v12  ;;  %v525_v3 = vrot.slane %v4709_v13, 1  ;;  %v616_v32 = vrot.slane %v4709_v13, 2 }
 0x186   :  { %v708_v56 = vrot.slane %v4709_v13, 5 }
 0x187   :  { %3710 = vrot.lane.b32.xlu0 %v3709_v31, %s4355_s25  ;;  %v524_v10 = vrot.slane %v4712_v21, 1 }
 0x189   :  { %1892 = vmatpush.bf16.msrb.mxu3 %v4397_v4  ;;  %v526_v24 = vsel %vm523_vm2, %v524_v10, %v525_v3 }
 0x18d   :  { %1893 = vmatpush.bf16.msrb.mxu3 %v4403_v5 }
 0x199   :  { %v3671_v61 = vpop.permute.xlu0 %3670 }
 0x19a   :  { %v3672_v7 = vunpack.i.l.bf16 %v3671_v61  ;;  %v3673_v30 = vunpack.i.h.bf16 %v3671_v61 }
 0x19c   :  { %v4717_v15 = vmax.f32 %v4592_v43, %v3672_v7  ;;  %v615_v43 = vrot.slane %v4712_v21, 2  ;;  %v4741_v34 = vmax.f32 %v4588_v41, %v3673_v30  ;;  %v854_v30 = vrot.slane %v4709_v13, 7 }
 0x19e   :  { %v527_v4 = vrot.slane %v4717_v15, 1  ;;  %v618_v5 = vrot.slane %v4717_v15, 2  ;;  %v617_v54 = vsel %vm614_vm3, %v615_v43, %v616_v32  ;;  %v709_v45 = vrot.slane %v4717_v15, 5 }
 0x19f   :  { %v711_v46 = vrot.slane %v4741_v34, 5  ;;  %v529_v47 = vrot.slane %v4741_v34, 1  ;;  %v1055_v59 = vrot.slane %v4741_v34, 4 }
 0x1a0   :  { %v528_v37 = vsel %vm523_vm2, %v525_v3, %v527_v4  ;;  %v619_v20 = vsel %vm614_vm3, %v616_v32, %v618_v5 }
 0x1a1   :  { %v3676_v26 = vpop.permute.xlu0 %3675  ;;  %v3729_v39 = vpack.i.bf16 %v528_v37, %v526_v24  ;;  %v530_v55 = vsel %vm523_vm2, %v527_v4, %v529_v47  ;;  %v3691_v19 = vpop.permute.xlu2 %3690  ;;  %v620_v24 = vrot.slane %v4741_v34, 2  ;;  %v855_v4 = vrot.slane %v4717_v15, 7 }
 0x1a2   :  { %v3678_v16 = vunpack.i.h.bf16 %v3676_v26  ;;  %v3677_v23 = vunpack.i.l.bf16 %v3676_v26  ;;  %v857_v37 = vrot.slane %v4741_v34, 7  ;;  %v3693_v26 = vunpack.i.h.bf16 %v3691_v19 }
 0x1a3   :  { %3730 = vrot.lane.b32.xlu1 %v3729_v39, %s4356_s1  ;;  %v3692_v39 = vunpack.i.l.bf16 %v3691_v19  ;;  %v856_v14 = vsel %vm503_vm7, %v854_v30, %v855_v4 }
 0x1a4   :  { %v4728_v51 = vmax.f32 %v280_v29, %v3678_v16  ;;  %v4732_v53 = vmax.f32 %v279_v27, %v3677_v23  ;;  %v3739_v27 = vpack.i.bf16 %v619_v20, %v617_v54  ;;  %v4796_v20 = vmax.f32 %v4647_v49, %v3693_v26 }
 0x1a5   :  { %v4799_v54 = vmax.f32 %v4651_v52, %v3692_v39 }
 0x1a6   :  { %v3719_v17 = vpack.i.bf16 %v4728_v51, %v4732_v53  ;;  %v537_v30 = vrot.slane %v4796_v20, 1 }
 0x1a8   :  { %3720 = vrot.lane.b32.xlu2 %v3719_v17, %s4355_s25 }
 0x1a9   :  { %v3681_v48 = vpop.permute.xlu1 %3680 }
 0x1aa   :  { %v3683_v29 = vunpack.i.h.bf16 %v3681_v48  ;;  %v3682_v42 = vunpack.i.l.bf16 %v3681_v48  ;;  %v621_v48 = vsel %vm614_vm3, %v618_v5, %v620_v24  ;;  %v1060_v5 = vrot.slane %v4799_v54, 4 }
 0x1ab   :  { %3740 = vrot.lane.b32.xlu1 %v3739_v27, %s4355_s25 }
 0x1ac   :  { %v4749_v40 = vmax.f32 %v4612_v62, %v3683_v29  ;;  %v4752_v41 = vmax.f32 %v4616_v0, %v3682_v42  ;;  %v710_v62 = vsel %vm707_vm4, %v708_v56, %v709_v45  ;;  %v712_v0 = vsel %vm707_vm4, %v709_v45, %v711_v46 }
 0x1ad   :  { %v3749_v10 = vpack.i.bf16 %v712_v0, %v710_v62  ;;  %v963_v29 = vrot.slane %v4741_v34, 3  ;;  %v970_v62 = vrot.slane %v4796_v20, 3 }
 0x1ae   :  { %v1056_v60 = vrot.slane %v4752_v41, 4  ;;  %v1058_v25 = vrot.slane %v4749_v40, 4  ;;  %v531_v63 = vrot.slane %v4752_v41, 1  ;;  %v622_v3 = vrot.slane %v4752_v41, 2 }
 0x1af   :  { %v964_v8 = vrot.slane %v4752_v41, 3  ;;  %v713_v42 = vrot.slane %v4752_v41, 5  ;;  %v715_v45 = vrot.slane %v4749_v40, 5  ;;  %v861_v26 = vrot.slane %v4749_v40, 7 }
 0x1b0   :  { %v1057_v2 = vsel %vm1054_vm5, %v1055_v59, %v1056_v60  ;;  %v1059_v6 = vsel %vm1054_vm5, %v1056_v60, %v1058_v25  ;;  %v532_v31 = vsel %vm523_vm2, %v529_v47, %v531_v63  ;;  %v623_v32 = vsel %vm614_vm3, %v620_v24, %v622_v3 }
 0x1b1   :  { %v3686_v11 = vpop.permute.xlu1 %3685  ;;  %v1223_v9 = vpack.c.bf16 %v1059_v6, %v1057_v2  ;;  %v3734_v12 = vpack.i.bf16 %v532_v31, %v530_v55  ;;  %v3696_v17 = vpop.permute.xlu0 %3695  ;;  %v3744_v27 = vpack.i.bf16 %v623_v32, %v621_v48  ;;  %v965_v49 = vsel %vm962_vm8, %v963_v29, %v964_v8 }
 0x1b2   :  { %v3688_v61 = vunpack.i.h.bf16 %v3686_v11  ;;  %v3687_v7 = vunpack.i.l.bf16 %v3686_v11  ;;  %v3697_v47 = vunpack.i.l.bf16 %v3696_v17  ;;  %v1062_v59 = vrot.slane %v4796_v20, 4 }
 0x1b3   :  { %3475 = vmatmul.msk.bf16.vlgmr.msra.gmra.mxu3 %vm1110_vm6, %v1223_v9  ;;  %3735 = vrot.lane.b32.xlu2 %v3734_v12, %s4356_s1  ;;  %v968_v60 = vrot.slane %v4799_v54, 3  ;;  %v714_v0 = vsel %vm707_vm4, %v711_v46, %v713_v42  ;;  %v716_v2 = vsel %vm707_vm4, %v713_v42, %v715_v45  ;;  %v533_v6 = vrot.slane %v4749_v40, 1 }
 0x1b4   :  { %v4778_v16 = vmax.f32 %v282_v35, %v3688_v61  ;;  %v4782_v23 = vmax.f32 %v281_v18, %v3687_v7  ;;  %3750 = vrot.lane.b32.xlu1 %v3749_v10, %s4354_s18  ;;  %v858_v35 = vsel %vm503_vm7, %v855_v4, %v857_v37  ;;  %v966_v18 = vrot.slane %v4749_v40, 3 }
 0x1b5   :  { %v3759_v56 = vpack.i.bf16 %v858_v35, %v856_v14  ;;  %v4824_v55 = vmax.f32 %v4635_v22, %v3697_v47  ;;  %v1061_v19 = vsel %vm1054_vm5, %v1058_v25, %v1060_v5  ;;  %v3698_v9 = vunpack.i.h.bf16 %v3696_v17 }
 0x1b6   :  { %v3724_v43 = vpack.i.bf16 %v4778_v16, %v4782_v23  ;;  %v967_v52 = vsel %vm962_vm8, %v964_v8, %v966_v18  ;;  %v969_v11 = vsel %vm962_vm8, %v966_v18, %v968_v60  ;;  %v1063_v12 = vsel %vm1054_vm5, %v1060_v5, %v1062_v59 }
 0x1b7   :  { %v3769_v31 = vpack.i.bf16 %v967_v52, %v965_v49  ;;  %v971_v46 = vsel %vm962_vm8, %v968_v60, %v970_v62  ;;  %v535_v61 = vrot.slane %v4799_v54, 1  ;;  %v3754_v7 = vpack.i.bf16 %v716_v2, %v714_v0 }
 0x1b8   :  { %3725 = vrot.lane.b32.xlu0 %v3724_v43, %s4355_s25  ;;  %v1226_v10 = vpack.c.bf16 %v1063_v12, %v1061_v19  ;;  %v3794_v24 = vpack.i.bf16 %v971_v46, %v969_v11  ;;  %v534_v22 = vsel %vm523_vm2, %v531_v63, %v533_v6  ;;  %v859_v4 = vrot.slane %v4752_v41, 7 }
 0x1b9   :  { %v536_v25 = vsel %vm523_vm2, %v533_v6, %v535_v61  ;;  %v539_v39 = vrot.slane %v4824_v55, 1  ;;  %v4844_v43 = vmax.f32 %v4631_v38, %v3698_v9  ;;  %v624_v35 = vrot.slane %v4749_v40, 2 }
 0x1ba   :  { %v3774_v63 = vpack.i.bf16 %v536_v25, %v534_v22  ;;  %v860_v32 = vsel %vm503_vm7, %v857_v37, %v859_v4  ;;  %v862_v17 = vsel %vm503_vm7, %v859_v4, %v861_v26  ;;  %v538_v18 = vsel %vm523_vm2, %v535_v61, %v537_v30 }
 0x1bb   :  { %3745 = vrot.lane.b32.xlu2 %v3744_v27, %s4355_s25  ;;  %v540_v14 = vsel %vm523_vm2, %v537_v30, %v539_v39  ;;  %v626_v48 = vrot.slane %v4799_v54, 2  ;;  %v972_v38 = vrot.slane %v4824_v55, 3  ;;  %v3764_v27 = vpack.i.bf16 %v862_v17, %v860_v32 }
 0x1bc   :  { %3760 = vrot.lane.b32.xlu1 %v3759_v56, %s4356_s1  ;;  %v3799_v29 = vpack.i.bf16 %v540_v14, %v538_v18  ;;  %v974_v37 = vrot.slane %v4844_v43, 3  ;;  %v1064_v42 = vrot.slane %v4824_v55, 4  ;;  %v625_v56 = vsel %vm614_vm3, %v622_v3, %v624_v35 }
 0x1bd   :  { %v627_v49 = vsel %vm614_vm3, %v624_v35, %v626_v48  ;;  %v1066_v52 = vrot.slane %v4844_v43, 4  ;;  %v630_v5 = vrot.slane %v4824_v55, 2  ;;  %v628_v60 = vrot.slane %v4796_v20, 2 }
 0x1be   :  { %v3779_v0 = vpack.i.bf16 %v627_v49, %v625_v56  ;;  %v973_v2 = vsel %vm962_vm8, %v970_v62, %v972_v38  ;;  %v975_v3 = vsel %vm962_vm8, %v972_v38, %v974_v37  ;;  %v717_v9 = vrot.slane %v4799_v54, 5 }
 0x1bf   :  { %v1067_v19 = vsel %vm1054_vm5, %v1064_v42, %v1066_v52  ;;  %v631_v11 = vsel %vm614_vm3, %v628_v60, %v630_v5  ;;  %v629_v62 = vsel %vm614_vm3, %v626_v48, %v628_v60  ;;  %v3819_v12 = vpack.i.bf16 %v975_v3, %v973_v2 }
 0x1c0   :  { %3770 = vrot.lane.b32.xlu0 %v3769_v31, %s4354_s18  ;;  %v1065_v31 = vsel %vm1054_vm5, %v1062_v59, %v1064_v42  ;;  %v718_v59 = vsel %vm707_vm4, %v715_v45, %v717_v9  ;;  %v721_v61 = vrot.slane %v4824_v55, 5  ;;  %v723_v22 = vrot.slane %v4844_v43, 5 }
 0x1c1   :  { %v3701_v8 = vpop.permute.xlu1 %3700  ;;  %v1229_v46 = vpack.c.bf16 %v1067_v19, %v1065_v31  ;;  %v541_v4 = vrot.slane %v4844_v43, 1  ;;  %v863_v14 = vrot.slane %v4799_v54, 7  ;;  %v865_v18 = vrot.slane %v4796_v20, 7 }
 0x1c2   :  { %v3702_v47 = vunpack.i.l.bf16 %v3701_v8  ;;  %v724_v17 = vsel %vm707_vm4, %v721_v61, %v723_v22  ;;  %v869_v56 = vrot.slane %v4844_v43, 7 }
 0x1c3   :  { %3755 = vrot.lane.b32.xlu2 %v3754_v7, %s4354_s18  ;;  %3476 = vmatmul.msk.bf16.gmra.mxu3 %vm1110_vm6, %v1226_v10  ;;  %v3703_v7 = vunpack.i.h.bf16 %v3701_v8  ;;  %v3804_v10 = vpack.i.bf16 %v631_v11, %v629_v62  ;;  %v542_v8 = vsel %vm523_vm2, %v539_v39, %v541_v4  ;;  %v864_v38 = vsel %vm503_vm7, %v861_v26, %v863_v14 }
 0x1c4   :  { %3795 = vrot.lane.b32.xlu1 %v3794_v24, %s4354_s18  ;;  %v4869_v6 = vmax.f32 %v4662_v44, %v3702_v47  ;;  %v719_v44 = vrot.slane %v4796_v20, 5  ;;  %v866_v60 = vsel %vm503_vm7, %v863_v14, %v865_v18  ;;  %v632_v26 = vrot.slane %v4844_v43, 2 }
 0x1c5   :  { %v4895_v45 = vmax.f32 %v4658_v36, %v3703_v7 }
 0x1c6   :  { %v543_v24 = vrot.slane %v4869_v6, 1  ;;  %v720_v25 = vsel %vm707_vm4, %v717_v9, %v719_v44  ;;  %v722_v32 = vsel %vm707_vm4, %v719_v44, %v721_v61  ;;  %v1068_v42 = vrot.slane %v4869_v6, 4 }
 0x1c7   :  { %v3784_v30 = vpack.i.bf16 %v720_v25, %v718_v59  ;;  %v3809_v36 = vpack.i.bf16 %v724_v17, %v722_v32  ;;  %v1070_v47 = vrot.slane %v4895_v45, 4  ;;  %v976_v44 = vrot.slane %v4869_v6, 3 }
 0x1c8   :  { %3775 = vrot.lane.b32.xlu0 %v3774_v63, %s4356_s1  ;;  %v544_v63 = vsel %vm523_vm2, %v541_v4, %v543_v24  ;;  %v1069_v31 = vsel %vm1054_vm5, %v1066_v52, %v1068_v42  ;;  %v633_v52 = vsel %vm614_vm3, %v630_v5, %v632_v26  ;;  %v725_v7 = vrot.slane %v4869_v6, 5 }
 0x1c9   :  { %v3824_v48 = vpack.i.bf16 %v544_v63, %v542_v8  ;;  %v1071_v19 = vsel %vm1054_vm5, %v1068_v42, %v1070_v47  ;;  %v871_v8 = vrot.slane %v4869_v6, 7 }
 0x1ca   :  { %v1232_v59 = vpack.c.bf16 %v1071_v19, %v1069_v31  ;;  %v636_v31 = vrot.slane %v4895_v45, 2  ;;  %v4996_v19 = vld [vmem:[%s7034_s3 + $0x28] sm:$0xff] }
 0x1cb   :  { %3765 = vrot.lane.b32.xlu2 %v3764_v27, %s4356_s1  ;;  %v867_v27 = vrot.slane %v4824_v55, 7 }
 0x1cc   :  { %3800 = vrot.lane.b32.xlu1 %v3799_v29, %s4356_s1  ;;  %v634_v29 = vrot.slane %v4869_v6, 2 }
 0x1cd   :  { %v868_v2 = vsel %vm503_vm7, %v865_v18, %v867_v27  ;;  %v870_v11 = vsel %vm503_vm7, %v867_v27, %v869_v56  ;;  %v4967_v27 = vld [vmem:[%s7034_s3 + $0x38] sm:$0xff] }
 0x1ce   :  { %v635_v3 = vsel %vm614_vm3, %v632_v26, %v634_v29  ;;  %v3814_v61 = vpack.i.bf16 %v870_v11, %v868_v2  ;;  %1386 = vmatpush.bf16.msra.mxu1 %v4967_v27  ;;  %v637_v11 = vsel %vm614_vm3, %v634_v29, %v636_v31 }
 0x1d0   :  { %3780 = vrot.lane.b32.xlu0 %v3779_v0, %s4355_s25  ;;  %v3789_v0 = vpack.i.bf16 %v866_v60, %v864_v38 }
 0x1d1   :  { %v3706_v35 = vpop.permute.xlu2 %3705 }
 0x1d2   :  { %v3708_v49 = vunpack.i.h.bf16 %v3706_v35  ;;  %v3707_v39 = vunpack.i.l.bf16 %v3706_v35  ;;  %v545_v35 = vrot.slane %v4895_v45, 1 }
 0x1d3   :  { %3820 = vrot.lane.b32.xlu2 %v3819_v12, %s4354_s18  ;;  %3477 = vmatmul.msk.bf16.gmra.mxu3 %vm1110_vm6, %v1229_v46  ;;  %v978_v12 = vrot.slane %v4895_v45, 3  ;;  %v3829_v46 = vpack.i.bf16 %v635_v3, %v633_v52 }
 0x1d4   :  { %3805 = vrot.lane.b32.xlu1 %v3804_v10, %s4355_s25  ;;  %v4926_v9 = vmax.f32 %v4669_v50, %v3708_v49  ;;  %v4929_v62 = vmax.f32 %v4673_v58, %v3707_v39  ;;  %v727_v50 = vrot.slane %v4895_v45, 5  ;;  %v977_v58 = vsel %vm962_vm8, %v974_v37, %v976_v44 }
 0x1d5   :  { %v979_v10 = vsel %vm962_vm8, %v976_v44, %v978_v12  ;;  %v546_v42 = vsel %vm523_vm2, %v543_v24, %v545_v35  ;;  %v872_v49 = vsel %vm503_vm7, %v869_v56, %v871_v8  ;;  %v4984_v24 = vld [vmem:[%s7034_s3 + $0x30] sm:$0xff] }
 0x1d6   :  { %v980_v25 = vrot.slane %v4929_v62, 3  ;;  %v982_v5 = vrot.slane %v4926_v9, 3  ;;  %v3844_v4 = vpack.i.bf16 %v979_v10, %v977_v58  ;;  %v728_v63 = vsel %vm707_vm4, %v725_v7, %v727_v50  ;;  %1387 = vmatpush.bf16.msra.mxu1 %v4984_v24 }
 0x1d7   :  { %v547_v37 = vrot.slane %v4929_v62, 1  ;;  %v638_v2 = vrot.slane %v4929_v62, 2  ;;  %v731_v52 = vrot.slane %v4926_v9, 5 }
 0x1d8   :  { %3785 = vrot.lane.b32.xlu0 %v3784_v30, %s4354_s18  ;;  %v726_v30 = vsel %vm707_vm4, %v723_v22, %v725_v7  ;;  %v981_v32 = vsel %vm962_vm8, %v978_v12, %v980_v25  ;;  %v983_v17 = vsel %vm962_vm8, %v980_v25, %v982_v5  ;;  %v873_v22 = vrot.slane %v4895_v45, 7 }
 0x1d9   :  { %v3834_v14 = vpack.i.bf16 %v728_v63, %v726_v30  ;;  %v3869_v18 = vpack.i.bf16 %v983_v17, %v981_v32  ;;  %v548_v38 = vsel %vm523_vm2, %v545_v35, %v547_v37  ;;  %v729_v12 = vrot.slane %v4929_v62, 5  ;;  %v5025_v32 = vld [vmem:[%s7034_s3 + $0x18] sm:$0xff] }
 0x1da   :  { %v3849_v39 = vpack.i.bf16 %v548_v38, %v546_v42  ;;  %v874_v60 = vsel %vm503_vm7, %v871_v8, %v873_v22  ;;  %1388 = vmatpush.bf16.msra.mxu1 %v4996_v19 }
 0x1db   :  { %3825 = vrot.lane.b32.xlu2 %v3824_v48, %s4356_s1  ;;  %v1072_v48 = vrot.slane %v4929_v62, 4  ;;  %v3839_v56 = vpack.i.bf16 %v874_v60, %v872_v49  ;;  %v730_v29 = vsel %vm707_vm4, %v727_v50, %v729_v12  ;;  %v732_v10 = vsel %vm707_vm4, %v729_v12, %v731_v52 }
 0x1dc   :  { %3810 = vrot.lane.b32.xlu1 %v3809_v36, %s4354_s18  ;;  %v1074_v36 = vrot.slane %v4926_v9, 4  ;;  %v3859_v17 = vpack.i.bf16 %v732_v10, %v730_v29  ;;  %v877_v49 = vrot.slane %v4926_v9, 7  ;;  %v640_v12 = vrot.slane %v4926_v9, 2  ;;  %v5085_v10 = vld [vmem:[%s7034_s3] sm:$0xff] }
 0x1dd   :  { %v1073_v26 = vsel %vm1054_vm5, %v1070_v47, %v1072_v48  ;;  %v639_v47 = vsel %vm614_vm3, %v636_v31, %v638_v2 }
 0x1de   :  { %v3854_v44 = vpack.i.bf16 %v639_v47, %v637_v11 }
 0x1e0   :  { %3790 = vrot.lane.b32.xlu0 %v3789_v0, %s4356_s1  ;;  %v1075_v0 = vsel %vm1054_vm5, %v1072_v48, %v1074_v36 }
 0x1e1   :  { %v1235_v3 = vpack.c.bf16 %v1075_v0, %v1073_v26 }
 0x1e3   :  { %3830 = vrot.lane.b32.xlu2 %v3829_v46, %s4355_s25  ;;  %3478 = vmatmul.msk.bf16.gmra.mxu3 %vm1110_vm6, %v1232_v59  ;;  %v5008_v59 = vld [vmem:[%s7034_s3 + $0x20] sm:$0xff] }
 0x1e4   :  { %3815 = vrot.lane.b32.xlu1 %v3814_v61, %s4356_s1  ;;  %1389 = vmatpush.bf16.msra.mxu1 %v5008_v59 }
 0x1e8   :  { %3845 = vrot.lane.b32.xlu0 %v3844_v4, %s4354_s18  ;;  %v549_v4 = vrot.slane %v4926_v9, 1  ;;  %1390 = vmatpush.bf16.msra.mxu1 %v5025_v32 }
 0x1ea   :  { %v550_v38 = vsel %vm523_vm2, %v547_v37, %v549_v4 }
 0x1eb   :  { %3835 = vrot.lane.b32.xlu2 %v3834_v14, %s4354_s18  ;;  %v875_v14 = vrot.slane %v4929_v62, 7 }
 0x1ec   :  { %3870 = vrot.lane.b32.xlu1 %v3869_v18, %s4354_s18 }
 0x1f0   :  { %3850 = vrot.lane.b32.xlu0 %v3849_v39, %s4356_s1 }
 0x1f2   :  { %v3716_v46 = vpop.permute.xlu1 %3715 }
 0x1f3   :  { %3840 = vrot.lane.b32.xlu2 %v3839_v56, %s4356_s1  ;;  %3479 = vmatmul.msk.bf16.gmra.mxu3 %vm1110_vm6, %v1235_v3  ;;  %v3717_v25 = vunpack.i.l.bf16 %v3716_v46  ;;  %v3718_v50 = vunpack.i.h.bf16 %v3716_v46 }
 0x1f5   :  { %v5039_v48 = vmax.f32 %v4684_v1, %v3717_v25  ;;  %v5054_v37 = vmax.f32 %v4680_v28, %v3718_v50  ;;  %v878_v28 = vsel %vm503_vm7, %v875_v14, %v877_v49  ;;  %v5090_v25 = vld [vmem:[%s7034_s3 + $0x78] sm:$0xff]  ;;  %v641_v50 = vsel %vm614_vm3, %v638_v2, %v640_v12 }
 0x1f6   :  { %1438 = vmatpush.bf16.msra.mxu2 %v5090_v25 }
 0x1f7   :  { %v555_v11 = vrot.slane %v5039_v48, 1  ;;  %v557_v46 = vrot.slane %v5054_v37, 1  ;;  %v1082_v2 = vrot.slane %v5054_v37, 4 }
 0x1f8   :  { %3855 = vrot.lane.b32.xlu0 %v3854_v44, %s4355_s25  ;;  %v5073_v44 = vld [vmem:[%s7034_s3 + $0x8] sm:$0xff] }
 0x1f9   :  { %v3711_v61 = vpop.permute.xlu0 %3710 }
 0x1fa   :  { %v3713_v7 = vunpack.i.h.bf16 %v3711_v61  ;;  %v3712_v58 = vunpack.i.l.bf16 %v3711_v61 }
 0x1fc   :  { %v5017_v30 = vmax.f32 %v4691_v57, %v3713_v7  ;;  %v5020_v63 = vmax.f32 %v4695_v33, %v3712_v58  ;;  %v5036_v33 = vld [vmem:[%s7034_s3 + $0x10] sm:$0xff] }
 0x1fd   :  { %1391 = vmatpush.bf16.msra.mxu1 %v5036_v33 }
 0x1fe   :  { %v984_v35 = vrot.slane %v5020_v63, 3  ;;  %v986_v8 = vrot.slane %v5017_v30, 3  ;;  %v1076_v18 = vrot.slane %v5020_v63, 4  ;;  %v1078_v57 = vrot.slane %v5017_v30, 4 }
 0x1ff   :  { %v551_v42 = vrot.slane %v5020_v63, 1  ;;  %v553_v47 = vrot.slane %v5017_v30, 1 }
 0x200   :  { %3860 = vrot.lane.b32.xlu0 %v3859_v17, %s4354_s18  ;;  %v985_v39 = vsel %vm962_vm8, %v982_v5, %v984_v35  ;;  %v987_v60 = vsel %vm962_vm8, %v984_v35, %v986_v8  ;;  %v1077_v26 = vsel %vm1054_vm5, %v1074_v36, %v1076_v18  ;;  %v1079_v1 = vsel %vm1054_vm5, %v1076_v18, %v1078_v57 }
 0x201   :  { %v3894_v0 = vpack.i.bf16 %v987_v60, %v985_v39  ;;  %v1238_v56 = vpack.c.bf16 %v1079_v1, %v1077_v26  ;;  %v552_v3 = vsel %vm523_vm2, %v549_v4, %v551_v42  ;;  %v876_v5 = vsel %vm503_vm7, %v873_v22, %v875_v14  ;;  %1392 = vmatpush.bf16.msra.mxu1 %v5073_v44 }
 0x202   :  { %v3874_v31 = vpack.i.bf16 %v552_v3, %v550_v38  ;;  %v642_v36 = vrot.slane %v5020_v63, 2  ;;  %v3864_v22 = vpack.i.bf16 %v878_v28, %v876_v5  ;;  %v554_v61 = vsel %vm523_vm2, %v551_v42, %v553_v47  ;;  %v3721_v58 = vpop.permute.xlu2 %3720 }
 0x203   :  { %3895 = vrot.lane.b32.xlu2 %v3894_v0, %s4354_s18  ;;  %3480 = vmatmul.msk.bf16.gmra.mxu3 %vm1110_vm6, %v1238_v56  ;;  %v556_v7 = vsel %vm523_vm2, %v553_v47, %v555_v11  ;;  %v558_v17 = vsel %vm523_vm2, %v555_v11, %v557_v46  ;;  %v3723_v14 = vunpack.i.h.bf16 %v3721_v58  ;;  %v3722_v35 = vunpack.i.l.bf16 %v3721_v58 }
 0x204   :  { %3875 = vrot.lane.b32.xlu1 %v3874_v31, %s4356_s1  ;;  %v643_v29 = vsel %vm614_vm3, %v640_v12, %v642_v36  ;;  %v3899_v4 = vpack.i.bf16 %v556_v7, %v554_v61  ;;  %v644_v38 = vrot.slane %v5017_v30, 2  ;;  %v1080_v42 = vrot.slane %v5039_v48, 4 }
 0x205   :  { %v3879_v18 = vpack.i.bf16 %v643_v29, %v641_v50  ;;  %1393 = vmatpush.bf16.msra.mxu1 %v5085_v10  ;;  %v733_v39 = vrot.slane %v5020_v63, 5  ;;  %v735_v60 = vrot.slane %v5017_v30, 5  ;;  %v646_v26 = vrot.slane %v5039_v48, 2 }
 0x206   :  { %v3909_v1 = vpack.i.bf16 %v557_v46, %v558_v17  ;;  %v1081_v0 = vsel %vm1054_vm5, %v1078_v57, %v1080_v42  ;;  %v5109_v56 = vmax.f32 %v4728_v51, %v3723_v14  ;;  %v5112_v3 = vmax.f32 %v4732_v53, %v3722_v35 }
 0x207   :  { %v645_v31 = vsel %vm614_vm3, %v642_v36, %v644_v38  ;;  %v647_v47 = vsel %vm614_vm3, %v644_v38, %v646_v26  ;;  %v736_v5 = vsel %vm707_vm4, %v733_v39, %v735_v60  ;;  %v1083_v51 = vsel %vm1054_vm5, %v1080_v42, %v1082_v2 }
 0x208   :  { %3865 = vrot.lane.b32.xlu0 %v3864_v22, %s4356_s1  ;;  %v1241_v53 = vpack.c.bf16 %v1083_v51, %v1081_v0  ;;  %v3904_v57 = vpack.i.bf16 %v647_v47, %v645_v31  ;;  %v988_v28 = vrot.slane %v5039_v48, 3  ;;  %v990_v36 = vrot.slane %v5054_v37, 3 }
 0x209   :  { %2955 = vmatpush.bf16.msrb.mxu1 %v4967_v27  ;;  %v734_v27 = vsel %vm707_vm4, %v731_v52, %v733_v39  ;;  %v5130_v52 = vld [vmem:[%s7034_s3 + $0x70] sm:$0xff]  ;;  %v834_v12 = vrot.slane %v5109_v56, 6  ;;  %v879_v61 = vrot.slane %v5020_v63, 7  ;;  %v881_v7 = vrot.slane %v5017_v30, 7 }
 0x20a   :  { %v3884_v11 = vpack.i.bf16 %v736_v5, %v734_v27  ;;  %v989_v22 = vsel %vm962_vm8, %v986_v8, %v988_v28  ;;  %v737_v58 = vrot.slane %v5039_v48, 5  ;;  %v739_v29 = vrot.slane %v5054_v37, 5  ;;  %1439 = vmatpush.bf16.msra.mxu2 %v5130_v52 }
 0x20b   :  { %3900 = vrot.lane.b32.xlu2 %v3899_v4, %s4356_s1  ;;  %v5150_v4 = vld [vmem:[%s7034_s3 + $0x68] sm:$0xff]  ;;  %v991_v8 = vsel %vm962_vm8, %v988_v28, %v990_v36  ;;  %v882_v38 = vsel %vm503_vm7, %v879_v61, %v881_v7  ;;  %v650_v42 = vrot.slane %v5112_v3, 2  ;;  %v1084_v0 = vrot.slane %v5112_v3, 4 }
 0x20c   :  { %3880 = vrot.lane.b32.xlu1 %v3879_v18, %s4355_s25  ;;  %v3924_v14 = vpack.i.bf16 %v991_v8, %v989_v22  ;;  %v738_v35 = vsel %vm707_vm4, %v735_v60, %v737_v58  ;;  %v880_v18 = vsel %vm503_vm7, %v877_v49, %v879_v61  ;;  %v740_v39 = vsel %vm707_vm4, %v737_v58, %v739_v29 }
 0x20d   :  { %2956 = vmatpush.bf16.msrb.mxu1 %v4984_v24  ;;  %v832_v24 = vrot.slane %v5112_v3, 6  ;;  %v5134_v46 = vpop.permute.xlu2 %3735  ;;  %v3914_v60 = vpack.i.bf16 %v740_v39, %v738_v35  ;;  %v3889_v49 = vpack.i.bf16 %v882_v38, %v880_v18  ;;  %v1086_v31 = vrot.slane %v5109_v56, 4 }
 0x20e   :  { %1440 = vmatpush.bf16.msra.mxu2 %v5150_v4  ;;  %v992_v27 = vrot.slane %v5112_v3, 3  ;;  %v994_v5 = vrot.slane %v5109_v56, 3  ;;  %v883_v51 = vrot.slane %v5039_v48, 7  ;;  %v1085_v22 = vsel %vm1054_vm5, %v1082_v2, %v1084_v0 }
 0x20f   :  { %v5158_v17 = vsel %vm7038_vm0, %v832_v24, %v834_v12  ;;  %v1087_v61 = vsel %vm1054_vm5, %v1084_v0, %v1086_v31 }
 0x210   :  { %3910 = vrot.lane.b32.xlu0 %v3909_v1, %s4356_s1  ;;  %v648_v1 = vrot.slane %v5054_v37, 2  ;;  %v884_v58 = vsel %vm503_vm7, %v881_v7, %v883_v51  ;;  %v993_v8 = vsel %vm962_vm8, %v990_v36, %v992_v27  ;;  %v1244_v35 = vpack.c.bf16 %v1087_v61, %v1085_v22  ;;  %v5217_v36 = vld [vmem:[%s7034_s3 + $0x50] sm:$0xff] }
 0x211   :  { %2957 = vmatpush.bf16.msrb.mxu1 %v4996_v19  ;;  %v5173_v19 = vld [vmem:[%s7034_s3 + $0x60] sm:$0xff] }
 0x212   :  { %v651_v47 = vsel %vm614_vm3, %v648_v1, %v650_v42  ;;  %1441 = vmatpush.bf16.msra.mxu2 %v5173_v19 }
 0x213   :  { %3481 = vmatmul.msk.bf16.gmra.mxu3 %vm1110_vm6, %v1241_v53  ;;  %3905 = vrot.lane.b32.xlu2 %v3904_v57, %s4355_s25  ;;  %v5192_v53 = vld [vmem:[%s7034_s3 + $0x58] sm:$0xff] }
 0x214   :  { %3885 = vrot.lane.b32.xlu1 %v3884_v11, %s4354_s18  ;;  %v649_v11 = vsel %vm614_vm3, %v646_v26, %v648_v1  ;;  %v741_v26 = vrot.slane %v5112_v3, 5 }
 0x215   :  { %v5152_v50 = vpop.permute.xlu1 %3730  ;;  %2958 = vmatpush.bf16.msrb.mxu1 %v5008_v59  ;;  %v885_v59 = vrot.slane %v5054_v37, 7  ;;  %v5194_v57 = vpop.permute.xlu2 %3745  ;;  %v3929_v12 = vpack.i.bf16 %v651_v47, %v649_v11 }
 0x216   :  { %1442 = vmatpush.bf16.msra.mxu2 %v5192_v53  ;;  %v3733_v38 = vunpack.i.h.bf16 %v5152_v50  ;;  %v3732_v39 = vunpack.i.l.bf16 %v5152_v50 }
 0x217   :  { %v886_v2 = vsel %vm503_vm7, %v883_v51, %v885_v59 }
 0x218   :  { %3925 = vrot.lane.b32.xlu0 %v3924_v14, %s4354_s18  ;;  %v995_v14 = vsel %vm962_vm8, %v992_v27, %v994_v5  ;;  %v3919_v18 = vpack.i.bf16 %v886_v2, %v884_v58  ;;  %v889_v27 = vrot.slane %v5109_v56, 7  ;;  %v1112_v51 = vsel %vm1110_vm6, %v4709_v13, %v3733_v38  ;;  %v5249_v58 = vld [vmem:[%s7034_s3 + $0x40] sm:$0xff] }
 0x219   :  { %2959 = vmatpush.bf16.msrb.mxu1 %v5025_v32  ;;  %v743_v32 = vrot.slane %v5109_v56, 5  ;;  %v3944_v7 = vpack.i.bf16 %v995_v14, %v993_v8 }
 0x21a   :  { %1443 = vmatpush.bf16.msra.mxu2 %v5217_v36 }
 0x21b   :  { %3915 = vrot.lane.b32.xlu2 %v3914_v60, %s4354_s18  ;;  %v742_v60 = vsel %vm707_vm4, %v739_v29, %v741_v26  ;;  %v744_v1 = vsel %vm707_vm4, %v741_v26, %v743_v32  ;;  %v887_v29 = vrot.slane %v5112_v3, 7 }
 0x21c   :  { %3890 = vrot.lane.b32.xlu1 %v3889_v49, %s4356_s1  ;;  %v3934_v47 = vpack.i.bf16 %v744_v1, %v742_v60  ;;  %v3738_v1 = vunpack.i.h.bf16 %v5134_v46 }
 0x21d   :  { %v3741_v28 = vpop.permute.xlu1 %3740  ;;  %2960 = vmatpush.bf16.msrb.mxu1 %v5036_v33  ;;  %v5231_v33 = vld [vmem:[%s7034_s3 + $0x48] sm:$0xff]  ;;  %v5240_v11 = vpop.permute.xlu2 %3755 }
 0x21e   :  { %v3743_v49 = vunpack.i.h.bf16 %v3741_v28  ;;  %v3742_v0 = vunpack.i.l.bf16 %v3741_v28  ;;  %v1111_v28 = vsel %vm1110_vm6, %v4712_v21, %v3732_v39  ;;  %1444 = vmatpush.bf16.msra.mxu2 %v5231_v33 }
 0x220   :  { %3930 = vrot.lane.b32.xlu0 %v3929_v12, %s4355_s25  ;;  %v1131_v61 = vsel %vm1129_vm9, %v1112_v51, %v3743_v49 }
 0x221   :  { %2961 = vmatpush.bf16.msrb.mxu1 %v5073_v44  ;;  %v1130_v44 = vsel %vm1129_vm9, %v1111_v28, %v3742_v0  ;;  %v3737_v0 = vunpack.i.l.bf16 %v5134_v46  ;;  %v3758_v46 = vunpack.i.h.bf16 %v5240_v11  ;;  %v3757_v28 = vunpack.i.l.bf16 %v5240_v11 }
 0x222   :  { %1445 = vmatpush.bf16.msra.mxu2 %v5249_v58 }
 0x223   :  { %3482 = vmatmul.msk.bf16.gmra.mxu3 %vm1110_vm6, %v1244_v35  ;;  %3920 = vrot.lane.b32.xlu2 %v3919_v18, %s4356_s1  ;;  %v888_v35 = vsel %vm503_vm7, %v885_v59, %v887_v29  ;;  %v890_v18 = vsel %vm503_vm7, %v887_v29, %v889_v27 }
 0x224   :  { %3945 = vrot.lane.b32.xlu1 %v3944_v7, %s4354_s18  ;;  %v947_v7 = vrot.slane %v5109_v56, 2  ;;  %v3939_v60 = vpack.i.bf16 %v890_v18, %v888_v35  ;;  %v800_v56 = vrot.slane %v4717_v15, 6 }
 0x225   :  { %2962 = vmatpush.bf16.msrb.mxu1 %v5085_v10  ;;  %v5272_v29 = vpop.permute.xlu2 %3765 }
 0x226   :  { %v3751_v50 = vpop.permute.xlu1 %3750  ;;  %3007 = vmatpush.bf16.msrb.mxu2 %v5090_v25  ;;  %v3747_v25 = vunpack.i.l.bf16 %v5194_v57 }
 0x227   :  { %v3753_v12 = vunpack.i.h.bf16 %v3751_v50  ;;  %v3752_v22 = vunpack.i.l.bf16 %v3751_v50 }
 0x228   :  { %3935 = vrot.lane.b32.xlu0 %v3934_v47, %s4354_s18 }
 0x229   :  { %v1149_v21 = vsel %vm7037_vm10, %v1130_v44, %v3752_v22  ;;  %v1150_v8 = vsel %vm7037_vm10, %v1131_v61, %v3753_v12 }
 0x22a   :  { %v3726_v14 = vpop.permute.xlu0 %3725  ;;  %v1221_v26 = vpack.c.bf16 %v1150_v8, %v1149_v21  ;;  %3008 = vmatpush.bf16.msrb.mxu2 %v5130_v52  ;;  %v1114_v52 = vsel %vm1110_vm6, %v4741_v34, %v3738_v1 }
 0x22b   :  { %v3728_v32 = vunpack.i.h.bf16 %v3726_v14  ;;  %v3727_v2 = vunpack.i.l.bf16 %v3726_v14 }
 0x22c   :  { %1394 = vmatmul.bf16.vlgmr.msra.gmra.mxu1 %v1221_v26 }
 0x22d   :  { %v502_v38 = vmax.f32 %v4778_v16, %v3728_v32  ;;  %v501_v39 = vmax.f32 %v4782_v23, %v3727_v2  ;;  %v948_v16 = vsel %vm614_vm3, %v650_v42, %v947_v7  ;;  %v3748_v23 = vunpack.i.h.bf16 %v5194_v57 }
 0x22e   :  { %v5261_v10 = vpop.permute.xlu1 %3760  ;;  %3009 = vmatpush.bf16.msrb.mxu2 %v5150_v4 }
 0x22f   :  { %v504_v59 = vsel %vm503_vm7, %v502_v38, 0.0  ;;  %v1088_v49 = vrot.slane %v501_v39, 4  ;;  %v949_v47 = vrot.slane %v501_v39, 2  ;;  %v996_v57 = vrot.slane %v501_v39, 3 }
 0x230   :  { %v1090_v50 = vrot.slane %v504_v59, 4  ;;  %3940 = vrot.lane.b32.xlu0 %v3939_v60, %s4356_s1  ;;  %v951_v27 = vrot.slane %v504_v59, 2  ;;  %v998_v44 = vrot.slane %v504_v59, 3  ;;  %v1133_v32 = vsel %vm1129_vm9, %v1114_v52, %v3748_v23  ;;  %v5304_v60 = vpop.permute.xlu2 %3820 }
 0x231   :  { %v1089_v51 = vsel %vm1054_vm5, %v1086_v31, %v1088_v49  ;;  %v950_v42 = vsel %vm614_vm3, %v947_v7, %v949_v47  ;;  %v1113_v31 = vsel %vm1110_vm6, %v4717_v15, %v3737_v0  ;;  %v997_v2 = vsel %vm962_vm8, %v994_v5, %v996_v57 }
 0x232   :  { %v3771_v12 = vpop.permute.xlu0 %3770  ;;  %v1091_v22 = vsel %vm1054_vm5, %v1088_v49, %v1090_v50  ;;  %v952_v61 = vsel %vm614_vm3, %v949_v47, %v951_v27  ;;  %v3949_v21 = vpack.i.bf16 %v950_v42, %v948_v16  ;;  %v1132_v26 = vsel %vm1129_vm9, %v1113_v31, %v3747_v25  ;;  %3010 = vmatpush.bf16.msrb.mxu2 %v5173_v19  ;;  %v3605_v16 = vld [vmem:[%s7033_s0 + $0x58] sm:$0xff] }
 0x233   :  { %957 = vrot.lane.b32.xlu2 %v952_v61, %s4355_s25  ;;  %v1247_v8 = vpack.c.bf16 %v1091_v22, %v1089_v51  ;;  %v999_v35 = vsel %vm962_vm8, %v996_v57, %v998_v44  ;;  %v1151_v18 = vsel %vm7037_vm10, %v1132_v26, %v3757_v28  ;;  %v1152_v4 = vsel %vm7037_vm10, %v1133_v32, %v3758_v46 }
 0x234   :  { %3950 = vrot.lane.b32.xlu1 %v3949_v21, %s4355_s25  ;;  %v3954_v38 = vpack.i.bf16 %v999_v35, %v997_v2  ;;  %v1224_v39 = vpack.c.bf16 %v1152_v4, %v1151_v18  ;;  %v3762_v5 = vunpack.i.l.bf16 %v5261_v10  ;;  %v802_v59 = vrot.slane %v4741_v34, 6 }
 0x235   :  { %3483 = vmatmul.msk.bf16.gmra.mxu3 %vm1110_vm6, %v1247_v8  ;;  %v799_v19 = vrot.slane %v4709_v13, 6  ;;  %v3763_v49 = vunpack.i.h.bf16 %v5261_v10  ;;  %v3772_v47 = vunpack.i.l.bf16 %v3771_v12  ;;  %v3773_v10 = vunpack.i.h.bf16 %v3771_v12 }
 0x236   :  { %v5291_v11 = vpop.permute.xlu1 %3795  ;;  %v5293_v14 = vpop.f32.mrf.mxu3  ;;  %3011 = vmatpush.bf16.msrb.mxu2 %v5192_v53  ;;  %v803_v34 = vsel %vm7038_vm0, %v800_v56, %v802_v59  ;;  %v804_v61 = vrot.slane %v4752_v41, 6  ;;  %v3768_v32 = vunpack.i.h.bf16 %v5272_v29 }
 0x237   :  { %v801_v50 = vsel %vm7038_vm0, %v799_v19, %v800_v56  ;;  %v1168_v13 = vsel %vm1110_vm6, %v803_v34, %v3763_v49 }
 0x238   :  { %v1167_v15 = vsel %vm1110_vm6, %v801_v50, %v3762_v5  ;;  %v5325_v27 = vpop.permute.xlu2 %3825  ;;  %v805_v5 = vsel %vm7038_vm0, %v802_v59, %v804_v61  ;;  %v3798_v50 = vunpack.i.h.bf16 %v5291_v11 }
 0x239   :  { %v1185_v51 = vsel %vm1129_vm9, %v1167_v15, %v3748_v23  ;;  %v806_v23 = vrot.slane %v4749_v40, 6 }
 0x23a   :  { %v3776_v7 = vpop.permute.xlu0 %3775  ;;  %3012 = vmatpush.bf16.msrb.mxu2 %v5217_v36  ;;  %v1203_v28 = vsel %vm7037_vm10, %v1185_v51, %v3772_v47 }
 0x23b   :  { %3955 = vrot.lane.b32.xlu2 %v3954_v38, %s4354_s18  ;;  %v3778_v22 = vunpack.i.h.bf16 %v3776_v7  ;;  %v3777_v44 = vunpack.i.l.bf16 %v3776_v7 }
 0x23c   :  { %1399 = vmatmul.bf16.gmra.mxu1 %v1224_v39 }
 0x23d   :  { %v1115_v52 = vsel %vm1110_vm6, %v4752_v41, %v3777_v44  ;;  %v807_v41 = vsel %vm7038_vm0, %v804_v61, %v806_v23 }
 0x23e   :  { %v5310_v1 = vpop.f32.mrf.mxu3  ;;  %v5315_v0 = vpop.permute.xlu1 %3800  ;;  %3013 = vmatpush.bf16.msrb.mxu2 %v5231_v33  ;;  %v1116_v33 = vsel %vm1110_vm6, %v4749_v40, %v3778_v22  ;;  %v1170_v56 = vsel %vm1110_vm6, %v807_v41, %v3768_v32  ;;  %v3607_v41 = vld [vmem:[%s7033_s0 + $0x68] sm:$0xff] }
 0x23f   :  { %v3803_v59 = vunpack.i.h.bf16 %v5315_v0 }
 0x240   :  { %v5351_v39 = vpop.permute.xlu2 %3830 }
 0x242   :  { %v3781_v53 = vpop.permute.xlu0 %3780  ;;  %3014 = vmatpush.bf16.msrb.mxu2 %v5249_v58  ;;  %v3767_v58 = vunpack.i.l.bf16 %v5272_v29  ;;  %v3606_v29 = vld [vmem:[%s7033_s0 + $0x60] sm:$0xff] }
 0x243   :  { %v3782_v25 = vunpack.i.l.bf16 %v3781_v53  ;;  %v3783_v12 = vunpack.i.h.bf16 %v3781_v53  ;;  %v3797_v53 = vunpack.i.l.bf16 %v5291_v11  ;;  %v1118_v11 = vsel %vm1110_vm6, %v4796_v20, %v3803_v59 }
 0x244   :  { %v1169_v49 = vsel %vm1110_vm6, %v805_v5, %v3767_v58  ;;  %v3823_v58 = vunpack.i.h.bf16 %v5304_v60 }
 0x245   :  { %v1186_v36 = vsel %vm1129_vm9, %v1168_v13, %v3782_v25  ;;  %3550 = vmatmul.msk.bf16.vlgmr.msrb.gmra.mxu3 %vm159_vm1, %v3605_v16  ;;  %v1134_v2 = vsel %vm1129_vm9, %v1115_v52, %v3782_v25  ;;  %v1135_v35 = vsel %vm1129_vm9, %v1116_v33, %v3783_v12  ;;  %v1187_v47 = vsel %vm1129_vm9, %v1169_v49, %v3783_v12 }
 0x246   :  { %v5331_v46 = vpop.f32.mrf.mxu3  ;;  %v1204_v42 = vsel %vm7037_vm10, %v1186_v36, %v3773_v10  ;;  %v3806_v21 = vpop.permute.xlu1 %3805  ;;  %v3802_v25 = vunpack.i.l.bf16 %v5315_v0  ;;  %v1205_v51 = vsel %vm7037_vm10, %v1187_v47, %v3797_v53  ;;  %v810_v0 = vrot.slane %v4796_v20, 6 }
 0x247   :  { %v1222_v57 = vpack.c.bf16 %v1204_v42, %v1203_v28  ;;  %v3807_v18 = vunpack.i.l.bf16 %v3806_v21  ;;  %v3808_v13 = vunpack.i.h.bf16 %v3806_v21 }
 0x248   :  { %v1117_v22 = vsel %vm1110_vm6, %v4799_v54, %v3802_v25  ;;  %v3836_v44 = vpop.permute.xlu2 %3835 }
 0x249   :  { %1446 = vmatmul.bf16.vlgmr.msra.gmra.mxu2 %v1222_v57  ;;  %v1188_v19 = vsel %vm1129_vm9, %v1170_v56, %v3807_v18  ;;  %v808_v57 = vrot.slane %v4799_v54, 6  ;;  %v1137_v33 = vsel %vm1129_vm9, %v1118_v11, %v3808_v13  ;;  %v3838_v47 = vunpack.i.h.bf16 %v3836_v44 }
 0x24a   :  { %v3786_v8 = vpop.permute.xlu0 %3785  ;;  %v1206_v34 = vsel %vm7037_vm10, %v1188_v19, %v3798_v50  ;;  %v3828_v50 = vunpack.i.h.bf16 %v5325_v27  ;;  %v3837_v53 = vunpack.i.l.bf16 %v3836_v44 }
 0x24b   :  { %v3788_v31 = vunpack.i.h.bf16 %v3786_v8  ;;  %v3787_v26 = vunpack.i.l.bf16 %v3786_v8  ;;  %v1225_v42 = vpack.c.bf16 %v1206_v34, %v1205_v51  ;;  %v1136_v8 = vsel %vm1129_vm9, %v1117_v22, %v3807_v18 }
 0x24c   :  { %v811_v32 = vsel %vm7038_vm0, %v808_v57, %v810_v0  ;;  %v1120_v34 = vsel %vm1110_vm6, %v4844_v43, %v3828_v50  ;;  %v812_v51 = vrot.slane %v4824_v55, 6 }
 0x24d   :  { %v1153_v4 = vsel %vm7037_vm10, %v1134_v2, %v3787_v26  ;;  %v1154_v7 = vsel %vm7037_vm10, %v1135_v35, %v3788_v31  ;;  %v809_v26 = vsel %vm7038_vm0, %v806_v23, %v808_v57  ;;  %v3822_v23 = vunpack.i.l.bf16 %v5304_v60 }
 0x24e   :  { %v5348_v38 = vpop.f32.mrf.mxu3  ;;  %v1227_v40 = vpack.c.bf16 %v1154_v7, %v1153_v4  ;;  %v3811_v16 = vpop.permute.xlu1 %3810  ;;  %v3832_v4 = vunpack.i.l.bf16 %v5351_v39 }
 0x24f   :  { %v3813_v36 = vunpack.i.h.bf16 %v3811_v16  ;;  %v3812_v28 = vunpack.i.l.bf16 %v3811_v16 }
 0x250   :  { %1404 = vmatmul.bf16.gmra.mxu1 %v1227_v40  ;;  %v5396_v56 = vpop.permute.xlu2 %3840 }
 0x251   :  { %v1155_v52 = vsel %vm7037_vm10, %v1136_v8, %v3812_v28  ;;  %v1156_v31 = vsel %vm7037_vm10, %v1137_v33, %v3813_v36 }
 0x252   :  { %v3791_v15 = vpop.permute.xlu0 %3790  ;;  %v1230_v35 = vpack.c.bf16 %v1156_v31, %v1155_v52 }
 0x253   :  { %v3793_v12 = vunpack.i.h.bf16 %v3791_v15  ;;  %v3792_v61 = vunpack.i.l.bf16 %v3791_v15  ;;  %v3827_v15 = vunpack.i.l.bf16 %v5325_v27 }
 0x255   :  { %3551 = vmatmul.msk.bf16.gmra.mxu3 %vm159_vm1, %v3606_v29  ;;  %v1172_v54 = vsel %vm1110_vm6, %v811_v32, %v3793_v12  ;;  %v1171_v20 = vsel %vm1110_vm6, %v809_v26, %v3792_v61  ;;  %v3833_v29 = vunpack.i.h.bf16 %v5351_v39  ;;  %v1119_v59 = vsel %vm1110_vm6, %v4824_v55, %v3827_v15 }
 0x256   :  { %v5367_v10 = vpop.f32.mrf.mxu3  ;;  %v1189_v18 = vsel %vm1129_vm9, %v1171_v20, %v3808_v13  ;;  %v1190_v7 = vsel %vm1129_vm9, %v1172_v54, %v3832_v4  ;;  %v3816_v5 = vpop.permute.xlu1 %3815  ;;  %v1138_v27 = vsel %vm1129_vm9, %v1119_v59, %v3832_v4  ;;  %v814_v13 = vrot.slane %v4844_v43, 6  ;;  %v3608_v54 = vld [vmem:[%s7033_s0 + $0x70] sm:$0xff] }
 0x257   :  { %v1207_v19 = vsel %vm7037_vm10, %v1189_v18, %v3822_v23  ;;  %v1208_v49 = vsel %vm7037_vm10, %v1190_v7, %v3823_v58  ;;  %v1139_v39 = vsel %vm1129_vm9, %v1120_v34, %v3833_v29  ;;  %v1157_v28 = vsel %vm7037_vm10, %v1138_v27, %v3837_v53 }
 0x258   :  { %v1228_v16 = vpack.c.bf16 %v1208_v49, %v1207_v19  ;;  %v3818_v11 = vunpack.i.h.bf16 %v3816_v5  ;;  %v3817_v44 = vunpack.i.l.bf16 %v3816_v5  ;;  %v815_v8 = vsel %vm7038_vm0, %v812_v51, %v814_v13 }
 0x259   :  { %1451 = vmatmul.bf16.gmra.mxu2 %v1225_v42  ;;  %v1158_v42 = vsel %vm7037_vm10, %v1139_v39, %v3838_v47  ;;  %v813_v55 = vsel %vm7038_vm0, %v810_v0, %v812_v51  ;;  %v816_v47 = vrot.slane %v4869_v6, 6  ;;  %v818_v53 = vrot.slane %v4895_v45, 6 }
 0x25a   :  { %v5376_v21 = vpop.permute.xlu0 %3845  ;;  %v1233_v61 = vpack.c.bf16 %v1158_v42, %v1157_v28  ;;  %v1174_v43 = vsel %vm1110_vm6, %v815_v8, %v3818_v11  ;;  %v1173_v52 = vsel %vm1110_vm6, %v813_v55, %v3817_v44  ;;  %v3843_v59 = vunpack.i.h.bf16 %v5396_v56  ;;  %v3609_v8 = vld [vmem:[%s7033_s0 + $0x78] sm:$0xff] }
 0x25b   :  { %v3848_v31 = vunpack.i.h.bf16 %v5376_v21  ;;  %v3847_v26 = vunpack.i.l.bf16 %v5376_v21  ;;  %v1191_v0 = vsel %vm1129_vm9, %v1173_v52, %v3833_v29  ;;  %v819_v28 = vsel %vm7038_vm0, %v816_v47, %v818_v53 }
 0x25c   :  { %v1176_v11 = vsel %vm1110_vm6, %v819_v28, %v3843_v59 }
 0x25d   :  { %v5416_v36 = vpop.permute.xlu2 %3895  ;;  %v1209_v21 = vsel %vm7037_vm10, %v1191_v0, %v3847_v26 }
 0x25e   :  { %v5386_v2 = vpop.f32.mrf.mxu3  ;;  %v5421_v57 = vpop.permute.xlu1 %3870 }
 0x25f   :  { %v3872_v55 = vunpack.i.l.bf16 %v5421_v57 }
 0x260   :  { %1409 = vmatmul.bf16.gmra.mxu1 %v1230_v35 }
 0x262   :  { %v3851_v40 = vpop.permute.xlu0 %3850 }
 0x263   :  { %v3853_v35 = vunpack.i.h.bf16 %v3851_v40  ;;  %v3852_v4 = vunpack.i.l.bf16 %v3851_v40 }
 0x265   :  { %3552 = vmatmul.msk.bf16.gmra.mxu3 %vm159_vm1, %v3607_v41  ;;  %v5436_v18 = vpop.permute.xlu2 %3900  ;;  %v1122_v49 = vsel %vm1110_vm6, %v4895_v45, %v3853_v35  ;;  %v1121_v40 = vsel %vm1110_vm6, %v4869_v6, %v3852_v4  ;;  %v817_v45 = vsel %vm7038_vm0, %v814_v13, %v816_v47 }
 0x266   :  { %v5404_v60 = vpop.f32.mrf.mxu3 }
 0x269   :  { %1456 = vmatmul.bf16.gmra.mxu2 %v1228_v16 }
 0x26a   :  { %v5410_v25 = vpop.permute.xlu0 %3855 }
 0x26b   :  { %v3857_v22 = vunpack.i.l.bf16 %v5410_v25  ;;  %v3858_v7 = vunpack.i.h.bf16 %v5410_v25  ;;  %v3842_v25 = vunpack.i.l.bf16 %v5396_v56  ;;  %v3873_v56 = vunpack.i.h.bf16 %v5421_v57 }
 0x26d   :  { %v1192_v33 = vsel %vm1129_vm9, %v1174_v43, %v3857_v22  ;;  %v1140_v15 = vsel %vm1129_vm9, %v1121_v40, %v3857_v22  ;;  %v1141_v29 = vsel %vm1129_vm9, %v1122_v49, %v3858_v7  ;;  %v5460_v6 = vpop.permute.xlu2 %3905  ;;  %v1175_v44 = vsel %vm1110_vm6, %v817_v45, %v3842_v25 }
 0x26e   :  { %v5423_v12 = vpop.f32.mrf.mxu3  ;;  %v1210_v20 = vsel %vm7037_vm10, %v1192_v33, %v3848_v31  ;;  %v1193_v43 = vsel %vm1129_vm9, %v1175_v44, %v3858_v7  ;;  %v3902_v44 = vunpack.i.l.bf16 %v5436_v18 }
 0x26f   :  { %v1231_v19 = vpack.c.bf16 %v1210_v20, %v1209_v21 }
 0x270   :  { %1414 = vmatmul.bf16.gmra.mxu1 %v1233_v61 }
 0x272   :  { %v3861_v32 = vpop.permute.xlu0 %3860 }
 0x273   :  { %v3863_v41 = vunpack.i.h.bf16 %v3861_v32  ;;  %v3862_v5 = vunpack.i.l.bf16 %v3861_v32 }
 0x275   :  { %3553 = vmatmul.msk.bf16.gmra.mxu3 %vm159_vm1, %v3608_v54  ;;  %v1159_v16 = vsel %vm7037_vm10, %v1140_v15, %v3862_v5  ;;  %v1160_v34 = vsel %vm7037_vm10, %v1141_v29, %v3863_v41  ;;  %v1211_v54 = vsel %vm7037_vm10, %v1193_v43, %v3872_v55  ;;  %v3916_v7 = vpop.permute.xlu2 %3915  ;;  %v820_v5 = vrot.slane %v4929_v62, 6 }
 0x276   :  { %v3876_v58 = vpop.permute.xlu1 %3875  ;;  %v5441_v23 = vpop.f32.mrf.mxu3  ;;  %v1236_v51 = vpack.c.bf16 %v1160_v34, %v1159_v16  ;;  %v3918_v55 = vunpack.i.h.bf16 %v3916_v7 }
 0x277   :  { %v3878_v52 = vunpack.i.h.bf16 %v3876_v58  ;;  %v3877_v13 = vunpack.i.l.bf16 %v3876_v58  ;;  %v821_v16 = vsel %vm7038_vm0, %v818_v53, %v820_v5 }
 0x279   :  { %1461 = vmatmul.bf16.gmra.mxu2 %v1231_v19  ;;  %v1124_v0 = vsel %vm1110_vm6, %v4926_v9, %v3878_v52  ;;  %v1123_v57 = vsel %vm1110_vm6, %v4929_v62, %v3877_v13  ;;  %v822_v19 = vrot.slane %v4926_v9, 6  ;;  %v3907_v9 = vunpack.i.l.bf16 %v5460_v6 }
 0x27a   :  { %v3866_v50 = vpop.permute.xlu0 %3865 }
 0x27b   :  { %v3868_v15 = vunpack.i.h.bf16 %v3866_v50  ;;  %v3867_v29 = vunpack.i.l.bf16 %v3866_v50  ;;  %v823_v34 = vsel %vm7038_vm0, %v820_v5, %v822_v19  ;;  %v3610_v50 = vld [vmem:[%s7033_s0 + $0x80] sm:$0xff] }
 0x27d   :  { %v1178_v25 = vsel %vm1110_vm6, %v823_v34, %v3868_v15 }
 0x27e   :  { %v3881_v27 = vpop.permute.xlu1 %3880  ;;  %v5456_v39 = vpop.f32.mrf.mxu3  ;;  %v1196_v53 = vsel %vm1129_vm9, %v1178_v25, %v3907_v9 }
 0x27f   :  { %v3882_v42 = vunpack.i.l.bf16 %v3881_v27  ;;  %v3883_v31 = vunpack.i.h.bf16 %v3881_v27  ;;  %v1177_v27 = vsel %vm1110_vm6, %v821_v16, %v3867_v29 }
 0x280   :  { %1419 = vmatmul.bf16.gmra.mxu1 %v1236_v51  ;;  %v3897_v51 = vunpack.i.l.bf16 %v5416_v36 }
 0x281   :  { %v1194_v22 = vsel %vm1129_vm9, %v1176_v11, %v3882_v42  ;;  %v1142_v21 = vsel %vm1129_vm9, %v1123_v57, %v3882_v42  ;;  %v1143_v41 = vsel %vm1129_vm9, %v1124_v0, %v3883_v31  ;;  %v1195_v62 = vsel %vm1129_vm9, %v1177_v27, %v3883_v31  ;;  %v5506_v11 = vpop.permute.xlu2 %3920 }
 0x282   :  { %v5466_v61 = vpop.permute.xlu0 %3910  ;;  %v1212_v33 = vsel %vm7037_vm10, %v1194_v22, %v3873_v56  ;;  %v3898_v42 = vunpack.i.h.bf16 %v5416_v36  ;;  %v1213_v45 = vsel %vm7037_vm10, %v1195_v62, %v3897_v51  ;;  %v3903_v22 = vunpack.i.h.bf16 %v5436_v18 }
 0x283   :  { %v1234_v4 = vpack.c.bf16 %v1212_v33, %v1211_v54  ;;  %v3917_v33 = vunpack.i.l.bf16 %v3916_v7  ;;  %v1125_v31 = vsel %vm1110_vm6, %v5020_v63, %v3902_v44  ;;  %v826_v54 = vrot.slane %v5017_v30, 6 }
 0x284   :  { %v1214_v43 = vsel %vm7037_vm10, %v1196_v53, %v3898_v42  ;;  %v1126_v13 = vsel %vm1110_vm6, %v5017_v30, %v3903_v22  ;;  %v3613_v30 = vld [vmem:[%s7033_s0 + $0x98] sm:$0xff] }
 0x285   :  { %3554 = vmatmul.msk.bf16.gmra.mxu3 %vm159_vm1, %v3609_v8  ;;  %v3908_v8 = vunpack.i.h.bf16 %v5460_v6  ;;  %v1237_v36 = vpack.c.bf16 %v1214_v43, %v1213_v45  ;;  %v830_v45 = vrot.slane %v5054_v37, 6 }
 0x286   :  { %v3886_v26 = vpop.permute.xlu1 %3885  ;;  %v5475_v32 = vpop.f32.mrf.mxu3 }
 0x287   :  { %v3888_v20 = vunpack.i.h.bf16 %v3886_v26  ;;  %v3887_v35 = vunpack.i.l.bf16 %v3886_v26  ;;  %v1144_v26 = vsel %vm1129_vm9, %v1125_v31, %v3907_v9  ;;  %v1145_v6 = vsel %vm1129_vm9, %v1126_v13, %v3908_v8 }
 0x288   :  { %v3913_v9 = vunpack.i.h.bf16 %v5466_v61 }
 0x289   :  { %1466 = vmatmul.bf16.gmra.mxu2 %v1234_v4  ;;  %v1161_v49 = vsel %vm7037_vm10, %v1142_v21, %v3887_v35  ;;  %v1162_v40 = vsel %vm7037_vm10, %v1143_v41, %v3888_v20  ;;  %v824_v20 = vrot.slane %v5020_v63, 6  ;;  %v1163_v35 = vsel %vm7037_vm10, %v1144_v26, %v3917_v33 }
 0x28a   :  { %v5482_v58 = vpop.permute.xlu0 %3925  ;;  %v1239_v47 = vpack.c.bf16 %v1162_v40, %v1161_v49  ;;  %v1164_v4 = vsel %vm7037_vm10, %v1145_v6, %v3918_v55 }
 0x28b   :  { %v1242_v41 = vpack.c.bf16 %v1164_v4, %v1163_v35  ;;  %v825_v5 = vsel %vm7038_vm0, %v822_v19, %v824_v20  ;;  %v827_v49 = vsel %vm7038_vm0, %v824_v20, %v826_v54  ;;  %v3928_v16 = vunpack.i.h.bf16 %v5482_v58  ;;  %v3611_v19 = vld [vmem:[%s7033_s0 + $0x88] sm:$0xff] }
 0x28c   :  { %v3927_v62 = vunpack.i.l.bf16 %v5482_v58  ;;  %v828_v20 = vrot.slane %v5039_v48, 6 }
 0x28d   :  { %v958_v0 = vpop.permute.xlu2 %957 }
 0x28e   :  { %v5492_v59 = vpop.f32.mrf.mxu3  ;;  %v3891_v56 = vpop.permute.xlu1 %3890 }
 0x28f   :  { %v3893_v57 = vunpack.i.h.bf16 %v3891_v56  ;;  %v3892_v7 = vunpack.i.l.bf16 %v3891_v56 }
 0x290   :  { %1424 = vmatmul.bf16.gmra.mxu1 %v1239_v47 }
 0x291   :  { %v1180_v63 = vsel %vm1110_vm6, %v827_v49, %v3893_v57  ;;  %v1179_v29 = vsel %vm1110_vm6, %v825_v5, %v3892_v7  ;;  %v3923_v7 = vunpack.i.h.bf16 %v5506_v11 }
 0x292   :  { %v5499_v28 = vpop.permute.xlu0 %3930  ;;  %v1197_v27 = vsel %vm1129_vm9, %v1179_v29, %v3908_v8 }
 0x293   :  { %v3932_v21 = vunpack.i.l.bf16 %v5499_v28  ;;  %v3933_v22 = vunpack.i.h.bf16 %v5499_v28  ;;  %v1215_v56 = vsel %vm7037_vm10, %v1197_v27, %v3927_v62  ;;  %v829_v27 = vsel %vm7038_vm0, %v826_v54, %v828_v20 }
 0x295   :  { %3555 = vmatmul.msk.bf16.gmra.mxu3 %vm159_vm1, %v3610_v50  ;;  %v1198_v47 = vsel %vm1129_vm9, %v1180_v63, %v3932_v21  ;;  %v3912_v50 = vunpack.i.l.bf16 %v5466_v61  ;;  %v3956_v44 = vpop.permute.xlu2 %3955  ;;  %v1128_v61 = vsel %vm1110_vm6, %v5054_v37, %v3913_v9  ;;  %v3922_v63 = vunpack.i.l.bf16 %v5506_v11 }
 0x296   :  { %v5514_v52 = vpop.f32.mrf.mxu3  ;;  %v5531_v40 = vpop.permute.xlu1 %3945  ;;  %v1216_v51 = vsel %vm7037_vm10, %v1198_v47, %v3928_v16  ;;  %v3958_v31 = vunpack.i.h.bf16 %v3956_v44  ;;  %v3957_v26 = vunpack.i.l.bf16 %v3956_v44  ;;  %v1147_v3 = vsel %vm1129_vm9, %v1128_v61, %v3933_v22  ;;  %v5607_v61 = vld [vmem:[%s7032_s2] ss:$0 sm:$0xff] }
 0x297   :  { %v1240_v33 = vpack.c.bf16 %v1216_v51, %v1215_v56  ;;  %v1127_v13 = vsel %vm1110_vm6, %v5039_v48, %v3912_v50  ;;  %v831_v48 = vsel %vm7038_vm0, %v828_v20, %v830_v45  ;;  %v1181_v11 = vsel %vm1110_vm6, %v829_v27, %v3922_v63 }
 0x298   :  { %v1146_v37 = vsel %vm1129_vm9, %v1127_v13, %v3932_v21  ;;  %v1182_v21 = vsel %vm1110_vm6, %v831_v48, %v3923_v7  ;;  %v1199_v62 = vsel %vm1129_vm9, %v1181_v11, %v3933_v22 }
 0x299   :  { %1471 = vmatmul.bf16.gmra.mxu2 %v1237_v36 }
 0x29a   :  { %v3936_v18 = vpop.permute.xlu0 %3935 }
 0x29b   :  { %v3938_v8 = vunpack.i.h.bf16 %v3936_v18  ;;  %v3937_v43 = vunpack.i.l.bf16 %v3936_v18 }
 0x29d   :  { %v1165_v35 = vsel %vm7037_vm10, %v1146_v37, %v3937_v43  ;;  %v1166_v4 = vsel %vm7037_vm10, %v1147_v3, %v3938_v8  ;;  %v5601_v8 = vld [vmem:[%s7035_s4] ss:$0 sm:$0xff] }
 0x29e   :  { %v5533_v15 = vpop.f32.mrf.mxu3  ;;  %v1245_v49 = vpack.c.bf16 %v1166_v4, %v1165_v35 }
 0x2a0   :  { %1429 = vmatmul.bf16.gmra.mxu1 %v1242_v41 }
 0x2a2   :  { %v3941_v34 = vpop.permute.xlu0 %3940 }
 0x2a3   :  { %v3943_v25 = vunpack.i.h.bf16 %v3941_v34  ;;  %v3942_v42 = vunpack.i.l.bf16 %v3941_v34  ;;  %v3948_v34 = vunpack.i.h.bf16 %v5531_v40 }
 0x2a5   :  { %v1184_v53 = vsel %vm1110_vm6, %v5158_v17, %v3943_v25  ;;  %3556 = vmatmul.msk.bf16.gmra.mxu3 %vm159_vm1, %v3611_v19  ;;  %v833_v17 = vsel %vm7038_vm0, %v830_v45, %v832_v24  ;;  %v3947_v19 = vunpack.i.l.bf16 %v5531_v40  ;;  %v3612_v25 = vld [vmem:[%s7033_s0 + $0x90] sm:$0xff] }
 0x2a6   :  { %v5553_v58 = vpop.f32.mrf.mxu3  ;;  %v3951_v55 = vpop.permute.xlu1 %3950  ;;  %v1202_v28 = vsel %vm1129_vm9, %v1184_v53, %v958_v0  ;;  %v1183_v18 = vsel %vm1110_vm6, %v833_v17, %v3942_v42 }
 0x2a7   :  { %v3953_v36 = vunpack.i.h.bf16 %v3951_v55  ;;  %v1220_v57 = vsel %vm7037_vm10, %v1202_v28, %v3958_v31  ;;  %v3952_v5 = vunpack.i.l.bf16 %v3951_v55  ;;  %v1217_v51 = vsel %vm7037_vm10, %v1199_v62, %v3947_v19 }
 0x2a9   :  { %v1395_v6 = vpop.f32.mrf.mxu1  ;;  %1476 = vmatmul.bf16.gmra.mxu2 %v1240_v33  ;;  %v1201_v24 = vsel %vm1129_vm9, %v1183_v18, %v3953_v36  ;;  %v1200_v16 = vsel %vm1129_vm9, %v1182_v21, %v3952_v5 }
 0x2aa   :  { %v1219_v0 = vsel %vm7037_vm10, %v1201_v24, %v3957_v26  ;;  %v1218_v9 = vsel %vm7037_vm10, %v1200_v16, %v3948_v34  ;;  %v1396_v13 = vadd.f32 %v5601_v8, %v1395_v6  ;;  %vm5927_vm10 = vmand %vm1763_vm14, %vm1764_vm15  ;;  %vm7048_vm14 = vcmask 785408  }
 0x2ab   :  { %v1246_v41 = vpack.c.bf16 %v1220_v57, %v1219_v0  ;;  %v1243_v50 = vpack.c.bf16 %v1218_v9, %v1217_v51  ;;  %vm7049_vm15 = vmmov %vm7048_vm14 }
 0x2ae   :  { %v5576_v29 = vpop.f32.mrf.mxu3 }
 0x2b0   :  { %1434 = vmatmul.bf16.gmra.mxu1 %v1245_v49 }
 0x2b1   :  { %v1397_v47 = vpop.f32.mrf.mxu1 }
 0x2b2   :  { %v1398_v55 = vadd.f32 %v5601_v8, %v1397_v47 }
 0x2b5   :  { %3557 = vmatmul.msk.bf16.gmra.mxu3 %vm159_vm1, %v3612_v25 }
 0x2b8   :  { %v1539_v40 = vpop.f32.mrf.mxu3 }
 0x2b9   :  { %1481 = vmatmul.bf16.gmra.mxu2 %v1243_v50  ;;  %v1400_v53 = vpop.f32.mrf.mxu1 }
 0x2ba   :  { %v1401_v18 = vadd.f32 %v5601_v8, %v1400_v53 }
 0x2c0   :  { %v1540_v42 = vpop.f32.mrf.mxu3 }
 0x2c1   :  { %v1402_v45 = vpop.f32.mrf.mxu1 }
 0x2c5   :  { %3558 = vmatmul.msk.bf16.gmra.mxu3 %vm159_vm1, %v3613_v30 }
 0x2c8   :  { %v5592_v44 = vpop.f32.mrf.mxu3 }
 0x2c9   :  { %1486 = vmatmul.bf16.gmra.mxu2 %v1246_v41 }
 0x2cc   :  { %v1447_v54 = vpop.f32.mrf.mxu2 }
 0x2cd   :  { %v1405_v22 = vpop.f32.mrf.mxu1  ;;  %v1448_v37 = vadd.f32 %v1447_v54, %v1396_v13 }
 0x2ce   :  { %v1406_v51 = vadd.f32 %v5601_v8, %v1405_v22 }
 0x2cf   :  { %v1500_v7 = vadd.f32 %v5293_v14, %v1448_v37 }
 0x2d0   :  { %v1897_v56 = vpop.f32.mrf.mxu3 }
 0x2d1   :  { %v5610_v17 = vadd.f32 %v5607_v61, %v1897_v56  ;;  %v1542_v48 = vmax.f32 %v1500_v7, 0.0 }
 0x2d3   :  { %v1951_v31 = vmax.f32 %v5610_v17, 0.0 }
 0x2d4   :  { %v1449_v43 = vpop.f32.mrf.mxu2 }
 0x2d5   :  { %v1407_v33 = vpop.f32.mrf.mxu1  ;;  %v1450_v36 = vadd.f32 %v1449_v43, %v1398_v55  ;;  %v1403_v55 = vadd.f32 %v5601_v8, %v1402_v45 }
 0x2d6   :  { %v1408_v56 = vadd.f32 %v5601_v8, %v1407_v33 }
 0x2d7   :  { %v1502_v20 = vadd.f32 %v5310_v1, %v1450_v36 }
 0x2d8   :  { %v1900_v28 = vpop.f32.mrf.mxu3 }
 0x2d9   :  { %v5615_v26 = vadd.f32 %v5607_v61, %v1900_v28  ;;  %v1543_v0 = vmax.f32 %v1502_v20, 0.0 }
 0x2db   :  { %v1952_v3 = vmax.f32 %v5615_v26, 0.0  ;;  %v1560_v5 = vrot.slane %v1543_v0, 5 }
 0x2dc   :  { %v1452_v24 = vpop.f32.mrf.mxu2 }
 0x2dd   :  { %v1453_v35 = vadd.f32 %v1452_v24, %v1401_v18  ;;  %v1410_v4 = vpop.f32.mrf.mxu1  ;;  %v3964_v6 = vpack.i.bf16 %v1952_v3, %v1951_v31 }
 0x2de   :  { %v1411_v45 = vadd.f32 %v5601_v8, %v1410_v4 }
 0x2df   :  { %v1505_v57 = vadd.f32 %v5331_v46, %v1453_v35  ;;  %3965 = vrot.lane.b32.xlu2 %v3964_v6, %s4354_s18 }
 0x2e0   :  { %v1902_v1 = vpop.f32.mrf.mxu3 }
 0x2e1   :  { %v1544_v41 = vmax.f32 %v1505_v57, 0.0  ;;  %v5635_v14 = vadd.f32 %v5607_v61, %v1902_v1 }
 0x2e3   :  { %v1561_v49 = vrot.slane %v1544_v41, 5  ;;  %v1953_v42 = vmax.f32 %v5635_v14, 0.0 }
 0x2e4   :  { %v1454_v21 = vpop.f32.mrf.mxu2 }
 0x2e5   :  { %v1562_v63 = vsel %vm707_vm4, %v1560_v5, %v1561_v49  ;;  %v5628_v47 = vmax.f32 %v1543_v0, %v1561_v49  ;;  %v5630_v16 = vpop.f32.mrf.mxu1  ;;  %v1455_v18 = vadd.f32 %v1454_v21, %v1403_v55 }
 0x2e6   :  { %v1565_v34 = vmax.f32 %v1542_v48, %v1562_v63 }
 0x2e8   :  { %v1568_v19 = vrot.slane %v1565_v34, 1  ;;  %v1905_v25 = vpop.f32.mrf.mxu3 }
 0x2e9   :  { %v5638_v27 = vadd.f32 %v5607_v61, %v1905_v25 }
 0x2ea   :  { %v5632_v46 = vmax.f32 %v1565_v34, %v1568_v19 }
 0x2eb   :  { %v1954_v30 = vmax.f32 %v5638_v27, 0.0 }
 0x2ec   :  { %v1457_v11 = vpop.f32.mrf.mxu2  ;;  %v1576_v9 = vrot.slane %v5632_v46, 2  ;;  %v1582_v62 = vrot.slane %v5632_v46, 6 }
 0x2ed   :  { %v1415_v50 = vpop.f32.mrf.mxu1  ;;  %v1458_v53 = vadd.f32 %v1457_v11, %v1406_v51  ;;  %v3969_v22 = vpack.i.bf16 %v1954_v30, %v1953_v42  ;;  %v1572_v51 = vrot.slane %v5628_v47, 1 }
 0x2ee   :  { %v3959_v40 = vpack.i.bf16 %v1582_v62, %v1576_v9  ;;  %v1416_v55 = vadd.f32 %v5601_v8, %v1415_v50 }
 0x2ef   :  { %v1510_v43 = vadd.f32 %v5367_v10, %v1458_v53  ;;  %v1507_v10 = vadd.f32 %v5348_v38, %v1455_v18 }
 0x2f0   :  { %3960 = vrot.lane.b32.xlu0 %v3959_v40, %s4355_s25  ;;  %v1907_v54 = vpop.f32.mrf.mxu3 }
 0x2f1   :  { %v1546_v20 = vmax.f32 %v1510_v43, 0.0  ;;  %v1545_v1 = vmax.f32 %v1507_v10, 0.0 }
 0x2f3   :  { %v1591_v35 = vrot.slane %v1546_v20, 5 }
 0x2f4   :  { %v1459_v36 = vpop.f32.mrf.mxu2 }
 0x2f5   :  { %v1460_v28 = vadd.f32 %v1459_v36, %v1408_v56  ;;  %v1417_v13 = vpop.f32.mrf.mxu1 }
 0x2f7   :  { %v1512_v37 = vadd.f32 %v5386_v2, %v1460_v28 }
 0x2f8   :  { %3970 = vrot.lane.b32.xlu0 %v3969_v22, %s4354_s18  ;;  %v1910_v33 = vpop.f32.mrf.mxu3  ;;  %v1574_v22 = vmax.f32 %v5628_v47, %v1572_v51  ;;  %v5693_v47 = vadd.f32 %v5607_v61, %v5592_v44 }
 0x2f9   :  { %v1547_v24 = vmax.f32 %v1512_v37, 0.0  ;;  %v5661_v5 = vadd.f32 %v5607_v61, %v1910_v33  ;;  %v5682_v33 = vadd.f32 %v5607_v61, %v1907_v54  ;;  %v1413_v54 = vadd.f32 %v5601_v8, %v5630_v16 }
 0x2fb   :  { %v1592_v6 = vrot.slane %v1547_v24, 5  ;;  %v1956_v38 = vmax.f32 %v5661_v5, 0.0 }
 0x2fc   :  { %v1462_v0 = vpop.f32.mrf.mxu2 }
 0x2fd   :  { %v1593_v57 = vsel %vm707_vm4, %v1591_v35, %v1592_v6  ;;  %v1463_v7 = vadd.f32 %v1462_v0, %v1411_v45  ;;  %v5658_v41 = vpop.f32.mrf.mxu1 }
 0x2fe   :  { %v1598_v49 = vmax.f32 %v1545_v1, %v1593_v57  ;;  %v1955_v57 = vmax.f32 %v5682_v33, 0.0 }
 0x2ff   :  { %v1515_v2 = vadd.f32 %v5404_v60, %v1463_v7 }
 0x300   :  { %v1912_v21 = vpop.f32.mrf.mxu3  ;;  %v1601_v34 = vrot.slane %v1598_v49, 1 }
 0x301   :  { %v1548_v48 = vmax.f32 %v1515_v2, 0.0  ;;  %v5666_v4 = vadd.f32 %v5607_v61, %v1912_v21  ;;  %v1950_v2 = vmax.f32 %v5693_v47, 0.0 }
 0x302   :  { %v5676_v40 = vmax.f32 %v1598_v49, %v1601_v34 }
 0x303   :  { %v1594_v63 = vrot.slane %v1548_v48, 5  ;;  %v1957_v19 = vmax.f32 %v5666_v4, 0.0  ;;  %v3979_v16 = vpack.i.bf16 %v1950_v2, %v1955_v57 }
 0x304   :  { %v1464_v25 = vpop.f32.mrf.mxu2  ;;  %v1609_v28 = vrot.slane %v5676_v40, 2 }
 0x305   :  { %v1595_v11 = vsel %vm707_vm4, %v1592_v6, %v1594_v63  ;;  %v1422_v9 = vpop.f32.mrf.mxu1  ;;  %v3984_v60 = vpack.i.bf16 %v1957_v19, %v1956_v38  ;;  %v1465_v44 = vadd.f32 %v1464_v25, %v1413_v54 }
 0x306   :  { %v1599_v62 = vmax.f32 %v1546_v20, %v1595_v11 }
 0x307   :  { %3985 = vrot.lane.b32.xlu2 %v3984_v60, %s4354_s18  ;;  %v1517_v25 = vadd.f32 %v5423_v12, %v1465_v44 }
 0x308   :  { %v1605_v53 = vrot.slane %v1599_v62, 1  ;;  %v1915_v56 = vpop.f32.mrf.mxu3 }
 0x309   :  { %v5685_v10 = vadd.f32 %v5607_v61, %v1915_v56 }
 0x30a   :  { %v1607_v43 = vmax.f32 %v1599_v62, %v1605_v53 }
 0x30b   :  { %v1958_v7 = vmax.f32 %v5685_v10, 0.0 }
 0x30c   :  { %v1467_v36 = vpop.f32.mrf.mxu2  ;;  %v1616_v18 = vrot.slane %v1607_v43, 6  ;;  %v1717_v37 = vrot.slane %v1607_v43, 1  ;;  %v1549_v43 = vmax.f32 %v1517_v25, 0.0  ;;  %v1421_v25 = vadd.f32 %v5601_v8, %v5658_v41 }
 0x30d   :  { %v1468_v24 = vadd.f32 %v1467_v36, %v1416_v55  ;;  %v1425_v20 = vpop.f32.mrf.mxu1 }
 0x30e   :  { %v3974_v45 = vpack.i.bf16 %v1616_v18, %v1609_v28  ;;  %v5688_v35 = vsel %vm503_vm7, %v1574_v22, %v1717_v37 }
 0x30f   :  { %v1520_v50 = vadd.f32 %v5441_v23, %v1468_v24  ;;  %v1418_v23 = vadd.f32 %v5601_v8, %v1417_v13 }
 0x310   :  { %3975 = vrot.lane.b32.xlu1 %v3974_v45, %s4355_s25  ;;  %v1917_v0 = vpop.f32.mrf.mxu3 }
 0x311   :  { %v1550_v6 = vmax.f32 %v1520_v50, 0.0  ;;  %v5701_v1 = vadd.f32 %v5607_v61, %v1917_v0 }
 0x313   :  { %v1624_v49 = vrot.slane %v1550_v6, 5  ;;  %v1959_v21 = vmax.f32 %v5701_v1, 0.0  ;;  %v1423_v6 = vadd.f32 %v5601_v8, %v1422_v9 }
 0x314   :  { %v1469_v63 = vpop.f32.mrf.mxu2 }
 0x315   :  { %v1470_v34 = vadd.f32 %v1469_v63, %v1418_v23  ;;  %v5706_v11 = vpop.f32.mrf.mxu1  ;;  %v3994_v13 = vpack.i.bf16 %v1959_v21, %v1958_v7  ;;  %v1629_v62 = vmax.f32 %v1548_v48, %v1624_v49 }
 0x317   :  { %v1522_v60 = vadd.f32 %v5456_v39, %v1470_v34  ;;  %3995 = vrot.lane.b32.xlu0 %v3994_v13, %s4354_s18  ;;  %v1632_v55 = vrot.slane %v1629_v62, 1 }
 0x318   :  { %3980 = vrot.lane.b32.xlu1 %v3979_v16, %s4354_s18  ;;  %v1920_v53 = vpop.f32.mrf.mxu3 }
 0x319   :  { %v1551_v51 = vmax.f32 %v1522_v60, 0.0  ;;  %v5722_v37 = vadd.f32 %v5607_v61, %v1920_v53  ;;  %v5724_v39 = vmax.f32 %v1629_v62, %v1632_v55  ;;  %v1426_v62 = vadd.f32 %v5601_v8, %v1425_v20 }
 0x31b   :  { %v1625_v56 = vrot.slane %v1551_v51, 5  ;;  %v1960_v24 = vmax.f32 %v5722_v37, 0.0  ;;  %v1640_v23 = vrot.slane %v5724_v39, 2 }
 0x31c   :  { %v1472_v22 = vpop.f32.mrf.mxu2 }
 0x31d   :  { %v1626_v36 = vsel %vm707_vm4, %v1624_v49, %v1625_v56  ;;  %v1430_v28 = vpop.f32.mrf.mxu1  ;;  %v1473_v56 = vadd.f32 %v1472_v22, %v1421_v25 }
 0x31e   :  { %v1630_v18 = vmax.f32 %v1549_v43, %v1626_v36 }
 0x320   :  { %v1636_v12 = vrot.slane %v1630_v18, 1  ;;  %v1922_v48 = vpop.f32.mrf.mxu3 }
 0x321   :  { %v5728_v45 = vadd.f32 %v5607_v61, %v1922_v48  ;;  %v1525_v48 = vadd.f32 %v5475_v32, %v1473_v56 }
 0x322   :  { %v5730_v50 = vmax.f32 %v1630_v18, %v1636_v12 }
 0x323   :  { %v1961_v0 = vmax.f32 %v5728_v45, 0.0 }
 0x324   :  { %v1474_v54 = vpop.f32.mrf.mxu2  ;;  %v1647_v44 = vrot.slane %v5730_v50, 6 }
 0x325   :  { %v1475_v49 = vadd.f32 %v1474_v54, %v1423_v6  ;;  %v1432_v63 = vpop.f32.mrf.mxu1  ;;  %v4004_v34 = vpack.i.bf16 %v1961_v0, %v1960_v24 }
 0x326   :  { %v3989_v16 = vpack.i.bf16 %v1647_v44, %v1640_v23  ;;  %v1552_v23 = vmax.f32 %v1525_v48, 0.0 }
 0x327   :  { %v1527_v13 = vadd.f32 %v5492_v59, %v1475_v49  ;;  %4005 = vrot.lane.b32.xlu1 %v4004_v34, %s4354_s18 }
 0x328   :  { %3990 = vrot.lane.b32.xlu2 %v3989_v16, %s4355_s25  ;;  %v1925_v60 = vpop.f32.mrf.mxu3 }
 0x329   :  { %v1553_v9 = vmax.f32 %v1527_v13, 0.0  ;;  %v5749_v59 = vadd.f32 %v5607_v61, %v1925_v60 }
 0x32b   :  { %v1655_v53 = vrot.slane %v1553_v9, 5  ;;  %v1962_v41 = vmax.f32 %v5749_v59, 0.0 }
 0x32c   :  { %v1477_v43 = vpop.f32.mrf.mxu2 }
 0x32d   :  { %v5746_v55 = vmax.f32 %v1551_v51, %v1655_v53  ;;  %v1478_v36 = vadd.f32 %v1477_v43, %v1426_v62  ;;  %v1435_v18 = vpop.f32.mrf.mxu1 }
 0x32f   :  { %v1530_v12 = vadd.f32 %v5514_v52, %v1478_v36 }
 0x330   :  { %v1927_v54 = vpop.f32.mrf.mxu3 }
 0x331   :  { %v1554_v6 = vmax.f32 %v1530_v12, 0.0  ;;  %v5755_v20 = vadd.f32 %v5607_v61, %v1927_v54  ;;  %v1428_v12 = vadd.f32 %v5601_v8, %v5706_v11  ;;  %v1433_v54 = vadd.f32 %v5601_v8, %v1432_v63 }
 0x333   :  { %v1656_v22 = vrot.slane %v1554_v6, 5  ;;  %v1963_v51 = vmax.f32 %v5755_v20, 0.0 }
 0x334   :  { %v1479_v44 = vpop.f32.mrf.mxu2 }
 0x335   :  { %v1657_v49 = vsel %vm707_vm4, %v1655_v53, %v1656_v22  ;;  %v1436_v34 = vpop.f32.mrf.mxu1  ;;  %v4009_v32 = vpack.i.bf16 %v1963_v51, %v1962_v41  ;;  %v1431_v53 = vadd.f32 %v5601_v8, %v1430_v28 }
 0x336   :  { %v1661_v16 = vmax.f32 %v1552_v23, %v1657_v49  ;;  %v1480_v23 = vadd.f32 %v1479_v44, %v1428_v12 }
 0x337   :  { %4010 = vrot.lane.b32.xlu2 %v4009_v32, %s4354_s18 }
 0x338   :  { %v1667_v52 = vrot.slane %v1661_v16, 1  ;;  %v1930_v22 = vpop.f32.mrf.mxu3 }
 0x339   :  { %v3966_v9 = vpop.permute.xlu2 %3965 }
 0x33a   :  { %v5764_v13 = vmax.f32 %v1661_v16, %v1667_v52  ;;  %v3968_v56 = vunpack.i.h.bf16 %v3966_v9  ;;  %v3967_v43 = vunpack.i.l.bf16 %v3966_v9 }
 0x33c   :  { %v1482_v60 = vpop.f32.mrf.mxu2  ;;  %v1671_v25 = vrot.slane %v5764_v13, 2  ;;  %v1677_v62 = vrot.slane %v5764_v13, 6  ;;  %v5774_v48 = vmax.f32 %v1952_v3, %v3968_v56  ;;  %v5778_v6 = vmax.f32 %v1951_v31, %v3967_v43 }
 0x33d   :  { %v1483_v18 = vadd.f32 %v1482_v60, %v1431_v53  ;;  %v1532_v3 = vadd.f32 %v5533_v15, %v1480_v23  ;;  %v1725_v60 = vrot.slane %v5730_v50, 2 }
 0x33e   :  { %v3999_v36 = vpack.i.bf16 %v1677_v62, %v1671_v25  ;;  %v4019_v16 = vpack.i.bf16 %v5774_v48, %v5778_v6  ;;  %v1733_v62 = vrot.slane %v5764_v13, 3 }
 0x33f   :  { %v1535_v28 = vadd.f32 %v5553_v58, %v1483_v18  ;;  %v1555_v8 = vmax.f32 %v1532_v3, 0.0  ;;  %v1751_v43 = vsel %vm7038_vm0, %v5688_v35, %v1725_v60 }
 0x340   :  { %4000 = vrot.lane.b32.xlu0 %v3999_v36, %s4355_s25  ;;  %v1932_v52 = vpop.f32.mrf.mxu3  ;;  %v1754_v36 = vsel %vm707_vm4, %v1751_v43, %v1733_v62 }
 0x341   :  { %v1556_v11 = vmax.f32 %v1535_v28, 0.0  ;;  %v5839_v5 = vadd.f32 %v5607_v61, %v1932_v52 }
 0x343   :  { %v1685_v31 = vrot.slane %v1556_v11, 5  ;;  %v1965_v52 = vmax.f32 %v5839_v5, 0.0 }
 0x344   :  { %v1484_v49 = vpop.f32.mrf.mxu2 }
 0x345   :  { %v1485_v34 = vadd.f32 %v1484_v49, %v1433_v54  ;;  %v1772_v49 = vld [vmem:[%s7036_s5 + $0x8] sm:$0x7] }
 0x347   :  { %v1537_v26 = vadd.f32 %v5576_v29, %v1485_v34 }
 0x348   :  { %4020 = vrot.lane.b32.xlu0 %v4019_v16, %s4355_s25  ;;  %v1935_v16 = vpop.f32.mrf.mxu3 }
 0x349   :  { %v1557_v17 = vmax.f32 %v1537_v26, 0.0  ;;  %v3614_v26 = vld [vmem:[%s7033_s0 + $0xa0] sm:$0xff] }
 0x34a   :  { %3559 = vmatmul.msk.bf16.gmra.mxu3 %vm159_vm1, %v3614_v26 }
 0x34b   :  { %v1686_v32 = vrot.slane %v1557_v17, 5 }
 0x34c   :  { %v1487_v63 = vpop.f32.mrf.mxu2 }
 0x34d   :  { %v1687_v58 = vsel %vm707_vm4, %v1685_v31, %v1686_v32  ;;  %v1691_v44 = vmax.f32 %v1556_v11, %v1686_v32  ;;  %v5817_v63 = vadd.f32 %v5607_v61, %v1935_v16 }
 0x34e   :  { %v1690_v9 = vmax.f32 %v1555_v8, %v1687_v58 }
 0x34f   :  { %v1697_v25 = vrot.slane %v1691_v44, 1 }
 0x350   :  { %v1693_v29 = vrot.slane %v1690_v9, 1  ;;  %v1937_v3 = vpop.f32.mrf.mxu3 }
 0x351   :  { %v1699_v53 = vmax.f32 %v1691_v44, %v1697_v25  ;;  %v1966_v25 = vmax.f32 %v5817_v63, 0.0 }
 0x352   :  { %v5790_v15 = vmax.f32 %v1690_v9, %v1693_v29  ;;  %v5828_v9 = vadd.f32 %v5607_v61, %v1937_v3 }
 0x353   :  { %v1742_v56 = vrot.slane %v1699_v53, 4  ;;  %v5836_v53 = vadd.f32 %v5607_v61, %v1930_v22 }
 0x354   :  { %v1488_v18 = vpop.f32.mrf.mxu2  ;;  %v1701_v12 = vrot.slane %v5790_v15, 2  ;;  %v1707_v54 = vrot.slane %v5790_v15, 6  ;;  %v1967_v62 = vmax.f32 %v5828_v9, 0.0 }
 0x355   :  { %v1757_v28 = vsel %vm1054_vm5, %v1754_v36, %v1742_v56  ;;  %v1964_v36 = vmax.f32 %v5836_v53, 0.0  ;;  %v1613_v18 = vrot.slane %v5676_v40, 4 }
 0x356   :  { %v1759_v34 = vpack.c.bf16 %v1757_v28, %v1757_v28  ;;  %v4014_v35 = vpack.i.bf16 %v1707_v54, %v1701_v12 }
 0x357   :  { %v4039_v27 = vpack.i.bf16 %v1965_v52, %v1964_v36 }
 0x358   :  { %v1773_v11 = vsel %vm5799_vm13, %v1759_v34, %v1772_v49  ;;  %4015 = vrot.lane.b32.xlu1 %v4014_v35, %s4355_s25  ;;  %v1580_v35 = vrot.slane %v5632_v46, 4 }
 0x359   :  { %1774 = vst [vmem:[%s7036_s5 + $0x8] sm:$0x7] %v1773_v11 }
 0x361   :  { %v3986_v17 = vpop.permute.xlu2 %3985 }
 0x362   :  { %v3961_v31 = vpop.permute.xlu0 %3960  ;;  %v3988_v32 = vunpack.i.h.bf16 %v3986_v17  ;;  %v3987_v8 = vunpack.i.l.bf16 %v3986_v17 }
 0x363   :  { %v3963_v14 = vunpack.i.h.bf16 %v3961_v31  ;;  %v3962_v54 = vunpack.i.l.bf16 %v3961_v31 }
 0x364   :  { %v5821_v58 = vmax.f32 %v1957_v19, %v3988_v32  ;;  %v5825_v44 = vmax.f32 %v1956_v38, %v3987_v8  ;;  %v4044_v38 = vpack.i.bf16 %v1967_v62, %v1966_v25 }
 0x365   :  { %v1587_v32 = vsel %vm1129_vm9, %v1580_v35, %v3963_v14  ;;  %v1586_v31 = vsel %vm1129_vm9, %v5632_v46, %v3962_v54 }
 0x366   :  { %v4034_v60 = vpack.i.bf16 %v5821_v58, %v5825_v44 }
 0x368   :  { %4035 = vrot.lane.b32.xlu0 %v4034_v60, %s4355_s25 }
 0x36a   :  { %v3971_v29 = vpop.permute.xlu0 %3970 }
 0x36b   :  { %v3973_v4 = vunpack.i.h.bf16 %v3971_v29  ;;  %v3972_v19 = vunpack.i.l.bf16 %v3971_v29 }
 0x36d   :  { %v5847_v56 = vmax.f32 %v1954_v30, %v3973_v4  ;;  %v5851_v43 = vmax.f32 %v1953_v42, %v3972_v19  ;;  %v1645_v42 = vrot.slane %v5730_v50, 4 }
 0x36f   :  { %v4024_v22 = vpack.i.bf16 %v5847_v56, %v5851_v43 }
 0x370   :  { %4045 = vrot.lane.b32.xlu0 %v4044_v38, %s4354_s18 }
 0x371   :  { %4025 = vrot.lane.b32.xlu1 %v4024_v22, %s4355_s25 }
 0x379   :  { %4040 = vrot.lane.b32.xlu1 %v4039_v27, %s4354_s18 }
 0x382   :  { %v3991_v30 = vpop.permute.xlu2 %3990  ;;  %v3976_v12 = vpop.permute.xlu1 %3975 }
 0x383   :  { %v3993_v28 = vunpack.i.h.bf16 %v3991_v30  ;;  %v3978_v49 = vunpack.i.h.bf16 %v3976_v12  ;;  %v3977_v34 = vunpack.i.l.bf16 %v3976_v12 }
 0x385   :  { %v1652_v16 = vsel %vm1129_vm9, %v1645_v42, %v3993_v28  ;;  %v1621_v11 = vsel %vm1129_vm9, %v1613_v18, %v3978_v49  ;;  %v1620_v26 = vsel %vm1129_vm9, %v5676_v40, %v3977_v34  ;;  %v1675_v34 = vrot.slane %v5764_v13, 4 }
 0x386   :  { %v1724_v3 = vrot.slane %v1652_v16, 2  ;;  %v1716_v17 = vrot.slane %v1621_v11, 1  ;;  %v1715_v50 = vrot.slane %v1620_v26, 1 }
 0x388   :  { %v1746_v8 = vsel %vm503_vm7, %v1586_v31, %v1715_v50  ;;  %v1747_v60 = vsel %vm503_vm7, %v1587_v32, %v1716_v17  ;;  %v1705_v17 = vrot.slane %v5790_v15, 4 }
 0x389   :  { %v1750_v29 = vsel %vm7038_vm0, %v1747_v60, %v1724_v3  ;;  %v3996_v22 = vpop.permute.xlu0 %3995 }
 0x38a   :  { %v3981_v4 = vpop.permute.xlu1 %3980  ;;  %v3998_v14 = vunpack.i.h.bf16 %v3996_v22  ;;  %v3997_v46 = vunpack.i.l.bf16 %v3996_v22 }
 0x38b   :  { %v3983_v19 = vunpack.i.h.bf16 %v3981_v4  ;;  %v3982_v38 = vunpack.i.l.bf16 %v3981_v4 }
 0x38c   :  { %v5890_v18 = vmax.f32 %v1959_v21, %v3998_v14  ;;  %v5894_v47 = vmax.f32 %v1958_v7, %v3997_v46  ;;  %v3992_v7 = vunpack.i.l.bf16 %v3991_v30  ;;  %v1663_v21 = vrot.slane %v5746_v55, 1 }
 0x38d   :  { %v5879_v40 = vmax.f32 %v1950_v2, %v3983_v19  ;;  %v5883_v27 = vmax.f32 %v1955_v57, %v3982_v38  ;;  %v1767_v19 = vld [vmem:[%s7036_s5] sm:$0x77] }
 0x38e   :  { %v4049_v33 = vpack.i.bf16 %v5890_v18, %v5894_v47  ;;  %v1651_v28 = vsel %vm1129_vm9, %v5724_v39, %v3992_v7  ;;  %v1665_v49 = vmax.f32 %v5746_v55, %v1663_v21  ;;  %v3548_v7 = vld [vmem:[%s7033_s0 + $0xa8] sm:$0xf]  ;;  %v3615_v21 = vld [vmem:[%s7033_s0 + $0xa8] sm:$0x10] }
 0x38f   :  { %v4029_v42 = vpack.i.bf16 %v5879_v40, %v5883_v27 }
 0x391   :  { %4030 = vrot.lane.b32.xlu2 %v4029_v42, %s4355_s25  ;;  %v5951_v42 = vpop.permute.xlu2 %4010 }
 0x399   :  { %4050 = vrot.lane.b32.xlu2 %v4049_v33, %s4355_s25  ;;  %v4006_v57 = vpop.permute.xlu1 %4005 }
 0x39a   :  { %v4008_v2 = vunpack.i.h.bf16 %v4006_v57  ;;  %v4007_v12 = vunpack.i.l.bf16 %v4006_v57 }
 0x39c   :  { %v5901_v54 = vmax.f32 %v1961_v0, %v4008_v2  ;;  %v5905_v1 = vmax.f32 %v1960_v24, %v4007_v12  ;;  %v1723_v0 = vrot.slane %v1651_v28, 2 }
 0x39e   :  { %v4054_v10 = vpack.i.bf16 %v5901_v54, %v5905_v1  ;;  %v1749_v30 = vsel %vm7038_vm0, %v1746_v8, %v1723_v0  ;;  %vm1766_vm0 = vmor %vm5927_vm10, %vm5923_vm12 }
 0x3a1   :  { %4055 = vrot.lane.b32.xlu2 %v4054_v10, %s4355_s25 }
 0x3b2   :  { %v4001_v45 = vpop.permute.xlu0 %4000 }
 0x3b3   :  { %v4003_v37 = vunpack.i.h.bf16 %v4001_v45  ;;  %v4002_v24 = vunpack.i.l.bf16 %v4001_v45  ;;  %v3549_v45 = vor.u32 %v3615_v21, %v3548_v7 }
 0x3b5   :  { %v1682_v35 = vsel %vm1129_vm9, %v1675_v34, %v4003_v37  ;;  %v1681_v16 = vsel %vm1129_vm9, %v1665_v49, %v4002_v24  ;;  %3560 = vmatmul.msk.bf16.gmra.mxu3 %vm159_vm1, %v3549_v45  ;;  %vm7046_vm1 = vcmask 1041408  }
 0x3b6   :  { %v1732_v11 = vrot.slane %v1682_v35, 3  ;;  %v1731_v26 = vrot.slane %v1681_v16, 3  ;;  %vm7047_vm11 = vmmov %vm7046_vm1 }
 0x3b8   :  { %v1752_v3 = vsel %vm707_vm4, %v1749_v30, %v1731_v26  ;;  %v1753_v39 = vsel %vm707_vm4, %v1750_v29, %v1732_v11 }
 0x3ba   :  { %v4021_v46 = vpop.permute.xlu0 %4020 }
 0x3bb   :  { %v4023_v33 = vunpack.i.h.bf16 %v4021_v46  ;;  %v4022_v57 = vunpack.i.l.bf16 %v4021_v46 }
 0x3bd   :  { %v5960_v28 = vmax.f32 %v5774_v48, %v4023_v33  ;;  %v5963_v49 = vmax.f32 %v5778_v6, %v4022_v57 }
 0x3bf   :  { %v2302_v24 = vrot.slane %v5963_v49, 2  ;;  %v2304_v35 = vrot.slane %v5960_v28, 2  ;;  %v2212_v11 = vrot.slane %v5963_v49, 1  ;;  %v2214_v6 = vrot.slane %v5960_v28, 1 }
 0x3c0   :  { %v2539_v45 = vrot.slane %v5963_v49, 7 }
 0x3ca   :  { %v4016_v55 = vpop.permute.xlu1 %4015 }
 0x3cb   :  { %v4018_v13 = vunpack.i.h.bf16 %v4016_v55  ;;  %v4017_v50 = vunpack.i.l.bf16 %v4016_v55 }
 0x3cd   :  { %v1712_v8 = vsel %vm1129_vm9, %v1705_v17, %v4018_v13  ;;  %v1711_v60 = vsel %vm1129_vm9, %v5790_v15, %v4017_v50 }
 0x3ce   :  { %v1741_v29 = vrot.slane %v1712_v8, 4  ;;  %v1740_v4 = vrot.slane %v1711_v60, 4  ;;  %v2305_v8 = vsel %vm614_vm3, %v2302_v24, %v2304_v35  ;;  %v2215_v60 = vsel %vm523_vm2, %v2212_v11, %v2214_v6 }
 0x3d0   :  { %v1755_v38 = vsel %vm1054_vm5, %v1752_v3, %v1740_v4  ;;  %v1756_v22 = vsel %vm1054_vm5, %v1753_v39, %v1741_v29 }
 0x3d1   :  { %v1758_v14 = vpack.c.bf16 %v1756_v22, %v1755_v38 }
 0x3d3   :  { %v1768_v15 = vsel %vm1766_vm0, %v1758_v14, %v1767_v19 }
 0x3d4   :  { %1769 = vst [vmem:[%s7036_s5] sm:$0x77] %v1768_v15 }
 0x3da   :  { %v4036_v33 = vpop.permute.xlu0 %4035 }
 0x3e3   :  { %v4026_v2 = vpop.permute.xlu1 %4025 }
 0x3e4   :  { %v4028_v12 = vunpack.i.h.bf16 %v4026_v2  ;;  %v4027_v10 = vunpack.i.l.bf16 %v4026_v2 }
 0x3e6   :  { %v5966_v0 = vmax.f32 %v5847_v56, %v4028_v12  ;;  %v5969_v34 = vmax.f32 %v5851_v43, %v4027_v10 }
 0x3e8   :  { %v2738_v26 = vrot.slane %v5969_v34, 4  ;;  %v2739_v56 = vrot.slane %v5966_v0, 4  ;;  %v2306_v43 = vrot.slane %v5969_v34, 2  ;;  %v2308_v30 = vrot.slane %v5966_v0, 2 }
 0x3e9   :  { %v2542_v2 = vrot.slane %v5969_v34, 7  ;;  %v2216_v12 = vrot.slane %v5969_v34, 1  ;;  %v2218_v10 = vrot.slane %v5966_v0, 1  ;;  %v2647_v7 = vrot.slane %v5969_v34, 3 }
 0x3ea   :  { %v2648_v21 = vrot.slane %v5966_v0, 3 }
 0x3eb   :  { %v4031_v37 = vpop.permute.xlu2 %4030 }
 0x3ec   :  { %v4033_v16 = vunpack.i.h.bf16 %v4031_v37  ;;  %v4032_v48 = vunpack.i.l.bf16 %v4031_v37  ;;  %v2540_v37 = vrot.slane %v5960_v28, 7 }
 0x3ee   :  { %v5981_v3 = vmax.f32 %v5879_v40, %v4033_v16  ;;  %v5984_v39 = vmax.f32 %v5883_v27, %v4032_v48  ;;  %v2740_v40 = vsel %vm1054_vm5, %v2738_v26, %v2739_v56  ;;  %v2309_v27 = vsel %vm614_vm3, %v2306_v43, %v2308_v30 }
 0x3ef   :  { %v4037_v16 = vunpack.i.l.bf16 %v4036_v33  ;;  %v2217_v26 = vsel %vm523_vm2, %v2214_v6, %v2216_v12 }
 0x3f0   :  { %v2211_v55 = vrot.slane %v5981_v3, 1  ;;  %v2301_v17 = vrot.slane %v5981_v3, 2  ;;  %v2741_v13 = vrot.slane %v5984_v39, 4  ;;  %v2310_v50 = vrot.slane %v5984_v39, 2 }
 0x3f1   :  { %v2650_v57 = vrot.slane %v5984_v39, 3 }
 0x3f2   :  { %v2303_v29 = vsel %vm614_vm3, %v2301_v17, %v2302_v24  ;;  %v2213_v4 = vsel %vm523_vm2, %v2211_v55, %v2212_v11  ;;  %v2742_v19 = vsel %vm1054_vm5, %v2739_v56, %v2741_v13  ;;  %v2311_v38 = vsel %vm614_vm3, %v2308_v30, %v2310_v50 }
 0x3f3   :  { %v4064_v22 = vpack.i.bf16 %v2305_v8, %v2303_v29  ;;  %v4059_v14 = vpack.i.bf16 %v2215_v60, %v2213_v4  ;;  %v2903_v15 = vpack.c.bf16 %v2742_v19, %v2740_v40  ;;  %v4079_v46 = vpack.i.bf16 %v2311_v38, %v2309_v27  ;;  %v4051_v20 = vpop.permute.xlu2 %4050 }
 0x3f4   :  { %v4038_v24 = vunpack.i.h.bf16 %v4036_v33  ;;  %v2651_v48 = vsel %vm962_vm8, %v2648_v21, %v2650_v57  ;;  %v2543_v11 = vsel %vm503_vm7, %v2540_v37, %v2542_v2  ;;  %v2219_v56 = vsel %vm523_vm2, %v2216_v12, %v2218_v10 }
 0x3f5   :  { %4065 = vrot.lane.b32.xlu0 %v4064_v22, %s4355_s25  ;;  %4060 = vrot.lane.b32.xlu1 %v4059_v14, %s4356_s1  ;;  %v4013_v30 = vunpack.i.h.bf16 %v5951_v42  ;;  %v4012_v55 = vunpack.i.l.bf16 %v5951_v42  ;;  %v2649_v17 = vsel %vm962_vm8, %v2647_v7, %v2648_v21  ;;  %v2541_v8 = vsel %vm503_vm7, %v2539_v45, %v2540_v37 }
 0x3f6   :  { %3561 = vmatmul.msk.bf16.vlgmr.msrb.gmra.mxu0 %vm1110_vm6, %v2903_v15  ;;  %4080 = vrot.lane.b32.xlu2 %v4079_v46, %s4355_s25  ;;  %v6029_v60 = vmax.f32 %v5821_v58, %v4038_v24  ;;  %v6032_v40 = vmax.f32 %v5825_v44, %v4037_v16  ;;  %v4089_v27 = vpack.i.bf16 %v2651_v48, %v2649_v17  ;;  %v2396_v4 = vrot.slane %v5969_v34, 5  ;;  %v1940_v58 = vpop.f32.mrf.mxu3 }
 0x3f7   :  { %v4069_v6 = vpack.i.bf16 %v2543_v11, %v2541_v8  ;;  %v4084_v29 = vpack.i.bf16 %v2219_v56, %v2217_v26  ;;  %v2546_v42 = vrot.slane %v5984_v39, 7  ;;  %v6040_v19 = vmax.f32 %v1963_v51, %v4013_v30 }
 0x3f8   :  { %v2393_v44 = vrot.slane %v5963_v49, 5  ;;  %v2394_v38 = vrot.slane %v5960_v28, 5  ;;  %v6047_v22 = vmax.f32 %v1962_v41, %v4012_v55  ;;  %v2743_v14 = vrot.slane %v6032_v40, 4 }
 0x3f9   :  { %v2745_v15 = vrot.slane %v6029_v60, 4  ;;  %v2544_v46 = vrot.slane %v5966_v0, 7  ;;  %v4052_v37 = vunpack.i.l.bf16 %v4051_v20  ;;  %v4053_v48 = vunpack.i.h.bf16 %v4051_v20 }
 0x3fa   :  { %v2397_v51 = vsel %vm707_vm4, %v2394_v38, %v2396_v4  ;;  %v2744_v33 = vsel %vm1054_vm5, %v2741_v13, %v2743_v14  ;;  %v2395_v7 = vsel %vm707_vm4, %v2393_v44, %v2394_v38  ;;  %v4094_v41 = vpack.i.bf16 %v6040_v19, %v6047_v22 }
 0x3fb   :  { %v2547_v12 = vsel %vm503_vm7, %v2544_v46, %v2546_v42  ;;  %v2746_v59 = vsel %vm1054_vm5, %v2743_v14, %v2745_v15  ;;  %v4074_v21 = vpack.i.bf16 %v2397_v51, %v2395_v7  ;;  %v2545_v45 = vsel %vm503_vm7, %v2542_v2, %v2544_v46  ;;  %v4056_v44 = vpop.permute.xlu2 %4055 }
 0x3fc   :  { %v2906_v24 = vpack.c.bf16 %v2746_v59, %v2744_v33  ;;  %v4099_v16 = vpack.i.bf16 %v2547_v12, %v2545_v45  ;;  %v2400_v13 = vrot.slane %v5984_v39, 5  ;;  %v2312_v11 = vrot.slane %v6032_v40, 2 }
 0x3fd   :  { %4090 = vrot.lane.b32.xlu0 %v4089_v27, %s4354_s18  ;;  %4070 = vrot.lane.b32.xlu1 %v4069_v6, %s4356_s1  ;;  %v2314_v26 = vrot.slane %v6029_v60, 2  ;;  %v2652_v2 = vrot.slane %v6032_v40, 3  ;;  %v2654_v56 = vrot.slane %v6029_v60, 3  ;;  %v2398_v30 = vrot.slane %v5966_v0, 5 }
 0x3fe   :  { %4085 = vrot.lane.b32.xlu2 %v4084_v29, %s4356_s1  ;;  %v6073_v55 = vmax.f32 %v5894_v47, %v4052_v37  ;;  %v1942_v17 = vpop.f32.mrf.mxu3  ;;  %v2313_v8 = vsel %vm614_vm3, %v2310_v50, %v2312_v11  ;;  %v6082_v6 = vmax.f32 %v5890_v18, %v4053_v48  ;;  %v6088_v47 = vadd.f32 %v5607_v61, %v1940_v58  ;;  %v4041_v50 = vpop.permute.xlu1 %4040 }
 0x3ff   :  { %v2653_v27 = vsel %vm962_vm8, %v2650_v57, %v2652_v2  ;;  %v2401_v29 = vsel %vm707_vm4, %v2398_v30, %v2400_v13  ;;  %v2315_v38 = vsel %vm614_vm3, %v2312_v11, %v2314_v26  ;;  %v2655_v14 = vsel %vm962_vm8, %v2652_v2, %v2654_v56 }
 0x400   :  { %v6093_v46 = vadd.f32 %v5607_v61, %v1942_v17  ;;  %v4109_v57 = vpack.i.bf16 %v2315_v38, %v2313_v8  ;;  %v4119_v20 = vpack.i.bf16 %v2655_v14, %v2653_v27  ;;  %v2399_v18 = vsel %vm707_vm4, %v2396_v4, %v2398_v30 }
 0x401   :  { %v4104_v51 = vpack.i.bf16 %v2401_v29, %v2399_v18  ;;  %v2316_v33 = vrot.slane %v6073_v55, 2  ;;  %v4057_v12 = vunpack.i.l.bf16 %v4056_v44  ;;  %v2747_v58 = vrot.slane %v6073_v55, 4 }
 0x402   :  { %v2749_v7 = vrot.slane %v6082_v6, 4  ;;  %v2318_v59 = vrot.slane %v6082_v6, 2  ;;  %v4042_v61 = vunpack.i.l.bf16 %v4041_v50  ;;  %v1969_v4 = vmax.f32 %v6093_v46, 0.0 }
 0x403   :  { %v6107_v45 = vmax.f32 %v5905_v1, %v4057_v12  ;;  %v2748_v37 = vsel %vm1054_vm5, %v2745_v15, %v2747_v58  ;;  %v2307_v11 = vsel %vm614_vm3, %v2304_v35, %v2306_v43  ;;  %v2656_v30 = vrot.slane %v6073_v55, 3 }
 0x404   :  { %v6114_v48 = vmax.f32 %v1964_v36, %v4042_v61  ;;  %v2658_v53 = vrot.slane %v6082_v6, 3  ;;  %v4058_v36 = vunpack.i.h.bf16 %v4056_v44  ;;  %v4043_v43 = vunpack.i.h.bf16 %v4041_v50 }
 0x405   :  { %4095 = vrot.lane.b32.xlu0 %v4094_v41, %s4355_s25  ;;  %4075 = vrot.lane.b32.xlu1 %v4074_v21, %s4354_s18  ;;  %v1968_v41 = vmax.f32 %v6088_v47, 0.0  ;;  %v2317_v21 = vsel %vm614_vm3, %v2314_v26, %v2316_v33  ;;  %v2320_v35 = vrot.slane %v6107_v45, 2  ;;  %v2548_v17 = vrot.slane %v6032_v40, 7 }
 0x406   :  { %3562 = vmatmul.msk.bf16.gmra.mxu0 %vm1110_vm6, %v2906_v24  ;;  %4100 = vrot.lane.b32.xlu2 %v4099_v16, %s4356_s1  ;;  %v2750_v24 = vsel %vm1054_vm5, %v2747_v58, %v2749_v7  ;;  %v2319_v16 = vsel %vm614_vm3, %v2316_v33, %v2318_v59  ;;  %v4124_v15 = vpack.i.bf16 %v2317_v21, %v2307_v11  ;;  %v2550_v8 = vrot.slane %v6029_v60, 7 }
 0x407   :  { %v4114_v1 = vpack.i.bf16 %v1969_v4, %v1968_v41  ;;  %v2909_v26 = vpack.c.bf16 %v2750_v24, %v2748_v37  ;;  %v4139_v2 = vpack.i.bf16 %v6114_v48, %v2319_v16  ;;  %v2657_v27 = vsel %vm962_vm8, %v2654_v56, %v2656_v30 }
 0x408   :  { %v2659_v29 = vsel %vm962_vm8, %v2656_v30, %v2658_v53  ;;  %v2549_v44 = vsel %vm503_vm7, %v2546_v42, %v2548_v17  ;;  %v6141_v38 = vmax.f32 %v5901_v54, %v4058_v36  ;;  %v2321_v14 = vsel %vm614_vm3, %v2318_v59, %v2320_v35 }
 0x409   :  { %v6146_v50 = vmax.f32 %v1965_v52, %v4043_v43  ;;  %v4144_v56 = vpack.i.bf16 %v2659_v29, %v2657_v27  ;;  %v2220_v33 = vrot.slane %v5984_v39, 1  ;;  %v2751_v54 = vrot.slane %v6107_v45, 4 }
 0x40a   :  { %v2753_v5 = vrot.slane %v6141_v38, 4  ;;  %v2322_v52 = vrot.slane %v6141_v38, 2  ;;  %v2402_v12 = vrot.slane %v6032_v40, 5  ;;  %v2404_v58 = vrot.slane %v6029_v60, 5 }
 0x40b   :  { %v2222_v59 = vrot.slane %v6032_v40, 1  ;;  %v2221_v21 = vsel %vm523_vm2, %v2218_v10, %v2220_v33  ;;  %v2752_v24 = vsel %vm1054_vm5, %v2749_v7, %v2751_v54  ;;  %v2554_v7 = vrot.slane %v6082_v6, 7 }
 0x40c   :  { %v2403_v61 = vsel %vm707_vm4, %v2400_v13, %v2402_v12  ;;  %v2754_v16 = vsel %vm1054_vm5, %v2751_v54, %v2753_v5  ;;  %v2323_v11 = vsel %vm614_vm3, %v2320_v35, %v2322_v52  ;;  %v2405_v13 = vsel %vm707_vm4, %v2402_v12, %v2404_v58 }
 0x40d   :  { %4110 = vrot.lane.b32.xlu0 %v4109_v57, %s4355_s25  ;;  %4120 = vrot.lane.b32.xlu1 %v4119_v20, %s4354_s18  ;;  %v2551_v57 = vsel %vm503_vm7, %v2548_v17, %v2550_v8  ;;  %v6149_v20 = vpop.permute.xlu0 %4045  ;;  %v2223_v37 = vsel %vm523_vm2, %v2220_v33, %v2222_v59  ;;  %v2660_v36 = vrot.slane %v6107_v45, 3  ;;  %v2662_v43 = vrot.slane %v6141_v38, 3 }
 0x40e   :  { %4105 = vrot.lane.b32.xlu2 %v4104_v51, %s4354_s18  ;;  %v4129_v18 = vpack.i.bf16 %v2551_v57, %v2549_v44  ;;  %v4164_v51 = vpack.i.bf16 %v2321_v14, %v6146_v50  ;;  %v4047_v42 = vunpack.i.l.bf16 %v6149_v20  ;;  %v4134_v10 = vpack.i.bf16 %v2223_v37, %v2221_v21 }
 0x40f   :  { %v2661_v63 = vsel %vm962_vm8, %v2658_v53, %v2660_v36  ;;  %v2406_v44 = vrot.slane %v6073_v55, 5  ;;  %v2408_v14 = vrot.slane %v6082_v6, 5  ;;  %v2226_v57 = vrot.slane %v6073_v55, 1 }
 0x410   :  { %v2224_v53 = vrot.slane %v6029_v60, 1  ;;  %v2558_v12 = vrot.slane %v6141_v38, 7  ;;  %v2230_v37 = vrot.slane %v6107_v45, 1 }
 0x415   :  { %4115 = vrot.lane.b32.xlu0 %v4114_v1, %s4354_s18  ;;  %4125 = vrot.lane.b32.xlu1 %v4124_v15, %s4355_s25  ;;  %v6179_v1 = vmax.f32 %v1966_v25, %v4047_v42  ;;  %v4149_v15 = vpack.i.bf16 %v2405_v13, %v2403_v61  ;;  %v2663_v25 = vsel %vm962_vm8, %v2660_v36, %v2662_v43  ;;  %v2556_v42 = vrot.slane %v6107_v45, 7 }
 0x416   :  { %3563 = vmatmul.msk.bf16.gmra.mxu0 %vm1110_vm6, %v2909_v26  ;;  %4140 = vrot.lane.b32.xlu2 %v4139_v2, %s4355_s25  ;;  %v2552_v26 = vrot.slane %v6073_v55, 7  ;;  %v2912_v2 = vpack.c.bf16 %v2754_v16, %v2752_v24  ;;  %v4174_v27 = vpack.i.bf16 %v2663_v25, %v2661_v63  ;;  %v2485_v36 = vrot.slane %v5960_v28, 6 }
 0x417   :  { %v4169_v30 = vpack.i.bf16 %v6179_v1, %v2323_v11  ;;  %v2559_v61 = vsel %vm503_vm7, %v2556_v42, %v2558_v12  ;;  %v2487_v63 = vrot.slane %v5969_v34, 6  ;;  %v4048_v25 = vunpack.i.h.bf16 %v6149_v20 }
 0x418   :  { %v2553_v35 = vsel %vm503_vm7, %v2550_v8, %v2552_v26  ;;  %v2555_v17 = vsel %vm503_vm7, %v2552_v26, %v2554_v7  ;;  %v2409_v8 = vsel %vm707_vm4, %v2406_v44, %v2408_v14 }
 0x419   :  { %v4154_v29 = vpack.i.bf16 %v2555_v17, %v2553_v35 }
 0x41d   :  { %4145 = vrot.lane.b32.xlu0 %v4144_v56, %s4354_s18  ;;  %4130 = vrot.lane.b32.xlu1 %v4129_v18, %s4356_s1  ;;  %v2407_v56 = vsel %vm707_vm4, %v2404_v58, %v2406_v44  ;;  %v2227_v18 = vsel %vm523_vm2, %v2224_v53, %v2226_v57  ;;  %v2557_v58 = vsel %vm503_vm7, %v2554_v7, %v2556_v42 }
 0x41e   :  { %4165 = vrot.lane.b32.xlu2 %v4164_v51, %s4355_s25  ;;  %v2225_v51 = vsel %vm523_vm2, %v2222_v59, %v2224_v53  ;;  %v4179_v33 = vpack.i.bf16 %v2409_v8, %v2407_v56  ;;  %v4184_v21 = vpack.i.bf16 %v2559_v61, %v2557_v58  ;;  %v2228_v59 = vrot.slane %v6082_v6, 1 }
 0x41f   :  { %v4159_v54 = vpack.i.bf16 %v2227_v18, %v2225_v51  ;;  %v2488_v53 = vsel %vm7047_vm11, %v2485_v36, %v2487_v63  ;;  %v2491_v61 = vrot.slane %v5984_v39, 6  ;;  %vm7050_vm11 = vmmov %vm7046_vm1 }
 0x420   :  { %v2231_v24 = vsel %vm523_vm2, %v2228_v59, %v2230_v37  ;;  %v2229_v16 = vsel %vm523_vm2, %v2226_v57, %v2228_v59 }
 0x421   :  { %v4189_v11 = vpack.i.bf16 %v2231_v24, %v2229_v16  ;;  %v2410_v24 = vrot.slane %v6107_v45, 5 }
 0x425   :  { %4150 = vrot.lane.b32.xlu0 %v4149_v15, %s4354_s18  ;;  %4135 = vrot.lane.b32.xlu1 %v4134_v10, %s4356_s1 }
 0x426   :  { %3564 = vmatmul.msk.bf16.gmra.mxu0 %vm1110_vm6, %v2912_v2  ;;  %4170 = vrot.lane.b32.xlu2 %v4169_v30, %s4355_s25  ;;  %v2484_v30 = vrot.slane %v5963_v49, 6 }
 0x428   :  { %v2486_v17 = vsel %vm7046_vm1, %v2484_v30, %v2485_v36 }
 0x42d   :  { %4175 = vrot.lane.b32.xlu0 %v4174_v27, %s4354_s18  ;;  %4155 = vrot.lane.b32.xlu1 %v4154_v29, %s4356_s1  ;;  %v2489_v29 = vrot.slane %v5966_v0, 6 }
 0x435   :  { %4180 = vrot.lane.b32.xlu0 %v4179_v33, %s4354_s18  ;;  %4160 = vrot.lane.b32.xlu1 %v4159_v54, %s4356_s1 }
 0x43d   :  { %4185 = vrot.lane.b32.xlu1 %v4184_v21, %s4356_s1 }
 0x445   :  { %4190 = vrot.lane.b32.xlu1 %v4189_v11, %s4356_s1 }
 0x450   :  { %v6225_v13 = vpop.permute.xlu2 %4080 }
 0x451   :  { %v4083_v8 = vunpack.i.h.bf16 %v6225_v13  ;;  %v4082_v18 = vunpack.i.l.bf16 %v6225_v13 }
 0x458   :  { %v6227_v15 = vpop.permute.xlu2 %4085 }
 0x459   :  { %v4088_v30 = vunpack.i.h.bf16 %v6227_v15 }
 0x460   :  { %v6229_v10 = vpop.permute.xlu2 %4100 }
 0x467   :  { %v4066_v26 = vpop.permute.xlu0 %4065  ;;  %v4061_v7 = vpop.permute.xlu1 %4060 }
 0x468   :  { %v6231_v2 = vpop.permute.xlu2 %4105  ;;  %v4063_v51 = vunpack.i.h.bf16 %v4061_v7  ;;  %v4062_v33 = vunpack.i.l.bf16 %v4061_v7  ;;  %v7039_v7 = vrot.slane %v6141_v38, 5  ;;  %v4068_v36 = vunpack.i.h.bf16 %v4066_v26 }
 0x46f   :  { %v4091_v35 = vpop.permute.xlu0 %4090  ;;  %v4071_v27 = vpop.permute.xlu1 %4070 }
 0x470   :  { %v4073_v44 = vunpack.i.h.bf16 %v4071_v27  ;;  %v4072_v57 = vunpack.i.l.bf16 %v4071_v27  ;;  %v6240_v56 = vpop.permute.xlu2 %4140  ;;  %v4093_v54 = vunpack.i.h.bf16 %v4091_v35  ;;  %v4092_v20 = vunpack.i.l.bf16 %v4091_v35 }
 0x471   :  { %v4067_v35 = vunpack.i.l.bf16 %v4066_v26  ;;  %v6260_v27 = vmax.f32 %v1967_v62, %v4048_v25  ;;  %v4103_v26 = vunpack.i.h.bf16 %v6229_v10  ;;  %v6275_v62 = vsel %vm707_vm4, %v2408_v14, %v2410_v24 }
 0x472   :  { %v2847_v42 = vsel %vm1110_vm6, %v2486_v17, %v4072_v57  ;;  %v2848_v58 = vsel %vm1110_vm6, %v2488_v53, %v4073_v44  ;;  %v2794_v44 = vsel %vm1110_vm6, %v5963_v49, %v4063_v51  ;;  %v2793_v57 = vsel %vm1110_vm6, %v5981_v3, %v4062_v33 }
 0x473   :  { %v2865_v21 = vsel %vm1129_vm9, %v2847_v42, %v4082_v18  ;;  %v2866_v59 = vsel %vm1129_vm9, %v2848_v58, %v4083_v8  ;;  %v2232_v53 = vrot.slane %v6141_v38, 1  ;;  %v2812_v33 = vsel %vm1129_vm9, %v2794_v44, %v4068_v36  ;;  %v1945_v44 = vpop.f32.mrf.mxu3 }
 0x474   :  { %v2883_v16 = vsel %vm7048_vm14, %v2865_v21, %v4092_v20  ;;  %v2884_v11 = vsel %vm7049_vm15, %v2866_v59, %v4093_v54  ;;  %v2490_v54 = vsel %vm7046_vm1, %v2487_v63, %v2489_v29  ;;  %v2492_v20 = vsel %vm7050_vm11, %v2489_v29, %v2491_v61  ;;  %vm7051_vm15 = vmmov %vm7048_vm14 }
 0x475   :  { %v2902_v17 = vpack.c.bf16 %v2884_v11, %v2883_v16  ;;  %v6279_v63 = vsel %vm1110_vm6, %v5969_v34, %v4088_v30  ;;  %v2811_v29 = vsel %vm1129_vm9, %v2793_v57, %v4067_v35  ;;  %v6286_v58 = vsel %vm707_vm4, %v2410_v24, %v7039_v7  ;;  %vm7052_vm1 = vmmov %vm7048_vm14 }
 0x476   :  { %v2850_v11 = vsel %vm1110_vm6, %v2492_v20, %v4103_v26  ;;  %v4102_v30 = vunpack.i.l.bf16 %v6229_v10  ;;  %v4143_v36 = vunpack.i.h.bf16 %v6240_v56  ;;  %vm7053_vm11 = vmmov %vm7052_vm1 }
 0x477   :  { %v4096_v42 = vpop.permute.xlu0 %4095  ;;  %v4076_v9 = vpop.permute.xlu1 %4075  ;;  %3015 = vmatmul.bf16.vlgmr.msrb.gmra.mxu2 %v2902_v17 }
 0x478   :  { %v4098_v49 = vunpack.i.h.bf16 %v4096_v42  ;;  %v4097_v3 = vunpack.i.l.bf16 %v4096_v42  ;;  %v4078_v25 = vunpack.i.h.bf16 %v4076_v9  ;;  %v4077_v51 = vunpack.i.l.bf16 %v4076_v9  ;;  %v6294_v59 = vpop.permute.xlu2 %4165 }
 0x479   :  { %v4167_v57 = vunpack.i.l.bf16 %v6294_v59  ;;  %v2849_v7 = vsel %vm1110_vm6, %v2490_v54, %v4102_v30  ;;  %v4108_v30 = vunpack.i.h.bf16 %v6231_v2 }
 0x47a   :  { %v6289_v14 = vmax.f32 %v6040_v19, %v4098_v49  ;;  %v6292_v21 = vmax.f32 %v6047_v22, %v4097_v3  ;;  %v2829_v34 = vsel %vm7048_vm14, %v2811_v29, %v4077_v51  ;;  %v2830_v16 = vsel %vm7051_vm15, %v2812_v33, %v4078_v25  ;;  %vm7054_vm14 = vmmov %vm7052_vm1 }
 0x47b   :  { %v2901_v24 = vpack.c.bf16 %v2830_v16, %v2829_v34  ;;  %vm7055_vm15 = vmmov %vm7052_vm1 }
 0x47c   :  { %v2755_v35 = vrot.slane %v6292_v21, 4  ;;  %v2757_v19 = vrot.slane %v6289_v14, 4  ;;  %v2664_v22 = vrot.slane %v6292_v21, 3  ;;  %v2666_v17 = vrot.slane %v6289_v14, 3 }
 0x47d   :  { %2963 = vmatmul.bf16.vlgmr.msrb.gmra.mxu1 %v2901_v24  ;;  %v2560_v42 = vrot.slane %v6292_v21, 7  ;;  %v2562_v20 = vrot.slane %v6289_v14, 7  ;;  %v2324_v10 = vrot.slane %v6292_v21, 2  ;;  %v2234_v54 = vrot.slane %v6292_v21, 1 }
 0x47e   :  { %v2756_v26 = vsel %vm1054_vm5, %v2753_v5, %v2755_v35  ;;  %v2758_v9 = vsel %vm1054_vm5, %v2755_v35, %v2757_v19  ;;  %v2665_v49 = vsel %vm962_vm8, %v2662_v43, %v2664_v22  ;;  %v2667_v3 = vsel %vm962_vm8, %v2664_v22, %v2666_v17 }
 0x47f   :  { %v6321_v25 = vpop.permute.xlu0 %4110  ;;  %v4121_v51 = vpop.permute.xlu1 %4120  ;;  %v2915_v29 = vpack.c.bf16 %v2758_v9, %v2756_v26  ;;  %v4204_v33 = vpack.i.bf16 %v2667_v3, %v2665_v49  ;;  %v2561_v5 = vsel %vm503_vm7, %v2558_v12, %v2560_v42  ;;  %v2563_v34 = vsel %vm503_vm7, %v2560_v42, %v2562_v20 }
 0x480   :  { %v4113_v16 = vunpack.i.h.bf16 %v6321_v25  ;;  %v4112_v43 = vunpack.i.l.bf16 %v6321_v25  ;;  %v4123_v24 = vunpack.i.h.bf16 %v4121_v51  ;;  %v4122_v35 = vunpack.i.l.bf16 %v4121_v51 }
 0x481   :  { %v4087_v22 = vunpack.i.l.bf16 %v6227_v15  ;;  %3565 = vmatmul.msk.bf16.gmra.mxu0 %vm1110_vm6, %v2915_v29  ;;  %4205 = vrot.lane.b32.xlu0 %v4204_v33, %s4354_s18  ;;  %v4219_v26 = vpack.i.bf16 %v2563_v34, %v2561_v5  ;;  %v2325_v12 = vsel %vm614_vm3, %v2322_v52, %v2324_v10  ;;  %v6350_v49 = vmax.f32 %v6146_v50, %v4167_v57 }
 0x482   :  { %v4194_v42 = vpack.i.bf16 %v2325_v12, %v6260_v27  ;;  %v2867_v9 = vsel %vm1129_vm9, %v2849_v7, %v4112_v43  ;;  %v2868_v15 = vsel %vm1129_vm9, %v2850_v11, %v4113_v16  ;;  %v6356_v51 = vmax.f32 %v6114_v48, %v4143_v36 }
 0x483   :  { %4220 = vrot.lane.b32.xlu1 %v4219_v26, %s4356_s1  ;;  %v2885_v52 = vsel %vm7052_vm1, %v2867_v9, %v4122_v35  ;;  %v2886_v3 = vsel %vm7053_vm11, %v2868_v15, %v4123_v24  ;;  %v4214_v11 = vpack.i.bf16 %v6286_v58, %v6275_v62  ;;  %v2233_v50 = vsel %vm523_vm2, %v2230_v37, %v2232_v53  ;;  %v1947_v58 = vpop.f32.mrf.mxu3  ;;  %v6398_v9 = vpop.permute.xlu2 %4170 }
 0x484   :  { %4195 = vrot.lane.b32.xlu2 %v4194_v42, %s4355_s25  ;;  %v2905_v7 = vpack.c.bf16 %v2886_v3, %v2885_v52  ;;  %v2493_v57 = vrot.slane %v6032_v40, 6  ;;  %v2495_v29 = vrot.slane %v6029_v60, 6  ;;  %v2795_v48 = vsel %vm1110_vm6, %v5960_v28, %v4087_v22  ;;  %v4352_v28 = vld [vmem:[%s7032_s2] ss:$0 sm:$0xff] }
 0x485   :  { %v4107_v36 = vunpack.i.l.bf16 %v6231_v2  ;;  %v2235_v62 = vsel %vm523_vm2, %v2232_v53, %v2234_v54  ;;  %v2814_v37 = vsel %vm1129_vm9, %v6279_v63, %v4082_v18  ;;  %v6385_v2 = vadd.f32 %v4352_v28, %v1945_v44 }
 0x486   :  { %v2326_v34 = vrot.slane %v6289_v14, 2  ;;  %v2832_v53 = vsel %vm7054_vm14, %v2814_v37, %v4108_v30  ;;  %v2761_v24 = vrot.slane %v6350_v49, 4  ;;  %v2759_v63 = vrot.slane %v6356_v51, 4 }
 0x487   :  { %v4116_v33 = vpop.permute.xlu0 %4115  ;;  %v6380_v5 = vpop.permute.xlu1 %4125  ;;  %3020 = vmatmul.bf16.gmra.mxu2 %v2905_v7  ;;  %v2670_v22 = vrot.slane %v6350_v49, 3  ;;  %v4224_v26 = vpack.i.bf16 %v2235_v62, %v2233_v50  ;;  %v2668_v12 = vrot.slane %v6356_v51, 3  ;;  %v2564_v44 = vrot.slane %v6356_v51, 7 }
 0x488   :  { %v4117_v35 = vunpack.i.l.bf16 %v4116_v33  ;;  %v4127_v18 = vunpack.i.l.bf16 %v6380_v5  ;;  %v6396_v42 = vadd.f32 %v4352_v28, %v1947_v58  ;;  %v2760_v52 = vsel %vm1054_vm5, %v2757_v19, %v2759_v63 }
 0x489   :  { %4215 = vrot.lane.b32.xlu0 %v4214_v11, %s4354_s18  ;;  %v2566_v3 = vrot.slane %v6350_v49, 7  ;;  %v2327_v7 = vsel %vm614_vm3, %v2324_v10, %v2326_v34  ;;  %v2762_v47 = vsel %vm1054_vm5, %v2759_v63, %v2761_v24  ;;  %v4118_v50 = vunpack.i.h.bf16 %v4116_v33 }
 0x48a   :  { %v6402_v15 = vmax.f32 %v1968_v41, %v4117_v35  ;;  %v2813_v30 = vsel %vm1129_vm9, %v2795_v48, %v4127_v18  ;;  %v2669_v41 = vsel %vm962_vm8, %v2666_v17, %v2668_v12  ;;  %v2671_v62 = vsel %vm962_vm8, %v2668_v12, %v2670_v22 }
 0x48b   :  { %4225 = vrot.lane.b32.xlu1 %v4224_v26, %s4356_s1  ;;  %v2831_v11 = vsel %vm7055_vm15, %v2813_v30, %v4107_v36  ;;  %v4173_v10 = vunpack.i.h.bf16 %v6398_v9  ;;  %vm7056_vm1 = vcmask 1041408   ;;  %v1970_v37 = vmax.f32 %v6385_v2, 0.0  ;;  %vm7058_vm15 = vmmov %vm7054_vm14 }
 0x48c   :  { %v4199_v19 = vpack.i.bf16 %v6402_v15, %v2327_v7  ;;  %v2904_v48 = vpack.c.bf16 %v2832_v53, %v2831_v11  ;;  %v2496_v36 = vsel %vm7056_vm1, %v2493_v57, %v2495_v29  ;;  %vm7057_vm11 = vmmov %vm7056_vm1  ;;  %v2565_v58 = vsel %vm503_vm7, %v2562_v20, %v2564_v44 }
 0x48d   :  { %v2494_v17 = vsel %vm7057_vm11, %v2491_v61, %v2493_v57  ;;  %v2567_v33 = vsel %vm503_vm7, %v2564_v44, %v2566_v3  ;;  %v4142_v28 = vunpack.i.l.bf16 %v6240_v56  ;;  %v2918_v18 = vpack.c.bf16 %v2762_v47, %v2760_v52  ;;  %vm7059_vm1 = vmmov %vm7054_vm14 }
 0x48e   :  { %4200 = vrot.lane.b32.xlu2 %v4199_v19, %s4355_s25  ;;  %2968 = vmatmul.bf16.gmra.mxu1 %v2904_v48  ;;  %v4229_v63 = vpack.i.bf16 %v2671_v62, %v2669_v41  ;;  %v2328_v26 = vrot.slane %v6356_v51, 2  ;;  %v6443_v12 = vmax.f32 %v1969_v4, %v4118_v50  ;;  %v1971_v20 = vmax.f32 %v6396_v42, 0.0  ;;  %vm7060_vm11 = vmmov %vm7059_vm1 }
 0x48f   :  { %v4146_v53 = vpop.permute.xlu0 %4145  ;;  %v4131_v35 = vpop.permute.xlu1 %4130  ;;  %v6447_v30 = vmax.f32 %v6179_v1, %v4173_v10  ;;  %v4128_v44 = vunpack.i.h.bf16 %v6380_v5  ;;  %v4249_v52 = vpack.i.bf16 %v2567_v33, %v2565_v58  ;;  %v2236_v7 = vrot.slane %v6289_v14, 1 }
 0x490   :  { %v4133_v61 = vunpack.i.h.bf16 %v4131_v35  ;;  %v4132_v57 = vunpack.i.l.bf16 %v4131_v35  ;;  %v4148_v11 = vunpack.i.h.bf16 %v4146_v53  ;;  %v4147_v46 = vunpack.i.l.bf16 %v4146_v53 }
 0x491   :  { %3566 = vmatmul.msk.bf16.gmra.mxu0 %vm1110_vm6, %v2918_v18  ;;  %4230 = vrot.lane.b32.xlu0 %v4229_v63, %s4354_s18  ;;  %v2329_v1 = vsel %vm614_vm3, %v2326_v34, %v2328_v26  ;;  %v2238_v10 = vrot.slane %v6356_v51, 1  ;;  %v4244_v34 = vpack.i.bf16 %v1970_v37, %v1971_v20  ;;  %v2237_v58 = vsel %vm523_vm2, %v2234_v54, %v2236_v7 }
 0x492   :  { %v2852_v4 = vsel %vm1110_vm6, %v2496_v36, %v4133_v61  ;;  %v2851_v47 = vsel %vm1110_vm6, %v2494_v17, %v4132_v57  ;;  %v4209_v19 = vpack.i.bf16 %v2329_v1, %v6443_v12  ;;  %v2332_v17 = vrot.slane %v6447_v30, 2 }
 0x493   :  { %4250 = vrot.lane.b32.xlu1 %v4249_v52, %s4356_s1  ;;  %v2869_v41 = vsel %vm1129_vm9, %v2851_v47, %v4128_v44  ;;  %v2870_v50 = vsel %vm1129_vm9, %v2852_v4, %v4142_v28  ;;  %v2239_v33 = vsel %vm523_vm2, %v2236_v7, %v2238_v10  ;;  %v2330_v18 = vrot.slane %v6350_v49, 2 }
 0x494   :  { %v2887_v48 = vsel %vm7054_vm14, %v2869_v41, %v4147_v46  ;;  %v2888_v62 = vsel %vm7058_vm15, %v2870_v50, %v4148_v11  ;;  %v4259_v57 = vpack.i.bf16 %v2239_v33, %v2237_v58  ;;  %v2497_v47 = vrot.slane %v6073_v55, 6 }
 0x495   :  { %v2908_v36 = vpack.c.bf16 %v2888_v62, %v2887_v48  ;;  %v2333_v52 = vsel %vm614_vm3, %v2330_v18, %v2332_v17  ;;  %v2331_v4 = vsel %vm614_vm3, %v2328_v26, %v2330_v18  ;;  %v2414_v26 = vrot.slane %v6292_v21, 5 }
 0x496   :  { %4210 = vrot.lane.b32.xlu2 %v4209_v19, %s4355_s25  ;;  %v4234_v50 = vpack.i.bf16 %v2333_v52, %v2331_v4  ;;  %v2416_v62 = vrot.slane %v6289_v14, 5  ;;  %vm7061_vm14 = vcmask 1041408   ;;  %v4168_v33 = vunpack.i.h.bf16 %v6294_v59 }
 0x497   :  { %v4151_v53 = vpop.permute.xlu0 %4150  ;;  %v4136_v35 = vpop.permute.xlu1 %4135  ;;  %3025 = vmatmul.bf16.gmra.mxu2 %v2908_v36  ;;  %vm7062_vm15 = vmmov %vm7061_vm14  ;;  %v2763_v25 = vrot.slane %v6447_v30, 4 }
 0x498   :  { %v4138_v63 = vunpack.i.h.bf16 %v4136_v35  ;;  %v4137_v61 = vunpack.i.l.bf16 %v4136_v35  ;;  %v4153_v11 = vunpack.i.h.bf16 %v4151_v53  ;;  %v4152_v54 = vunpack.i.l.bf16 %v4151_v53 }
 0x499   :  { %4245 = vrot.lane.b32.xlu0 %v4244_v34, %s4354_s18  ;;  %v4172_v53 = vunpack.i.l.bf16 %v6398_v9  ;;  %v7063_v35 = vrot.slane %v6141_v38, 5 }
 0x49a   :  { %v2798_v46 = vsel %vm1110_vm6, %v5984_v39, %v4138_v63  ;;  %v2797_v7 = vsel %vm1110_vm6, %v5966_v0, %v4137_v61  ;;  %v2499_v39 = vrot.slane %v6082_v6, 6  ;;  %v2417_v63 = vsel %vm707_vm4, %v2414_v26, %v2416_v62 }
 0x49b   :  { %4260 = vrot.lane.b32.xlu1 %v4259_v57, %s4356_s1  ;;  %v2815_v1 = vsel %vm1129_vm9, %v2797_v7, %v4083_v8  ;;  %v2816_v41 = vsel %vm1129_vm9, %v2798_v46, %v4112_v43  ;;  %v2498_v43 = vsel %vm7061_vm14, %v2495_v29, %v2497_v47  ;;  %v2415_v18 = vsel %vm707_vm4, %v7063_v35, %v2414_v26  ;;  %vm7065_vm14 = vmmov %vm7059_vm1 }
 0x49c   :  { %v2833_v19 = vsel %vm7059_vm1, %v2815_v1, %v4152_v54  ;;  %v2834_v0 = vsel %vm7060_vm11, %v2816_v41, %v4153_v11  ;;  %v2500_v34 = vsel %vm7062_vm15, %v2497_v47, %v2499_v39  ;;  %v4239_v46 = vpack.i.bf16 %v2417_v63, %v2415_v18  ;;  %vm7064_vm11 = vmmov %vm7059_vm1 }
 0x49d   :  { %v2907_v48 = vpack.c.bf16 %v2834_v0, %v2833_v19  ;;  %vm7066_vm15 = vmmov %vm7059_vm1  ;;  %v2764_v63 = vsel %vm1054_vm5, %v2761_v24, %v2763_v25 }
 0x49e   :  { %4235 = vrot.lane.b32.xlu2 %v4234_v50, %s4355_s25 }
 0x49f   :  { %v4176_v13 = vpop.permute.xlu0 %4175  ;;  %v4156_v8 = vpop.permute.xlu1 %4155  ;;  %2973 = vmatmul.bf16.gmra.mxu1 %v2907_v48 }
 0x4a0   :  { %v4158_v36 = vunpack.i.h.bf16 %v4156_v8  ;;  %v4157_v58 = vunpack.i.l.bf16 %v4156_v8  ;;  %v4178_v61 = vunpack.i.h.bf16 %v4176_v13  ;;  %v4177_v29 = vunpack.i.l.bf16 %v4176_v13 }
 0x4a2   :  { %v2854_v57 = vsel %vm1110_vm6, %v2500_v34, %v4158_v36  ;;  %v2853_v52 = vsel %vm1110_vm6, %v2498_v43, %v4157_v58 }
 0x4a3   :  { %v2871_v11 = vsel %vm1129_vm9, %v2853_v52, %v4168_v33  ;;  %v2872_v54 = vsel %vm1129_vm9, %v2854_v57, %v4172_v53 }
 0x4a4   :  { %v2889_v7 = vsel %vm7059_vm1, %v2871_v11, %v4177_v29  ;;  %v2890_v4 = vsel %vm7064_vm11, %v2872_v54, %v4178_v61  ;;  %vm7067_vm1 = vcmask 1041408  }
 0x4a5   :  { %v2911_v47 = vpack.c.bf16 %v2890_v4, %v2889_v7  ;;  %vm7068_vm11 = vmmov %vm7067_vm1 }
 0x4a6   :  { %4240 = vrot.lane.b32.xlu2 %v4239_v46, %s4354_s18  ;;  %v2568_v46 = vrot.slane %v6447_v30, 7 }
 0x4a7   :  { %v4181_v1 = vpop.permute.xlu0 %4180  ;;  %v4161_v41 = vpop.permute.xlu1 %4160  ;;  %3030 = vmatmul.bf16.gmra.mxu2 %v2911_v47 }
 0x4a8   :  { %v4163_v50 = vunpack.i.h.bf16 %v4161_v41  ;;  %v4162_v19 = vunpack.i.l.bf16 %v4161_v41  ;;  %v4183_v0 = vunpack.i.h.bf16 %v4181_v1  ;;  %v4182_v48 = vunpack.i.l.bf16 %v4181_v1 }
 0x4a9   :  { %v2501_v1 = vrot.slane %v6107_v45, 6  ;;  %v2240_v41 = vrot.slane %v6350_v49, 1 }
 0x4aa   :  { %v2800_v26 = vsel %vm1110_vm6, %v6029_v60, %v4163_v50  ;;  %v2799_v13 = vsel %vm1110_vm6, %v6032_v40, %v4162_v19  ;;  %v2420_v50 = vrot.slane %v6350_v49, 5 }
 0x4ab   :  { %v2817_v8 = vsel %vm1129_vm9, %v2799_v13, %v4113_v16  ;;  %v2818_v43 = vsel %vm1129_vm9, %v2800_v26, %v4128_v44  ;;  %v2672_v16 = vrot.slane %v6447_v30, 3 }
 0x4ac   :  { %v2835_v34 = vsel %vm7065_vm14, %v2817_v8, %v4182_v48  ;;  %v2836_v36 = vsel %vm7066_vm15, %v2818_v43, %v4183_v0  ;;  %v2569_v0 = vsel %vm503_vm7, %v2566_v3, %v2568_v46  ;;  %v2503_v48 = vrot.slane %v6141_v38, 6  ;;  %vm7069_vm15 = vmmov %vm7065_vm14 }
 0x4ad   :  { %v2910_v58 = vpack.c.bf16 %v2836_v36, %v2835_v34  ;;  %v2418_v8 = vrot.slane %v6356_v51, 5  ;;  %v2502_v3 = vsel %vm7067_vm1, %v2499_v39, %v2501_v1  ;;  %v2241_v39 = vsel %vm523_vm2, %v2238_v10, %v2240_v41 }
 0x4af   :  { %2978 = vmatmul.bf16.gmra.mxu1 %v2910_v58  ;;  %v4186_v5 = vpop.permute.xlu1 %4185 }
 0x4b0   :  { %v4188_v43 = vunpack.i.h.bf16 %v4186_v5  ;;  %v4187_v34 = vunpack.i.l.bf16 %v4186_v5  ;;  %v2421_v5 = vsel %vm707_vm4, %v2418_v8, %v2420_v50 }
 0x4b7   :  { %v4191_v19 = vpop.permute.xlu1 %4190 }
 0x4de   :  { %v6540_v35 = vpop.permute.xlu2 %4195 }
 0x4df   :  { %v4197_v60 = vunpack.i.l.bf16 %v6540_v35 }
 0x4e1   :  { %v6544_v40 = vmax.f32 %v6260_v27, %v4197_v60  ;;  %v2673_v27 = vsel %vm962_vm8, %v2670_v22, %v2672_v16  ;;  %v2242_v22 = vrot.slane %v6447_v30, 1 }
 0x4e3   :  { %v2765_v44 = vrot.slane %v6544_v40, 4  ;;  %v2674_v18 = vrot.slane %v6544_v40, 3  ;;  %v2570_v11 = vrot.slane %v6544_v40, 7  ;;  %v2334_v47 = vrot.slane %v6544_v40, 2 }
 0x4e4   :  { %v2243_v13 = vsel %vm523_vm2, %v2240_v41, %v2242_v22  ;;  %v4192_v41 = vunpack.i.l.bf16 %v4191_v19 }
 0x4e5   :  { %v2766_v61 = vsel %vm1054_vm5, %v2763_v25, %v2765_v44  ;;  %v2675_v29 = vsel %vm962_vm8, %v2672_v16, %v2674_v18  ;;  %v2571_v4 = vsel %vm503_vm7, %v2568_v46, %v2570_v11  ;;  %v2335_v36 = vsel %vm614_vm3, %v2332_v17, %v2334_v47 }
 0x4e6   :  { %v2921_v57 = vpack.c.bf16 %v2766_v61, %v2764_v63  ;;  %v4254_v52 = vpack.i.bf16 %v2675_v29, %v2673_v27  ;;  %v4274_v26 = vpack.i.bf16 %v2571_v4, %v2569_v0  ;;  %v2419_v16 = vsel %vm707_vm4, %v2416_v62, %v2418_v8 }
 0x4e7   :  { %v4198_v17 = vunpack.i.h.bf16 %v6540_v35  ;;  %v2504_v27 = vsel %vm7068_vm11, %v2501_v1, %v2503_v48  ;;  %v4284_v62 = vpack.i.bf16 %v2243_v13, %v2241_v39  ;;  %v4269_v10 = vpack.i.bf16 %v2421_v5, %v2419_v16  ;;  %vm7070_vm11 = vmmov %vm7065_vm14 }
 0x4e8   :  { %3567 = vmatmul.msk.bf16.gmra.mxu0 %vm1110_vm6, %v2921_v57  ;;  %4255 = vrot.lane.b32.xlu0 %v4254_v52, %s4354_s18  ;;  %v6565_v24 = vpop.permute.xlu2 %4200  ;;  %v2422_v57 = vrot.slane %v6447_v30, 5  ;;  %v2856_v52 = vsel %vm1110_vm6, %v2504_v27, %v4188_v43  ;;  %v2801_v39 = vsel %vm1110_vm6, %v6073_v55, %v4192_v41  ;;  %v2515_v27 = vrot.slane %v6544_v40, 6 }
 0x4e9   :  { %v4203_v54 = vunpack.i.h.bf16 %v6565_v24  ;;  %v4202_v63 = vunpack.i.l.bf16 %v6565_v24 }
 0x4eb   :  { %v6571_v7 = vmax.f32 %v6402_v15, %v4203_v54  ;;  %v2855_v54 = vsel %vm1110_vm6, %v2502_v3, %v4187_v34  ;;  %v2874_v13 = vsel %vm1129_vm9, %v2856_v52, %v4202_v63  ;;  %v6632_v34 = vpop.f32.mrf.mxu0  ;;  %v2424_v3 = vrot.slane %v6544_v40, 5 }
 0x4ed   :  { %v2336_v15 = vrot.slane %v6571_v7, 2  ;;  %v2767_v29 = vrot.slane %v6571_v7, 4  ;;  %v2517_v52 = vrot.slane %v6571_v7, 6 }
 0x4ef   :  { %v2337_v58 = vsel %vm614_vm3, %v2334_v47, %v2336_v15  ;;  %v4193_v47 = vunpack.i.h.bf16 %v4191_v19 }
 0x4f0   :  { %4275 = vrot.lane.b32.xlu0 %v4274_v26, %s4356_s1  ;;  %v6597_v60 = vpop.permute.xlu2 %4210  ;;  %v4264_v25 = vpack.i.bf16 %v2337_v58, %v2335_v36  ;;  %v2873_v26 = vsel %vm1129_vm9, %v2855_v54, %v4198_v17  ;;  %v2768_v58 = vsel %vm1054_vm5, %v2765_v44, %v2767_v29  ;;  %v2505_v54 = vrot.slane %v6292_v21, 6 }
 0x4f1   :  { %v4212_v61 = vunpack.i.l.bf16 %v6597_v60 }
 0x4f2   :  { %4265 = vrot.lane.b32.xlu2 %v4264_v25, %s4355_s25 }
 0x4f3   :  { %v6620_v46 = vmax.f32 %v6443_v12, %v4212_v61  ;;  %v4206_v4 = vpop.permute.xlu0 %4205 }
 0x4f4   :  { %v4208_v0 = vunpack.i.h.bf16 %v4206_v4  ;;  %v4207_v1 = vunpack.i.l.bf16 %v4206_v4  ;;  %v2572_v4 = vrot.slane %v6571_v7, 7 }
 0x4f5   :  { %v6628_v8 = vpop.permute.xlu1 %4220  ;;  %v2632_v43 = vrot.slane %v6620_v46, 2  ;;  %v2769_v12 = vrot.slane %v6620_v46, 4  ;;  %v2574_v61 = vrot.slane %v6620_v46, 7  ;;  %v2678_v55 = vrot.slane %v6620_v46, 3 }
 0x4f6   :  { %v2891_v19 = vsel %vm7065_vm14, %v2873_v26, %v4207_v1  ;;  %v2892_v36 = vsel %vm7069_vm15, %v2874_v13, %v4208_v0  ;;  %v2426_v1 = vrot.slane %v6571_v7, 5  ;;  %vm7071_vm14 = vmmov %vm7070_vm11 }
 0x4f7   :  { %v2633_v25 = vsel %vm614_vm3, %v2336_v15, %v2632_v43  ;;  %v2914_v16 = vpack.c.bf16 %v2892_v36, %v2891_v19  ;;  %v2770_v5 = vsel %vm1054_vm5, %v2767_v29, %v2769_v12  ;;  %v2802_v15 = vsel %vm1110_vm6, %v6082_v6, %v4193_v47  ;;  %vm7072_vm15 = vmmov %vm7067_vm1 }
 0x4f8   :  { %4285 = vrot.lane.b32.xlu0 %v4284_v62, %s4356_s1  ;;  %2638 = vrot.lane.b32.xlu1 %v2633_v25, %s4355_s25  ;;  %v2924_v44 = vpack.c.bf16 %v2770_v5, %v2768_v58  ;;  %v6656_v29 = vpop.permute.xlu2 %4235  ;;  %v2507_v62 = vrot.slane %v6289_v14, 6  ;;  %v2425_v6 = vsel %vm707_vm4, %v2422_v57, %v2424_v3  ;;  %v6671_v47 = vsel %vm7067_vm1, %v2515_v27, %v2517_v52 }
 0x4f9   :  { %3035 = vmatmul.bf16.gmra.mxu2 %v2914_v16  ;;  %v2575_v13 = vsel %vm503_vm7, %v2572_v4, %v2574_v61  ;;  %v2423_v19 = vsel %vm707_vm4, %v2420_v50, %v2422_v57  ;;  %v2676_v36 = vrot.slane %v6571_v7, 3  ;;  %v2820_v16 = vsel %vm1129_vm9, %v2802_v15, %v4168_v33 }
 0x4fa   :  { %v6661_v41 = vpop.f32.mrf.mxu1  ;;  %v6663_v0 = vpop.f32.mrf.mxu2  ;;  %4270 = vrot.lane.b32.xlu2 %v4269_v10, %s4354_s18  ;;  %3568 = vmatmul.msk.bf16.gmra.mxu0 %vm1110_vm6, %v2924_v44  ;;  %v2819_v10 = vsel %vm1129_vm9, %v2801_v39, %v4142_v28  ;;  %v6686_v5 = vsel %vm707_vm4, %v2424_v3, %v2426_v1  ;;  %v2573_v50 = vsel %vm503_vm7, %v2570_v11, %v2572_v4  ;;  %v2244_v28 = vrot.slane %v6544_v40, 1 }
 0x4fb   :  { %v4216_v26 = vpop.permute.xlu0 %4215  ;;  %v4289_v57 = vpack.i.bf16 %v2425_v6, %v2423_v19  ;;  %v2679_v56 = vsel %vm962_vm8, %v2676_v36, %v2678_v55  ;;  %v4222_v7 = vunpack.i.l.bf16 %v6628_v8  ;;  %v4299_v59 = vpack.i.bf16 %v2575_v13, %v2573_v50  ;;  %v6703_v4 = vpop.f32.mrf.mxu0 }
 0x4fc   :  { %v4218_v58 = vunpack.i.h.bf16 %v4216_v26  ;;  %v4217_v25 = vunpack.i.l.bf16 %v4216_v26  ;;  %v2677_v44 = vsel %vm962_vm8, %v2674_v18, %v2676_v36  ;;  %v2519_v11 = vrot.slane %v6620_v46, 6 }
 0x4fd   :  { %v4226_v61 = vpop.permute.xlu1 %4225  ;;  %v2428_v15 = vrot.slane %v6620_v46, 5  ;;  %v4223_v6 = vunpack.i.h.bf16 %v6628_v8  ;;  %v4279_v26 = vpack.i.bf16 %v2679_v56, %v2677_v44  ;;  %v2506_v13 = vsel %vm7072_vm15, %v2503_v48, %v2505_v54  ;;  %vm7076_vm15 = vmmov %vm7067_vm1 }
 0x4fe   :  { %v2837_v33 = vsel %vm7070_vm11, %v2819_v10, %v4217_v25  ;;  %v2838_v3 = vsel %vm7071_vm14, %v2820_v16, %v4218_v58  ;;  %v4237_v19 = vunpack.i.l.bf16 %v6656_v29  ;;  %v2508_v18 = vsel %vm7067_vm1, %v2505_v54, %v2507_v62  ;;  %vm7073_vm11 = vmmov %vm7067_vm1 }
 0x4ff   :  { %v2913_v39 = vpack.c.bf16 %v2838_v3, %v2837_v33  ;;  %v2857_v10 = vsel %vm1110_vm6, %v2506_v13, %v4222_v7  ;;  %v6718_v58 = vsel %vm7073_vm11, %v2517_v52, %v2519_v11  ;;  %v6721_v25 = vsel %vm707_vm4, %v2426_v1, %v2428_v15 }
 0x500   :  { %4300 = vrot.lane.b32.xlu0 %v4299_v59, %s4356_s1  ;;  %4290 = vrot.lane.b32.xlu1 %v4289_v57, %s4354_s18  ;;  %v4213_v48 = vunpack.i.h.bf16 %v6597_v60  ;;  %v4227_v16 = vunpack.i.l.bf16 %v4226_v61  ;;  %v2245_v54 = vsel %vm523_vm2, %v2242_v22, %v2244_v28  ;;  %v4319_v57 = vpack.i.bf16 %v6721_v25, %v6686_v5  ;;  %v4241_v59 = vpop.permute.xlu2 %4240  ;;  %vm7074_vm2 = vmmov %vm7071_vm14 }
 0x501   :  { %2983 = vmatmul.bf16.gmra.mxu1 %v2913_v39  ;;  %v2858_v56 = vsel %vm1110_vm6, %v2508_v18, %v4223_v6  ;;  %v4228_v7 = vunpack.i.h.bf16 %v4226_v61  ;;  %v4314_v22 = vpack.i.bf16 %v2244_v28, %v2245_v54  ;;  %vm7075_vm14 = vmmov %vm7074_vm2  ;;  %v4242_v15 = vunpack.i.l.bf16 %v4241_v59  ;;  %v6748_v18 = vld [vmem:[%s7035_s4] ss:$0 sm:$0xff] }
 0x502   :  { %v2966_v36 = vpop.f32.mrf.mxu1  ;;  %v3018_v8 = vpop.f32.mrf.mxu2  ;;  %4280 = vrot.lane.b32.xlu2 %v4279_v26, %s4354_s18  ;;  %v2876_v1 = vsel %vm1129_vm9, %v2858_v56, %v4237_v19  ;;  %v2875_v3 = vsel %vm1129_vm9, %v2857_v10, %v4213_v48  ;;  %v2803_v61 = vsel %vm1110_vm6, %v6107_v45, %v4227_v16  ;;  %v4243_v13 = vunpack.i.h.bf16 %v4241_v59  ;;  %vm7077_vm1 = vmmov %vm7074_vm2 }
 0x503   :  { %v4231_v50 = vpop.permute.xlu0 %4230  ;;  %v2804_v26 = vsel %vm1110_vm6, %v6141_v38, %v4228_v7  ;;  %v2967_v28 = vadd.f32 %v6748_v18, %v2966_v36  ;;  %v3073_v45 = vpop.f32.mrf.mxu0  ;;  %v2821_v38 = vsel %vm1129_vm9, %v2803_v61, %v4172_v53  ;;  %vm7078_vm11 = vmmov %vm7077_vm1 }
 0x504   :  { %v4233_v52 = vunpack.i.h.bf16 %v4231_v50  ;;  %v4232_v33 = vunpack.i.l.bf16 %v4231_v50  ;;  %v2509_v50 = vrot.slane %v6356_v51, 6  ;;  %v2822_v36 = vsel %vm1129_vm9, %v2804_v26, %v4198_v17 }
 0x505   :  { %v6736_v39 = vpop.permute.xlu1 %4250  ;;  %v2839_v59 = vsel %vm7077_vm1, %v2821_v38, %v4242_v15  ;;  %v2840_v53 = vsel %vm7078_vm11, %v2822_v36, %v4243_v13  ;;  %vm7081_vm11 = vmmov %vm7077_vm1 }
 0x506   :  { %v2893_v44 = vsel %vm7074_vm2, %v2875_v3, %v4232_v33  ;;  %v2894_v11 = vsel %vm7075_vm14, %v2876_v1, %v4233_v52  ;;  %v4252_v10 = vunpack.i.l.bf16 %v6736_v39  ;;  %v2510_v54 = vsel %vm7076_vm15, %v2507_v62, %v2509_v50  ;;  %vm7079_vm2 = vmmov %vm7077_vm1 }
 0x507   :  { %v2917_v6 = vpack.c.bf16 %v2894_v11, %v2893_v44  ;;  %v3019_v1 = vadd.f32 %v3018_v8, %v2967_v28  ;;  %v2916_v44 = vpack.c.bf16 %v2840_v53, %v2839_v59  ;;  %vm7080_vm14 = vmmov %vm7077_vm1 }
 0x508   :  { %4315 = vrot.lane.b32.xlu0 %v4314_v22, %s4356_s1  ;;  %v2859_v3 = vsel %vm1110_vm6, %v2510_v54, %v4252_v10  ;;  %v4238_v22 = vunpack.i.h.bf16 %v6656_v29 }
 0x509   :  { %3040 = vmatmul.bf16.gmra.mxu2 %v2917_v6  ;;  %v6785_v61 = vadd.f32 %v6703_v4, %v3019_v1 }
 0x50a   :  { %v3021_v16 = vpop.f32.mrf.mxu2  ;;  %v6782_v8 = vsel %vm1129_vm9, %v2859_v3, %v4238_v22 }
 0x50b   :  { %v4246_v56 = vpop.permute.xlu0 %4245  ;;  %v2969_v7 = vpop.f32.mrf.mxu1  ;;  %v3112_v6 = vmax.f32 %v6785_v61, 0.0 }
 0x50c   :  { %v4248_v52 = vunpack.i.h.bf16 %v4246_v56  ;;  %v4247_v33 = vunpack.i.l.bf16 %v4246_v56  ;;  %v2970_v9 = vadd.f32 %v6748_v18, %v2969_v7  ;;  %v6792_v15 = vpop.f32.mrf.mxu0 }
 0x50e   :  { %v6771_v62 = vmax.f32 %v1970_v37, %v4248_v52  ;;  %v6775_v35 = vmax.f32 %v1971_v20, %v4247_v33  ;;  %v3022_v17 = vadd.f32 %v3021_v16, %v2970_v9 }
 0x510   :  { %v4294_v11 = vpack.i.bf16 %v6771_v62, %v6775_v35  ;;  %v3074_v2 = vadd.f32 %v3073_v45, %v3022_v17 }
 0x511   :  { %2988 = vmatmul.bf16.gmra.mxu1 %v2916_v44 }
 0x512   :  { %4295 = vrot.lane.b32.xlu2 %v4294_v11, %s4355_s25  ;;  %v6788_v42 = vpop.f32.mrf.mxu2  ;;  %v3113_v37 = vmax.f32 %v3074_v2, 0.0 }
 0x513   :  { %v6790_v20 = vpop.f32.mrf.mxu1 }
 0x514   :  { %v6795_v26 = vrot.slane %v3113_v37, 5  ;;  %v3078_v10 = vpop.f32.mrf.mxu0 }
 0x516   :  { %v3135_v4 = vmax.f32 %v3112_v6, %v6795_v26 }
 0x51a   :  { %v3026_v13 = vpop.f32.mrf.mxu2 }
 0x51c   :  { %v2974_v28 = vpop.f32.mrf.mxu1  ;;  %v3080_v38 = vpop.f32.mrf.mxu0 }
 0x51d   :  { %v2975_v9 = vadd.f32 %v6748_v18, %v2974_v28 }
 0x51f   :  { %v3027_v3 = vadd.f32 %v3026_v13, %v2975_v9 }
 0x521   :  { %v3079_v11 = vadd.f32 %v3078_v10, %v3027_v3  ;;  %v4261_v10 = vpop.permute.xlu1 %4260 }
 0x522   :  { %v3028_v16 = vpop.f32.mrf.mxu2 }
 0x524   :  { %v2976_v45 = vpop.f32.mrf.mxu1  ;;  %v3083_v33 = vpop.f32.mrf.mxu0 }
 0x525   :  { %v2977_v7 = vadd.f32 %v6748_v18, %v2976_v45  ;;  %v3115_v45 = vmax.f32 %v3079_v11, 0.0 }
 0x527   :  { %v3029_v52 = vadd.f32 %v3028_v16, %v2977_v7 }
 0x529   :  { %v3081_v1 = vadd.f32 %v3080_v38, %v3029_v52  ;;  %v4263_v52 = vunpack.i.h.bf16 %v4261_v10 }
 0x52a   :  { %v3031_v36 = vpop.f32.mrf.mxu2 }
 0x52b   :  { %v3116_v44 = vmax.f32 %v3081_v1, 0.0  ;;  %v2806_v9 = vsel %vm1110_vm6, %v6289_v14, %v4263_v52 }
 0x52c   :  { %v2979_v54 = vpop.f32.mrf.mxu1 }
 0x52d   :  { %v2980_v56 = vadd.f32 %v6748_v18, %v2979_v54  ;;  %v6808_v37 = vrot.slane %v3116_v44, 5 }
 0x52f   :  { %v3032_v59 = vadd.f32 %v3031_v36, %v2980_v56  ;;  %v3141_v56 = vrot.slane %v3135_v4, 1 }
 0x531   :  { %v6803_v53 = vadd.f32 %v3083_v33, %v3032_v59  ;;  %v3143_v38 = vmax.f32 %v3135_v4, %v3141_v56  ;;  %v4262_v33 = vunpack.i.l.bf16 %v4261_v10  ;;  %v2511_v4 = vrot.slane %v6350_v49, 6 }
 0x533   :  { %v3117_v17 = vmax.f32 %v6803_v53, 0.0  ;;  %v2805_v1 = vsel %vm1110_vm6, %v6292_v21, %v4262_v33  ;;  %v2972_v33 = vadd.f32 %v6748_v18, %v6790_v20 }
 0x535   :  { %v3163_v2 = vrot.slane %v3117_v17, 5 }
 0x537   :  { %v3164_v16 = vsel %vm707_vm4, %v6808_v37, %v3163_v2  ;;  %v2823_v2 = vsel %vm1129_vm9, %v2805_v1, %v4202_v63  ;;  %v2965_v1 = vadd.f32 %v6748_v18, %v6661_v41  ;;  %v3160_v41 = vrot.slane %v3115_v45, 5 }
 0x538   :  { %v3168_v54 = vmax.f32 %v3115_v45, %v3164_v16  ;;  %v2824_v16 = vsel %vm1129_vm9, %v2806_v9, %v4213_v48 }
 0x53a   :  { %v3174_v28 = vrot.slane %v3168_v54, 1 }
 0x53c   :  { %v6812_v7 = vmax.f32 %v3168_v54, %v3174_v28  ;;  %v4253_v54 = vunpack.i.h.bf16 %v6736_v39 }
 0x53e   :  { %v3286_v13 = vrot.slane %v6812_v7, 1  ;;  %v3185_v46 = vrot.slane %v6812_v7, 6 }
 0x540   :  { %v6816_v36 = vsel %vm503_vm7, %v3143_v38, %v3286_v13  ;;  %v2512_v38 = vsel %vm7076_vm15, %v2509_v50, %v2511_v4  ;;  %v2513_v50 = vrot.slane %v6447_v30, 6 }
 0x541   :  { %v2860_v63 = vsel %vm1110_vm6, %v2512_v38, %v4253_v54 }
 0x54c   :  { %v6818_v59 = vpop.permute.xlu2 %4265 }
 0x54d   :  { %v4267_v21 = vunpack.i.l.bf16 %v6818_v59 }
 0x54f   :  { %v2878_v48 = vsel %vm1129_vm9, %v2860_v63, %v4267_v21 }
 0x554   :  { %v4271_v3 = vpop.permute.xlu2 %4270 }
 0x555   :  { %v4273_v44 = vunpack.i.h.bf16 %v4271_v3  ;;  %v4272_v11 = vunpack.i.l.bf16 %v4271_v3 }
 0x557   :  { %v2841_v14 = vsel %vm7079_vm2, %v2823_v2, %v4272_v11  ;;  %v2842_v56 = vsel %vm7080_vm14, %v2824_v16, %v4273_v44  ;;  %v3024_v44 = vadd.f32 %v6788_v42, %v2972_v33  ;;  %vm7082_vm2 = vmmov %vm7076_vm15  ;;  %v3017_v16 = vadd.f32 %v6663_v0, %v2965_v1 }
 0x558   :  { %v2919_v28 = vpack.c.bf16 %v2842_v56, %v2841_v14  ;;  %v2514_v2 = vsel %vm7082_vm2, %v2511_v4, %v2513_v50  ;;  %v4268_v14 = vunpack.i.h.bf16 %v6818_v59  ;;  %vm7083_vm14 = vmmov %vm7082_vm2 }
 0x559   :  { %v3076_v20 = vadd.f32 %v6792_v15, %v3024_v44  ;;  %v2516_v56 = vsel %vm7083_vm14, %v2513_v50, %v2515_v27  ;;  %v3069_v4 = vadd.f32 %v6632_v34, %v3017_v16  ;;  %vm7084_vm15 = vmmov %vm7077_vm1  ;;  %v3129_v50 = vrot.slane %v3112_v6, 5 }
 0x55a   :  { %v4256_v24 = vpop.permute.xlu0 %4255  ;;  %2993 = vmatmul.bf16.gmra.mxu1 %v2919_v28  ;;  %vm7089_vm14 = vmmov %vm7077_vm1 }
 0x55b   :  { %v4258_v60 = vunpack.i.h.bf16 %v4256_v24  ;;  %v4257_v13 = vunpack.i.l.bf16 %v4256_v24  ;;  %v3111_v44 = vmax.f32 %v3069_v4, 0.0 }
 0x55c   :  { %v4281_v11 = vpop.permute.xlu2 %4280 }
 0x55d   :  { %v2895_v39 = vsel %vm7077_vm1, %v6782_v8, %v4257_v13  ;;  %v2896_v10 = vsel %vm7081_vm11, %v2878_v48, %v4258_v60  ;;  %v4283_v28 = vunpack.i.h.bf16 %v4281_v11  ;;  %v4282_v63 = vunpack.i.l.bf16 %v4281_v11  ;;  %vm7085_vm11 = vmmov %vm7077_vm1 }
 0x55e   :  { %v2920_v52 = vpack.c.bf16 %v2896_v10, %v2895_v39  ;;  %v3114_v60 = vmax.f32 %v3076_v20, 0.0  ;;  %v3162_v13 = vsel %vm707_vm4, %v3160_v41, %v6808_v37  ;;  %v3131_v37 = vsel %vm707_vm4, %v3129_v50, %v6795_v26 }
 0x560   :  { %3045 = vmatmul.bf16.gmra.mxu2 %v2920_v52 }
 0x562   :  { %v4276_v9 = vpop.permute.xlu0 %4275 }
 0x563   :  { %v4277_v3 = vunpack.i.l.bf16 %v4276_v9  ;;  %v4278_v8 = vunpack.i.h.bf16 %v4276_v9  ;;  %v3167_v9 = vmax.f32 %v3114_v60, %v3162_v13 }
 0x565   :  { %v2861_v54 = vsel %vm1110_vm6, %v2514_v2, %v4277_v3  ;;  %v2862_v42 = vsel %vm1110_vm6, %v2516_v56, %v4278_v8  ;;  %v3134_v56 = vmax.f32 %v3111_v44, %v3131_v37  ;;  %v3170_v26 = vrot.slane %v3167_v9, 1 }
 0x566   :  { %v2879_v0 = vsel %vm1129_vm9, %v2861_v54, %v4268_v14 }
 0x567   :  { %v2897_v33 = vsel %vm7077_vm1, %v2879_v0, %v4282_v63 }
 0x56a   :  { %v4286_v38 = vpop.permute.xlu0 %4285  ;;  %v2639_v24 = vpop.permute.xlu1 %2638 }
 0x56b   :  { %v2880_v15 = vsel %vm1129_vm9, %v2862_v42, %v2639_v24  ;;  %v4288_v27 = vunpack.i.h.bf16 %v4286_v38  ;;  %v4287_v39 = vunpack.i.l.bf16 %v4286_v38 }
 0x56c   :  { %v2898_v45 = vsel %vm7084_vm15, %v2880_v15, %v4283_v28  ;;  %v4296_v48 = vpop.permute.xlu2 %4295  ;;  %v3033_v15 = vpop.f32.mrf.mxu2  ;;  %vm7091_vm15 = vmmov %vm7077_vm1 }
 0x56d   :  { %v4298_v10 = vunpack.i.h.bf16 %v4296_v48  ;;  %v4297_v52 = vunpack.i.l.bf16 %v4296_v48  ;;  %v2923_v34 = vpack.c.bf16 %v2898_v45, %v2897_v33  ;;  %v2808_v11 = vsel %vm1110_vm6, %v6350_v49, %v4288_v27 }
 0x56e   :  { %v2807_v2 = vsel %vm1110_vm6, %v6356_v51, %v4287_v39  ;;  %v2826_v63 = vsel %vm1129_vm9, %v2808_v11, %v4238_v22  ;;  %v6902_v45 = vmax.f32 %v3167_v9, %v3170_v26  ;;  %v3085_v22 = vpop.f32.mrf.mxu0 }
 0x56f   :  { %v2190_v1 = vmax.f32 %v6771_v62, %v4298_v10  ;;  %v2191_v3 = vmax.f32 %v6775_v35, %v4297_v52  ;;  %v2825_v4 = vsel %vm1129_vm9, %v2807_v2, %v4237_v19 }
 0x570   :  { %3050 = vmatmul.bf16.gmra.mxu2 %v2923_v34  ;;  %v3178_v48 = vrot.slane %v6902_v45, 2 }
 0x571   :  { %v2680_v8 = vrot.slane %v2190_v1, 3  ;;  %v2771_v61 = vrot.slane %v2190_v1, 4  ;;  %v2192_v6 = vsel %vm503_vm7, %v2191_v3, 0.0  ;;  %v2634_v16 = vrot.slane %v2190_v1, 2 }
 0x572   :  { %v2636_v54 = vrot.slane %v2192_v6, 2  ;;  %v2682_v62 = vrot.slane %v2192_v6, 3  ;;  %v2773_v20 = vrot.slane %v2192_v6, 4  ;;  %v4291_v35 = vpop.permute.xlu1 %4290  ;;  %v4324_v39 = vpack.i.bf16 %v3185_v46, %v3178_v48 }
 0x573   :  { %v4293_v41 = vunpack.i.h.bf16 %v4291_v35  ;;  %v4292_v28 = vunpack.i.l.bf16 %v4291_v35  ;;  %v2772_v49 = vsel %vm1054_vm5, %v2769_v12, %v2771_v61  ;;  %v2681_v51 = vsel %vm962_vm8, %v2678_v55, %v2680_v8  ;;  %v2981_v12 = vpop.f32.mrf.mxu1 }
 0x574   :  { %v2774_v38 = vsel %vm1054_vm5, %v2771_v61, %v2773_v20  ;;  %v2683_v42 = vsel %vm962_vm8, %v2680_v8, %v2682_v62  ;;  %v2635_v60 = vsel %vm614_vm3, %v2632_v43, %v2634_v16  ;;  %v2637_v55 = vsel %vm614_vm3, %v2634_v16, %v2636_v54  ;;  %vm7086_vm8 = vmmov %vm7077_vm1 }
 0x575   :  { %v2927_v24 = vpack.c.bf16 %v2774_v38, %v2772_v49  ;;  %v4309_v0 = vpack.i.bf16 %v2683_v42, %v2681_v51  ;;  %v2843_v13 = vsel %vm7085_vm11, %v2825_v4, %v4292_v28  ;;  %v2844_v27 = vsel %vm7086_vm8, %v2826_v63, %v4293_v41  ;;  %vm7087_vm3 = vmmov %vm7082_vm2 }
 0x576   :  { %v4304_v19 = vpack.i.bf16 %v2637_v55, %v2635_v60  ;;  %v2922_v29 = vpack.c.bf16 %v2844_v27, %v2843_v13  ;;  %v3137_v43 = vrot.slane %v3134_v56, 1  ;;  %v3088_v34 = vpop.f32.mrf.mxu0  ;;  %v2982_v44 = vadd.f32 %v6748_v18, %v2981_v12  ;;  %vm7088_vm2 = vmmov %vm7077_vm1 }
 0x577   :  { %3569 = vmatmul.msk.bf16.gmra.mxu0 %vm1110_vm6, %v2927_v24  ;;  %4310 = vrot.lane.b32.xlu2 %v4309_v0, %s4354_s18 }
 0x578   :  { %4305 = vrot.lane.b32.xlu1 %v4304_v19, %s4355_s25  ;;  %2998 = vmatmul.bf16.gmra.mxu1 %v2922_v29  ;;  %v6907_v33 = vmax.f32 %v3134_v56, %v3137_v43  ;;  %v3034_v61 = vadd.f32 %v3033_v15, %v2982_v44  ;;  %v4301_v43 = vpop.permute.xlu0 %4300 }
 0x579   :  { %v4302_v44 = vunpack.i.l.bf16 %v4301_v43 }
 0x57a   :  { %v3145_v1 = vrot.slane %v6907_v33, 2  ;;  %v3151_v3 = vrot.slane %v6907_v33, 6 }
 0x57c   :  { %v3036_v10 = vpop.f32.mrf.mxu2  ;;  %v4334_v8 = vpack.i.bf16 %v3151_v3, %v3145_v1  ;;  %v4303_v1 = vunpack.i.h.bf16 %v4301_v43 }
 0x57e   :  { %v2984_v52 = vpop.f32.mrf.mxu1  ;;  %v3090_v5 = vpop.f32.mrf.mxu0 }
 0x57f   :  { %v2985_v50 = vadd.f32 %v6748_v18, %v2984_v52  ;;  %4325 = vrot.lane.b32.xlu2 %v4324_v39, %s4355_s25 }
 0x580   :  { %4320 = vrot.lane.b32.xlu1 %v4319_v57, %s4354_s18  ;;  %v3086_v57 = vadd.f32 %v3085_v22, %v3034_v61 }
 0x581   :  { %v3037_v9 = vadd.f32 %v3036_v10, %v2985_v50 }
 0x582   :  { %v3118_v56 = vmax.f32 %v3086_v57, 0.0 }
 0x583   :  { %v3089_v7 = vadd.f32 %v3088_v34, %v3037_v9 }
 0x584   :  { %v3038_v16 = vpop.f32.mrf.mxu2 }
 0x585   :  { %v3119_v37 = vmax.f32 %v3089_v7, 0.0 }
 0x586   :  { %v2986_v11 = vpop.f32.mrf.mxu1  ;;  %v3093_v4 = vpop.f32.mrf.mxu0 }
 0x587   :  { %v2987_v2 = vadd.f32 %v6748_v18, %v2986_v11  ;;  %v3193_v6 = vrot.slane %v3119_v37, 5 }
 0x588   :  { %4335 = vrot.lane.b32.xlu1 %v4334_v8, %s4355_s25  ;;  %v4316_v8 = vpop.permute.xlu0 %4315 }
 0x589   :  { %v3039_v54 = vadd.f32 %v3038_v16, %v2987_v2  ;;  %v3198_v62 = vmax.f32 %v3117_v17, %v3193_v6  ;;  %v2864_v16 = vsel %vm1110_vm6, %v6718_v58, %v4303_v1 }
 0x58b   :  { %v6920_v25 = vadd.f32 %v3090_v5, %v3039_v54  ;;  %v3201_v41 = vrot.slane %v3198_v62, 1 }
 0x58c   :  { %v3041_v60 = vpop.f32.mrf.mxu2 }
 0x58d   :  { %v3120_v20 = vmax.f32 %v6920_v25, 0.0  ;;  %v6928_v49 = vmax.f32 %v3198_v62, %v3201_v41 }
 0x58e   :  { %v3095_v63 = vpop.f32.mrf.mxu0  ;;  %v2989_v15 = vpop.f32.mrf.mxu1 }
 0x58f   :  { %v3194_v35 = vrot.slane %v3120_v20, 5  ;;  %v3209_v42 = vrot.slane %v6928_v49, 2  ;;  %v2990_v22 = vadd.f32 %v6748_v18, %v2989_v15 }
 0x591   :  { %v3195_v28 = vsel %vm707_vm4, %v3193_v6, %v3194_v35  ;;  %v3042_v10 = vadd.f32 %v3041_v60, %v2990_v22  ;;  %v2863_v35 = vsel %vm1110_vm6, %v6671_v47, %v4302_v44 }
 0x592   :  { %v3199_v26 = vmax.f32 %v3118_v56, %v3195_v28 }
 0x593   :  { %v3094_v7 = vadd.f32 %v3093_v4, %v3042_v10 }
 0x594   :  { %v3205_v38 = vrot.slane %v3199_v26, 1  ;;  %v3043_v19 = vpop.f32.mrf.mxu2 }
 0x595   :  { %v3121_v61 = vmax.f32 %v3094_v7, 0.0 }
 0x596   :  { %v6930_v51 = vmax.f32 %v3199_v26, %v3205_v38  ;;  %v3098_v12 = vpop.f32.mrf.mxu0  ;;  %v2991_v55 = vpop.f32.mrf.mxu1  ;;  %v4318_v26 = vunpack.i.h.bf16 %v4316_v8  ;;  %v4317_v38 = vunpack.i.l.bf16 %v4316_v8 }
 0x597   :  { %v2992_v27 = vadd.f32 %v6748_v18, %v2991_v55 }
 0x598   :  { %v3216_v53 = vrot.slane %v6930_v51, 6  ;;  %v3294_v24 = vrot.slane %v6930_v51, 2  ;;  %v2810_v47 = vsel %vm1110_vm6, %v6544_v40, %v4318_v26  ;;  %v2809_v60 = vsel %vm1110_vm6, %v6447_v30, %v4317_v38  ;;  %vm7090_vm6 = vmmov %vm7077_vm1 }
 0x599   :  { %v3044_v29 = vadd.f32 %v3043_v19, %v2992_v27  ;;  %v2828_v40 = vsel %vm1129_vm9, %v2810_v47, %v4268_v14  ;;  %vm7093_vm1 = vmmov %vm7087_vm3 }
 0x59a   :  { %v4329_v17 = vpack.i.bf16 %v3216_v53, %v3209_v42  ;;  %v6938_v0 = vsel %vm7087_vm3, %v6816_v36, %v3294_v24 }
 0x59b   :  { %v3096_v39 = vadd.f32 %v3095_v63, %v3044_v29 }
 0x59c   :  { %4330 = vrot.lane.b32.xlu0 %v4329_v17, %s4355_s25 }
 0x59d   :  { %v3122_v34 = vmax.f32 %v3096_v39, 0.0  ;;  %v2827_v39 = vsel %vm1129_vm9, %v2809_v60, %v4267_v21 }
 0x59e   :  { %v6940_v13 = vpop.f32.mrf.mxu0 }
 0x59f   :  { %v6945_v37 = vrot.slane %v3122_v34, 5 }
 0x5a6   :  { %v3103_v48 = vpop.f32.mrf.mxu0 }
 0x5ae   :  { %v3105_v54 = vpop.f32.mrf.mxu0 }
 0x5d1   :  { %v4311_v11 = vpop.permute.xlu2 %4310 }
 0x5d2   :  { %v4313_v56 = vunpack.i.h.bf16 %v4311_v11  ;;  %v4312_v41 = vunpack.i.l.bf16 %v4311_v11 }
 0x5d7   :  { %v2994_v46 = vpop.f32.mrf.mxu1 }
 0x5d8   :  { %v2995_v36 = vadd.f32 %v6748_v18, %v2994_v46 }
 0x5df   :  { %v2996_v42 = vpop.f32.mrf.mxu1 }
 0x5e0   :  { %v2997_v21 = vadd.f32 %v6748_v18, %v2996_v42 }
 0x5e3   :  { %v3046_v52 = vpop.f32.mrf.mxu2 }
 0x5e4   :  { %v3047_v50 = vadd.f32 %v3046_v52, %v2995_v36 }
 0x5e6   :  { %v3099_v9 = vadd.f32 %v3098_v12, %v3047_v50 }
 0x5e8   :  { %v3123_v3 = vmax.f32 %v3099_v9, 0.0 }
 0x5ea   :  { %v3225_v2 = vrot.slane %v3123_v3, 5  ;;  %v4306_v6 = vpop.permute.xlu1 %4305 }
 0x5eb   :  { %v4308_v57 = vunpack.i.h.bf16 %v4306_v6  ;;  %v4307_v62 = vunpack.i.l.bf16 %v4306_v6  ;;  %v3048_v53 = vpop.f32.mrf.mxu2 }
 0x5ec   :  { %v3226_v5 = vsel %vm707_vm4, %v6945_v37, %v3225_v2  ;;  %v3049_v3 = vadd.f32 %v3048_v53, %v2997_v21  ;;  %v3229_v21 = vmax.f32 %v3120_v20, %v6945_v37 }
 0x5ed   :  { %v3230_v28 = vmax.f32 %v3121_v61, %v3226_v5  ;;  %v2882_v17 = vsel %vm1129_vm9, %v2864_v16, %v4308_v57  ;;  %v2881_v58 = vsel %vm1129_vm9, %v2863_v35, %v4307_v62 }
 0x5ee   :  { %v2899_v4 = vsel %vm7088_vm2, %v2881_v58, %v4312_v41  ;;  %v2900_v63 = vsel %vm7089_vm14, %v2882_v17, %v4313_v56  ;;  %v3101_v61 = vadd.f32 %v6940_v13, %v3049_v3  ;;  %v3572_v17 = vld [vmem:[%s7036_s5 + $0x14] sm:$0x7] }
 0x5ef   :  { %v3236_v24 = vrot.slane %v3230_v28, 1  ;;  %v2926_v15 = vpack.c.bf16 %v2900_v63, %v2899_v4  ;;  %v4326_v63 = vpop.permute.xlu2 %4325 }
 0x5f0   :  { %v3124_v57 = vmax.f32 %v3101_v61, 0.0  ;;  %v4328_v60 = vunpack.i.h.bf16 %v4326_v63 }
 0x5f1   :  { %v6957_v12 = vmax.f32 %v3230_v28, %v3236_v24  ;;  %3055 = vmatmul.bf16.gmra.mxu2 %v2926_v15 }
 0x5f2   :  { %v4321_v55 = vpop.permute.xlu1 %4320 }
 0x5f3   :  { %v3240_v27 = vrot.slane %v6957_v12, 2  ;;  %v3246_v19 = vrot.slane %v6957_v12, 6  ;;  %v4323_v29 = vunpack.i.h.bf16 %v4321_v55  ;;  %v4322_v22 = vunpack.i.l.bf16 %v4321_v55  ;;  %v3051_v36 = vpop.f32.mrf.mxu2 }
 0x5f4   :  { %v3108_v46 = vpop.f32.mrf.mxu0  ;;  %v3214_v55 = vrot.slane %v6930_v51, 4 }
 0x5f5   :  { %v4339_v43 = vpack.i.bf16 %v3246_v19, %v3240_v27  ;;  %v2999_v30 = vpop.f32.mrf.mxu1  ;;  %v2845_v10 = vsel %vm7090_vm6, %v2827_v39, %v4322_v22  ;;  %v2846_v52 = vsel %vm7091_vm15, %v2828_v40, %v4323_v29  ;;  %v3182_v27 = vrot.slane %v6902_v45, 4 }
 0x5f6   :  { %v3000_v50 = vadd.f32 %v6748_v18, %v2999_v30  ;;  %v2925_v34 = vpack.c.bf16 %v2846_v52, %v2845_v10  ;;  %v3149_v22 = vrot.slane %v6907_v33, 4  ;;  %v3244_v40 = vrot.slane %v6957_v12, 4 }
 0x5f7   :  { %4340 = vrot.lane.b32.xlu2 %v4339_v43, %s4355_s25  ;;  %v3190_v23 = vsel %vm1129_vm9, %v3182_v27, %v4328_v60 }
 0x5f8   :  { %3003 = vmatmul.bf16.gmra.mxu1 %v2925_v34  ;;  %v3052_v9 = vadd.f32 %v3051_v36, %v3000_v50  ;;  %v3285_v30 = vrot.slane %v3190_v23, 1 }
 0x5fa   :  { %v3104_v59 = vadd.f32 %v3103_v48, %v3052_v9  ;;  %v3302_v48 = vrot.slane %v6957_v12, 3  ;;  %v4336_v15 = vpop.permute.xlu1 %4335 }
 0x5fb   :  { %v3053_v44 = vpop.f32.mrf.mxu2  ;;  %v4338_v19 = vunpack.i.h.bf16 %v4336_v15 }
 0x5fc   :  { %v3109_v7 = vpop.f32.mrf.mxu0  ;;  %v3125_v2 = vmax.f32 %v3104_v59, 0.0  ;;  %v3232_v59 = vrot.slane %v3229_v21, 1 }
 0x5fd   :  { %v3001_v1 = vpop.f32.mrf.mxu1  ;;  %v3156_v43 = vsel %vm1129_vm9, %v3149_v22, %v4338_v19 }
 0x5fe   :  { %v3002_v14 = vadd.f32 %v6748_v18, %v3001_v1  ;;  %v3254_v16 = vrot.slane %v3125_v2, 5  ;;  %v3316_v51 = vsel %vm503_vm7, %v3156_v43, %v3285_v30 }
 0x600   :  { %v3054_v11 = vadd.f32 %v3053_v44, %v3002_v14  ;;  %v4327_v14 = vunpack.i.l.bf16 %v4326_v63 }
 0x602   :  { %v3106_v8 = vadd.f32 %v3105_v54, %v3054_v11  ;;  %v3323_v54 = vsel %vm707_vm4, %v6938_v0, %v3302_v48  ;;  %v4337_v11 = vunpack.i.l.bf16 %v4336_v15 }
 0x604   :  { %v3126_v6 = vmax.f32 %v3106_v8, 0.0  ;;  %v3189_v8 = vsel %vm1129_vm9, %v6902_v45, %v4327_v14  ;;  %v3155_v25 = vsel %vm1129_vm9, %v6907_v33, %v4337_v11  ;;  %v3570_v33 = vld [vmem:[%s7036_s5 + $0xc] sm:$0x77] }
 0x606   :  { %v3255_v5 = vrot.slane %v3126_v6, 5 }
 0x608   :  { %v3256_v62 = vsel %vm707_vm4, %v3254_v16, %v3255_v5  ;;  %v3260_v35 = vmax.f32 %v3125_v2, %v3255_v5  ;;  %v3234_v2 = vmax.f32 %v3229_v21, %v3232_v59  ;;  %v3284_v16 = vrot.slane %v3189_v8, 1 }
 0x609   :  { %v3259_v56 = vmax.f32 %v3124_v57, %v3256_v62 }
 0x60a   :  { %v3266_v41 = vrot.slane %v3260_v35, 1 }
 0x60b   :  { %v3262_v28 = vrot.slane %v3259_v56, 1 }
 0x60c   :  { %v3268_v18 = vmax.f32 %v3260_v35, %v3266_v41 }
 0x60d   :  { %v3264_v26 = vmax.f32 %v3259_v56, %v3262_v28  ;;  %v3315_v56 = vsel %vm503_vm7, %v3155_v25, %v3284_v16 }
 0x60e   :  { %v3311_v38 = vrot.slane %v3268_v18, 4  ;;  %v4331_v0 = vpop.permute.xlu0 %4330 }
 0x60f   :  { %v3270_v42 = vrot.slane %v3264_v26, 2  ;;  %v3276_v13 = vrot.slane %v3264_v26, 6  ;;  %v4333_v47 = vunpack.i.h.bf16 %v4331_v0  ;;  %v4332_v3 = vunpack.i.l.bf16 %v4331_v0 }
 0x610   :  { %v3326_v53 = vsel %vm1054_vm5, %v3323_v54, %v3311_v38  ;;  %v3274_v57 = vrot.slane %v3264_v26, 4 }
 0x611   :  { %v3328_v58 = vpack.c.bf16 %v3326_v53, %v3326_v53  ;;  %v4344_v24 = vpack.i.bf16 %v3276_v13, %v3270_v42  ;;  %v3221_v29 = vsel %vm1129_vm9, %v3214_v55, %v4333_v47  ;;  %v3220_v61 = vsel %vm1129_vm9, %v6928_v49, %v4332_v3 }
 0x612   :  { %v3293_v39 = vrot.slane %v3221_v29, 2  ;;  %v3292_v20 = vrot.slane %v3220_v61, 2 }
 0x613   :  { %v3334_v4 = vsel %vm5799_vm13, %v3328_v58, %v3572_v17  ;;  %4345 = vrot.lane.b32.xlu0 %v4344_v24, %s4355_s25  ;;  %vm7092_vm13 = vmmov %vm7087_vm3 }
 0x614   :  { %3573 = vst [vmem:[%s7036_s5 + $0x14] sm:$0x7] %v3334_v4  ;;  %v3319_v50 = vsel %vm7092_vm13, %v3316_v51, %v3293_v39  ;;  %v3318_v49 = vsel %vm7093_vm1, %v3315_v56, %v3292_v20 }
 0x651   :  { %v4341_v46 = vpop.permute.xlu2 %4340 }
 0x652   :  { %v4343_v36 = vunpack.i.h.bf16 %v4341_v46  ;;  %v4342_v44 = vunpack.i.l.bf16 %v4341_v46 }
 0x654   :  { %v3251_v10 = vsel %vm1129_vm9, %v3244_v40, %v4343_v36  ;;  %v3250_v6 = vsel %vm1129_vm9, %v3234_v2, %v4342_v44 }
 0x655   :  { %v3301_v52 = vrot.slane %v3251_v10, 3  ;;  %v3300_v5 = vrot.slane %v3250_v6, 3 }
 0x657   :  { %v3322_v34 = vsel %vm707_vm4, %v3319_v50, %v3301_v52  ;;  %v3321_v18 = vsel %vm707_vm4, %v3318_v49, %v3300_v5 }
 0x674   :  { %v3056_v9 = vpop.f32.mrf.mxu2 }
 0x675   :  { %v3004_v7 = vpop.f32.mrf.mxu1 }
 0x67c   :  { %v3057_v1 = vpop.f32.mrf.mxu2 }
 0x67d   :  { %v3005_v12 = vpop.f32.mrf.mxu1 }
 0x685   :  { %v4346_v37 = vpop.permute.xlu0 %4345 }
 0x686   :  { %v4348_v62 = vunpack.i.h.bf16 %v4346_v37  ;;  %v4347_v35 = vunpack.i.l.bf16 %v4346_v37 }
 0x688   :  { %v3281_v41 = vsel %vm1129_vm9, %v3274_v57, %v4348_v62  ;;  %v3280_v45 = vsel %vm1129_vm9, %v3264_v26, %v4347_v35 }
 0x689   :  { %v3310_v48 = vrot.slane %v3281_v41, 4  ;;  %v3309_v28 = vrot.slane %v3280_v45, 4 }
 0x68b   :  { %v3324_v38 = vsel %vm1054_vm5, %v3321_v18, %v3309_v28  ;;  %v3325_v54 = vsel %vm1054_vm5, %v3322_v34, %v3310_v48 }
 0x68c   :  { %v3327_v42 = vpack.c.bf16 %v3325_v54, %v3324_v38 }
 0x68e   :  { %v3331_v26 = vsel %vm1766_vm0, %v3327_v42, %v3570_v33 }
 0x68f   :  { %3571 = vst [vmem:[%s7036_s5 + $0xc] sm:$0x77] %v3331_v26 }

// kernel: forward.3
= control target key start
LH: loop header
LB: loop body
LE: loop exit
PB: predicated region body
PF: predicated region fallthrough
CT: control target
= control target key end

     0   :  { %s2014_s0 = inlined_call_operand.vmem [shape: bf16[2,1600], index: 0, kind: input, shape index: {}]   ;;  %s2015_s1 = inlined_call_operand.vmem [shape: bf16[1600,64], index: 1, kind: input, shape index: {}]   ;;  %s2016_s2 = inlined_call_operand.vmem [shape: f32[1,64], index: 2, kind: input, shape index: {}]   ;;  %s2017_s3 = inlined_call_operand.vmem [shape: bf16[64,128], index: 3, kind: input, shape index: {}]   ;;  %s2018_s4 = inlined_call_operand.vmem [shape: f32[1,128], index: 4, kind: input, shape index: {}]   ;;  %s2019_s5 = inlined_call_operand.hbm [shape: f32[2,128], index: 5, kind: output, shape index: {}]  }
   0x1   :  { %v1525_v0 = vld [vmem:[%s2015_s1 + $0x38] sm:$0xff]  ;;  %v1524_v4 = vld [vmem:[%s2015_s1 + $0x30] sm:$0xff]  ;;  %v1523_v8 = vld [vmem:[%s2015_s1 + $0x28] sm:$0xff] }
   0x2   :  { %v1541_v1 = vld [vmem:[%s2015_s1 + $0xb8] sm:$0xff]  ;;  %860 = vmatpush.bf16.msra.mxu0 %v1525_v0  ;;  %v1540_v5 = vld [vmem:[%s2015_s1 + $0xb0] sm:$0xff]  ;;  %v1539_v9 = vld [vmem:[%s2015_s1 + $0xa8] sm:$0xff] }
   0x3   :  { %v1549_v2 = vld [vmem:[%s2015_s1 + $0xf8] sm:$0xff]  ;;  %886 = vmatpush.bf16.msra.mxu2 %v1541_v1  ;;  %v1548_v6 = vld [vmem:[%s2015_s1 + $0xf0] sm:$0xff]  ;;  %v1547_v10 = vld [vmem:[%s2015_s1 + $0xe8] sm:$0xff] }
   0x4   :  { %v1533_v3 = vld [vmem:[%s2015_s1 + $0x78] sm:$0xff]  ;;  %899 = vmatpush.bf16.msra.mxu3 %v1549_v2  ;;  %v1532_v7 = vld [vmem:[%s2015_s1 + $0x70] sm:$0xff]  ;;  %v1531_v11 = vld [vmem:[%s2015_s1 + $0x68] sm:$0xff] }
   0x5   :  { %873 = vmatpush.bf16.msra.mxu1 %v1533_v3  ;;  %v1522_v12 = vld [vmem:[%s2015_s1 + $0x20] sm:$0xff]  ;;  %v1521_v16 = vld [vmem:[%s2015_s1 + $0x18] sm:$0xff]  ;;  %v1520_v21 = vld [vmem:[%s2015_s1 + $0x10] sm:$0xff] }
   0x6   :  { %861 = vmatpush.bf16.msra.mxu0 %v1524_v4  ;;  %v1538_v13 = vld [vmem:[%s2015_s1 + $0xa0] sm:$0xff]  ;;  %v1537_v17 = vld [vmem:[%s2015_s1 + $0x98] sm:$0xff]  ;;  %v1536_v22 = vld [vmem:[%s2015_s1 + $0x90] sm:$0xff] }
   0x7   :  { %887 = vmatpush.bf16.msra.mxu2 %v1540_v5  ;;  %v1546_v14 = vld [vmem:[%s2015_s1 + $0xe0] sm:$0xff]  ;;  %v1545_v18 = vld [vmem:[%s2015_s1 + $0xd8] sm:$0xff]  ;;  %v1544_v23 = vld [vmem:[%s2015_s1 + $0xd0] sm:$0xff] }
   0x8   :  { %900 = vmatpush.bf16.msra.mxu3 %v1548_v6  ;;  %v1530_v15 = vld [vmem:[%s2015_s1 + $0x60] sm:$0xff]  ;;  %v1529_v19 = vld [vmem:[%s2015_s1 + $0x58] sm:$0xff]  ;;  %v1528_v24 = vld [vmem:[%s2015_s1 + $0x50] sm:$0xff] }
   0x9   :  { %874 = vmatpush.bf16.msra.mxu1 %v1532_v7  ;;  %v22_v20 = vld [vmem:[%s2014_s0] sm:$0xff] }
   0xa   :  { %862 = vmatpush.bf16.msra.mxu0 %v1523_v8  ;;  %229 = vst [vmem:[#allocation1] ss:$9 sm:$0xff] %v22_v20 }
   0xb   :  { %888 = vmatpush.bf16.msra.mxu2 %v1539_v9 }
   0xc   :  { %901 = vmatpush.bf16.msra.mxu3 %v1547_v10 }
   0xd   :  { %875 = vmatpush.bf16.msra.mxu1 %v1531_v11 }
   0xe   :  { %863 = vmatpush.bf16.msra.mxu0 %v1522_v12 }
   0xf   :  { %889 = vmatpush.bf16.msra.mxu2 %v1538_v13 }
  0x10   :  { %902 = vmatpush.bf16.msra.mxu3 %v1546_v14 }
  0x11   :  { %876 = vmatpush.bf16.msra.mxu1 %v1530_v15 }
  0x12   :  { %864 = vmatpush.bf16.msra.mxu0 %v1521_v16 }
  0x13   :  { %890 = vmatpush.bf16.msra.mxu2 %v1537_v17 }
  0x14   :  { %903 = vmatpush.bf16.msra.mxu3 %v1545_v18 }
  0x15   :  { %877 = vmatpush.bf16.msra.mxu1 %v1529_v19 }
  0x16   :  { %10 = vsyncpa [#allocation3], 0  ;;  %865 = vmatpush.bf16.msra.mxu0 %v1520_v21  ;;  %v1519_v25 = vld [vmem:[%s2015_s1 + $0x8] sm:$0xff]  ;;  %v1518_v29 = vld [vmem:[%s2015_s1] sm:$0xff]  ;;  %vm857_vm0 = vcmask 523264   ;;  %s1651_s26 = smov [#allocation2]  }
  0x17   :  { %891 = vmatpush.bf16.msra.mxu2 %v1536_v22  ;;  %v1535_v26 = vld [vmem:[%s2015_s1 + $0x88] sm:$0xff]  ;;  %v1534_v30 = vld [vmem:[%s2015_s1 + $0x80] sm:$0xff]  ;;  %v1557_v32 = vld [vmem:[%s2015_s1 + $0x138] sm:$0xff]  ;;  %s1089_s27 = sshll.u32 %s1651_s26, 4  ;;  %s1091_s30 = sshll.u32 %s2019_s5, 4  ;;  %s1090_s27 = int_to_ptr.vmem [resolvable:$true] %s1089_s27  ;;  %s1092_s30 = int_to_ptr.hbm [resolvable:$true] %s1091_s30 }
  0x18   :  { %904 = vmatpush.bf16.msra.mxu3 %v1544_v23  ;;  %v1543_v27 = vld [vmem:[%s2015_s1 + $0xc8] sm:$0xff]  ;;  %v1542_v31 = vld [vmem:[%s2015_s1 + $0xc0] sm:$0xff]  ;;  %v1573_v33 = vld [vmem:[%s2015_s1 + $0x1b8] sm:$0xff] }
  0x19   :  { %878 = vmatpush.bf16.msra.mxu1 %v1528_v24  ;;  %v1527_v28 = vld [vmem:[%s2015_s1 + $0x48] sm:$0xff]  ;;  %v1581_v34 = vld [vmem:[%s2015_s1 + $0x1f8] sm:$0xff]  ;;  %v1526_v35 = vld [vmem:[%s2015_s1 + $0x40] sm:$0xff] }
  0x1a   :  { %866 = vmatpush.bf16.msra.mxu0 %v1519_v25  ;;  %v1565_v36 = vld [vmem:[%s2015_s1 + $0x178] sm:$0xff]  ;;  %v1556_v38 = vld [vmem:[%s2015_s1 + $0x130] sm:$0xff]  ;;  %v230_v39 = vld [vmem:[#allocation1] sm:$0xff] }
  0x1b   :  { %892 = vmatpush.bf16.msra.mxu2 %v1535_v26  ;;  %v232_v37 = vld [vmem:[#allocation1 + $0x12] sm:$0xff]  ;;  %v233_v42 = vld [vmem:[#allocation1 + $0x1b] sm:$0xff]  ;;  %v231_v44 = vld [vmem:[#allocation1 + $0x9] sm:$0xff] }
  0x1c   :  { %905 = vmatpush.bf16.msra.mxu3 %v1543_v27  ;;  %v1572_v40 = vld [vmem:[%s2015_s1 + $0x1b0] sm:$0xff]  ;;  %v1555_v45 = vld [vmem:[%s2015_s1 + $0x128] sm:$0xff]  ;;  %v237_v51 = vld [vmem:[#allocation1 + $0x3f] sm:$0xff] }
  0x1d   :  { %879 = vmatpush.bf16.msra.mxu1 %v1527_v28  ;;  %v1580_v41 = vld [vmem:[%s2015_s1 + $0x1f0] sm:$0xff]  ;;  %v1571_v46 = vld [vmem:[%s2015_s1 + $0x1a8] sm:$0xff]  ;;  %v1554_v54 = vld [vmem:[%s2015_s1 + $0x120] sm:$0xff] }
  0x1e   :  { %867 = vmatpush.bf16.msra.mxu0 %v1518_v29  ;;  %v1564_v43 = vld [vmem:[%s2015_s1 + $0x170] sm:$0xff]  ;;  %v1579_v47 = vld [vmem:[%s2015_s1 + $0x1e8] sm:$0xff]  ;;  %v1570_v55 = vld [vmem:[%s2015_s1 + $0x1a0] sm:$0xff] }
  0x1f   :  { %893 = vmatpush.bf16.msra.mxu2 %v1534_v30  ;;  %v1563_v48 = vld [vmem:[%s2015_s1 + $0x168] sm:$0xff]  ;;  %v236_v49 = vld [vmem:[#allocation1 + $0x36] sm:$0xff]  ;;  %v1578_v56 = vld [vmem:[%s2015_s1 + $0x1e0] sm:$0xff] }
  0x20   :  { %906 = vmatpush.bf16.msra.mxu3 %v1542_v31  ;;  %v234_v50 = vld [vmem:[#allocation1 + $0x24] sm:$0xff]  ;;  %v1820_v53 = vld [vmem:[#allocation1 + $0x2d] sm:$0xff]  ;;  %v1553_v58 = vld [vmem:[%s2015_s1 + $0x118] sm:$0xff] }
  0x21   :  { %880 = vmatpush.bf16.msra.mxu1 %v1526_v35  ;;  %868 = vmatmul.bf16.vlgmr.msra.gmra.mxu0 %v230_v39  ;;  %v23_v52 = vld [vmem:[%s2014_s0 + $0x8] sm:$0x1f]  ;;  %v1562_v57 = vld [vmem:[%s2015_s1 + $0x160] sm:$0xff]  ;;  %v1569_v59 = vld [vmem:[%s2015_s1 + $0x198] sm:$0xff] }
  0x22   :  { %912 = vmatpush.bf16.msrb.mxu0 %v1557_v32  ;;  %894 = vmatmul.bf16.vlgmr.msra.gmra.mxu2 %v232_v37  ;;  %239 = vst [vmem:[#allocation1] ss:$9 sm:$0xff] %v23_v52  ;;  %v1577_v60 = vld [vmem:[%s2015_s1 + $0x1d8] sm:$0xff]  ;;  %v1552_v62 = vld [vmem:[%s2015_s1 + $0x110] sm:$0xff]  ;;  %v1551_v2 = vld [vmem:[%s2015_s1 + $0x108] sm:$0xff] }
  0x23   :  { %938 = vmatpush.bf16.msrb.mxu2 %v1573_v33  ;;  %907 = vmatmul.bf16.vlgmr.msra.gmra.mxu3 %v233_v42  ;;  %v1561_v61 = vld [vmem:[%s2015_s1 + $0x158] sm:$0xff]  ;;  %v1568_v63 = vld [vmem:[%s2015_s1 + $0x190] sm:$0xff]  ;;  %v1567_v3 = vld [vmem:[%s2015_s1 + $0x188] sm:$0xff] }
  0x24   :  { %951 = vmatpush.bf16.msrb.mxu3 %v1581_v34  ;;  %881 = vmatmul.bf16.vlgmr.msra.gmra.mxu1 %v231_v44  ;;  %v1576_v0 = vld [vmem:[%s2015_s1 + $0x1d0] sm:$0xff]  ;;  %v1575_v4 = vld [vmem:[%s2015_s1 + $0x1c8] sm:$0xff]  ;;  %v1550_v6 = vld [vmem:[%s2015_s1 + $0x100] sm:$0xff] }
  0x25   :  { %925 = vmatpush.bf16.msrb.mxu1 %v1565_v36  ;;  %v1560_v1 = vld [vmem:[%s2015_s1 + $0x150] sm:$0xff]  ;;  %v1559_v5 = vld [vmem:[%s2015_s1 + $0x148] sm:$0xff]  ;;  %v1566_v7 = vld [vmem:[%s2015_s1 + $0x180] sm:$0xff] }
  0x26   :  { %913 = vmatpush.bf16.msrb.mxu0 %v1556_v38  ;;  %v1574_v8 = vld [vmem:[%s2015_s1 + $0x1c0] sm:$0xff]  ;;  %v1589_v9 = vld [vmem:[%s2015_s1 + $0x238] sm:$0xff]  ;;  %v1588_v14 = vld [vmem:[%s2015_s1 + $0x230] sm:$0xff] }
  0x27   :  { %939 = vmatpush.bf16.msrb.mxu2 %v1572_v40  ;;  %v1605_v10 = vld [vmem:[%s2015_s1 + $0x2b8] sm:$0xff]  ;;  %v1558_v12 = vld [vmem:[%s2015_s1 + $0x140] sm:$0xff]  ;;  %v1604_v15 = vld [vmem:[%s2015_s1 + $0x2b0] sm:$0xff] }
  0x28   :  { %952 = vmatpush.bf16.msrb.mxu3 %v1580_v41  ;;  %v1613_v11 = vld [vmem:[%s2015_s1 + $0x2f8] sm:$0xff]  ;;  %v1612_v16 = vld [vmem:[%s2015_s1 + $0x2f0] sm:$0xff]  ;;  %v1587_v18 = vld [vmem:[%s2015_s1 + $0x228] sm:$0xff] }
  0x29   :  { %926 = vmatpush.bf16.msrb.mxu1 %v1564_v43  ;;  %v1597_v13 = vld [vmem:[%s2015_s1 + $0x278] sm:$0xff]  ;;  %v1596_v17 = vld [vmem:[%s2015_s1 + $0x270] sm:$0xff]  ;;  %v1603_v19 = vld [vmem:[%s2015_s1 + $0x2a8] sm:$0xff] }
  0x2a   :  { %914 = vmatpush.bf16.msrb.mxu0 %v1555_v45  ;;  %v1611_v20 = vld [vmem:[%s2015_s1 + $0x2e8] sm:$0xff]  ;;  %v1586_v22 = vld [vmem:[%s2015_s1 + $0x220] sm:$0xff]  ;;  %v1585_v26 = vld [vmem:[%s2015_s1 + $0x218] sm:$0xff] }
  0x2b   :  { %940 = vmatpush.bf16.msrb.mxu2 %v1571_v46  ;;  %v1595_v21 = vld [vmem:[%s2015_s1 + $0x268] sm:$0xff]  ;;  %v1602_v23 = vld [vmem:[%s2015_s1 + $0x2a0] sm:$0xff]  ;;  %v1601_v27 = vld [vmem:[%s2015_s1 + $0x298] sm:$0xff] }
  0x2c   :  { %953 = vmatpush.bf16.msrb.mxu3 %v1579_v47  ;;  %v1610_v24 = vld [vmem:[%s2015_s1 + $0x2e0] sm:$0xff]  ;;  %v1609_v28 = vld [vmem:[%s2015_s1 + $0x2d8] sm:$0xff]  ;;  %v1584_v30 = vld [vmem:[%s2015_s1 + $0x210] sm:$0xff] }
  0x2d   :  { %927 = vmatpush.bf16.msrb.mxu1 %v1563_v48  ;;  %v1594_v25 = vld [vmem:[%s2015_s1 + $0x260] sm:$0xff]  ;;  %v1593_v29 = vld [vmem:[%s2015_s1 + $0x258] sm:$0xff]  ;;  %v1600_v31 = vld [vmem:[%s2015_s1 + $0x290] sm:$0xff] }
  0x2e   :  { %915 = vmatpush.bf16.msrb.mxu0 %v1554_v54  ;;  %v1608_v32 = vld [vmem:[%s2015_s1 + $0x2d0] sm:$0xff]  ;;  %v1583_v34 = vld [vmem:[%s2015_s1 + $0x208] sm:$0xff]  ;;  %v1582_v38 = vld [vmem:[%s2015_s1 + $0x200] sm:$0xff] }
  0x2f   :  { %941 = vmatpush.bf16.msrb.mxu2 %v1570_v55  ;;  %v1592_v33 = vld [vmem:[%s2015_s1 + $0x250] sm:$0xff]  ;;  %v1599_v35 = vld [vmem:[%s2015_s1 + $0x288] sm:$0xff]  ;;  %v1598_v39 = vld [vmem:[%s2015_s1 + $0x280] sm:$0xff] }
  0x30   :  { %954 = vmatpush.bf16.msrb.mxu3 %v1578_v56  ;;  %v1607_v36 = vld [vmem:[%s2015_s1 + $0x2c8] sm:$0xff]  ;;  %v1606_v40 = vld [vmem:[%s2015_s1 + $0x2c0] sm:$0xff]  ;;  %v1617_v41 = vld [vmem:[%s2015_s1 + $0x318] sm:$0xff] }
  0x31   :  { %928 = vmatpush.bf16.msrb.mxu1 %v1562_v57  ;;  %v1591_v37 = vld [vmem:[%s2015_s1 + $0x248] sm:$0xff]  ;;  %v1590_v42 = vld [vmem:[%s2015_s1 + $0x240] sm:$0xff]  ;;  %v242_v44 = vld [vmem:[#allocation1 + $0x12] sm:$0xff] }
  0x32   :  { %916 = vmatpush.bf16.msrb.mxu0 %v1553_v58  ;;  %v240_v43 = vld [vmem:[#allocation1] sm:$0xff]  ;;  %v1616_v46 = vld [vmem:[%s2015_s1 + $0x310] sm:$0xff]  ;;  %v1615_v48 = vld [vmem:[%s2015_s1 + $0x308] sm:$0xff] }
  0x33   :  { %942 = vmatpush.bf16.msrb.mxu2 %v1569_v59  ;;  %v243_v45 = vld [vmem:[#allocation1 + $0x1b] sm:$0xff]  ;;  %v241_v47 = vld [vmem:[#allocation1 + $0x9] sm:$0xff] }
  0x34   :  { %955 = vmatpush.bf16.msrb.mxu3 %v1577_v60  ;;  %v1623_v59 = vld [vmem:[%s2016_s2] ss:$0 sm:$0xff] }
  0x35   :  { %929 = vmatpush.bf16.msrb.mxu1 %v1561_v61 }
  0x36   :  { %917 = vmatpush.bf16.msrb.mxu0 %v1552_v62 }
  0x37   :  { %943 = vmatpush.bf16.msrb.mxu2 %v1568_v63  ;;  %v1621_v63 = vld [vmem:[%s2017_s3 + $0x18] sm:$0xff] }
  0x38   :  { %956 = vmatpush.bf16.msrb.mxu3 %v1576_v0 }
  0x39   :  { %930 = vmatpush.bf16.msrb.mxu1 %v1560_v1 }
  0x3a   :  { %918 = vmatpush.bf16.msrb.mxu0 %v1551_v2  ;;  %v1620_v2 = vld [vmem:[%s2017_s3 + $0x10] sm:$0xff] }
  0x3b   :  { %944 = vmatpush.bf16.msrb.mxu2 %v1567_v3 }
  0x3c   :  { %957 = vmatpush.bf16.msrb.mxu3 %v1575_v4 }
  0x3d   :  { %931 = vmatpush.bf16.msrb.mxu1 %v1559_v5 }
  0x3e   :  { %919 = vmatpush.bf16.msrb.mxu0 %v1550_v6 }
  0x3f   :  { %945 = vmatpush.bf16.msrb.mxu2 %v1566_v7  ;;  %v1619_v7 = vld [vmem:[%s2017_s3 + $0x8] sm:$0xff] }
  0x40   :  { %958 = vmatpush.bf16.msrb.mxu3 %v1574_v8 }
  0x41   :  { %932 = vmatpush.bf16.msrb.mxu1 %v1558_v12  ;;  %920 = vmatmul.bf16.vlgmr.msrb.gmra.mxu0 %v234_v50  ;;  %v244_v50 = vld [vmem:[#allocation1 + $0x24] sm:$0xff] }
  0x42   :  { %964 = vmatpush.bf16.msra.mxu0 %v1589_v9  ;;  %946 = vmatmul.bf16.vlgmr.msrb.gmra.mxu2 %v236_v49  ;;  %v1614_v49 = vld [vmem:[%s2015_s1 + $0x300] sm:$0xff] }
  0x43   :  { %990 = vmatpush.bf16.msra.mxu2 %v1605_v10  ;;  %959 = vmatmul.bf16.vlgmr.msrb.gmra.mxu3 %v237_v51 }
  0x44   :  { %1003 = vmatpush.bf16.msra.mxu3 %v1613_v11  ;;  %933 = vmatmul.bf16.vlgmr.msrb.gmra.mxu1 %v1820_v53  ;;  %v1618_v11 = vld [vmem:[%s2017_s3] sm:$0xff] }
  0x45   :  { %977 = vmatpush.bf16.msra.mxu1 %v1597_v13 }
  0x46   :  { %965 = vmatpush.bf16.msra.mxu0 %v1588_v14 }
  0x47   :  { %991 = vmatpush.bf16.msra.mxu2 %v1604_v15 }
  0x48   :  { %1004 = vmatpush.bf16.msra.mxu3 %v1612_v16 }
  0x49   :  { %978 = vmatpush.bf16.msra.mxu1 %v1596_v17 }
  0x4a   :  { %966 = vmatpush.bf16.msra.mxu0 %v1587_v18 }
  0x4b   :  { %992 = vmatpush.bf16.msra.mxu2 %v1603_v19 }
  0x4c   :  { %1005 = vmatpush.bf16.msra.mxu3 %v1611_v20 }
  0x4d   :  { %979 = vmatpush.bf16.msra.mxu1 %v1595_v21 }
  0x4e   :  { %967 = vmatpush.bf16.msra.mxu0 %v1586_v22 }
  0x4f   :  { %993 = vmatpush.bf16.msra.mxu2 %v1602_v23 }
  0x50   :  { %1006 = vmatpush.bf16.msra.mxu3 %v1610_v24 }
  0x51   :  { %980 = vmatpush.bf16.msra.mxu1 %v1594_v25 }
  0x52   :  { %968 = vmatpush.bf16.msra.mxu0 %v1585_v26 }
  0x53   :  { %994 = vmatpush.bf16.msra.mxu2 %v1601_v27 }
  0x54   :  { %1007 = vmatpush.bf16.msra.mxu3 %v1609_v28 }
  0x55   :  { %981 = vmatpush.bf16.msra.mxu1 %v1593_v29 }
  0x56   :  { %969 = vmatpush.bf16.msra.mxu0 %v1584_v30 }
  0x57   :  { %995 = vmatpush.bf16.msra.mxu2 %v1600_v31 }
  0x58   :  { %1008 = vmatpush.bf16.msra.mxu3 %v1608_v32 }
  0x59   :  { %982 = vmatpush.bf16.msra.mxu1 %v1592_v33  ;;  %v1624_v33 = vld [vmem:[%s2018_s4] ss:$0 sm:$0xff] }
  0x5a   :  { %970 = vmatpush.bf16.msra.mxu0 %v1583_v34 }
  0x5b   :  { %996 = vmatpush.bf16.msra.mxu2 %v1599_v35 }
  0x5c   :  { %1009 = vmatpush.bf16.msra.mxu3 %v1607_v36 }
  0x5d   :  { %983 = vmatpush.bf16.msra.mxu1 %v1591_v37 }
  0x5e   :  { %971 = vmatpush.bf16.msra.mxu0 %v1582_v38 }
  0x5f   :  { %997 = vmatpush.bf16.msra.mxu2 %v1598_v39 }
  0x60   :  { %1010 = vmatpush.bf16.msra.mxu3 %v1606_v40 }
  0x61   :  { %984 = vmatpush.bf16.msra.mxu1 %v1590_v42  ;;  %972 = vmatmul.bf16.vlgmr.msra.gmra.mxu0 %v240_v43 }
  0x62   :  { %1020 = vmatpush.bf16.msrb.mxu0 %v1617_v41  ;;  %998 = vmatmul.bf16.vlgmr.msra.gmra.mxu2 %v242_v44 }
  0x63   :  { %1011 = vmatmul.bf16.vlgmr.msra.gmra.mxu3 %v243_v45 }
  0x64   :  { %985 = vmatmul.bf16.vlgmr.msra.gmra.mxu1 %v241_v47 }
  0x65   :  { %1074 = vmatpush.bf16.msrb.mxu1 %v1621_v63 }
  0x66   :  { %1021 = vmatpush.bf16.msrb.mxu0 %v1616_v46 }
  0x69   :  { %1075 = vmatpush.bf16.msrb.mxu1 %v1620_v2 }
  0x6a   :  { %1022 = vmatpush.bf16.msrb.mxu0 %v1615_v48 }
  0x6d   :  { %1076 = vmatpush.bf16.msrb.mxu1 %v1619_v7 }
  0x6e   :  { %1023 = vmatpush.bf16.msrb.mxu0 %v1614_v49 }
  0x71   :  { %1500 = vmatmul.msk.bf16.vlgmr.msrb.gmra.mxu0 %vm857_vm0, %v244_v50  ;;  %1077 = vmatpush.bf16.msrb.mxu1 %v1618_v11 }
  0x9e   :  { %v869_v51 = vpop.f32.mrf.mxu0 }
  0x9f   :  { %v870_v62 = vadd.f32 %v1623_v59, %v869_v51 }
  0xa1   :  { %v882_v52 = vpop.f32.mrf.mxu1 }
  0xa2   :  { %v883_v3 = vadd.f32 %v882_v52, %v870_v62 }
  0xa5   :  { %v895_v53 = vpop.f32.mrf.mxu2 }
  0xa6   :  { %v908_v54 = vpop.f32.mrf.mxu3  ;;  %v871_v55 = vpop.f32.mrf.mxu0  ;;  %v896_v6 = vadd.f32 %v895_v53, %v883_v3 }
  0xa8   :  { %v909_v10 = vadd.f32 %v908_v54, %v896_v6 }
  0xa9   :  { %v884_v56 = vpop.f32.mrf.mxu1 }
  0xad   :  { %v897_v57 = vpop.f32.mrf.mxu2 }
  0xae   :  { %v910_v58 = vpop.f32.mrf.mxu3 }
  0xbe   :  { %v921_v60 = vpop.f32.mrf.mxu0 }
  0xbf   :  { %v922_v12 = vadd.f32 %v921_v60, %v909_v10 }
  0xc1   :  { %v934_v61 = vpop.f32.mrf.mxu1 }
  0xc2   :  { %v935_v13 = vadd.f32 %v934_v61, %v922_v12 }
  0xc5   :  { %v947_v0 = vpop.f32.mrf.mxu2 }
  0xc6   :  { %v960_v1 = vpop.f32.mrf.mxu3  ;;  %v923_v4 = vpop.f32.mrf.mxu0  ;;  %v948_v14 = vadd.f32 %v947_v0, %v935_v13 }
  0xc8   :  { %v961_v17 = vadd.f32 %v960_v1, %v948_v14 }
  0xc9   :  { %v936_v5 = vpop.f32.mrf.mxu1 }
  0xcd   :  { %v949_v8 = vpop.f32.mrf.mxu2 }
  0xce   :  { %v962_v9 = vpop.f32.mrf.mxu3 }
  0xde   :  { %v973_v15 = vpop.f32.mrf.mxu0 }
  0xdf   :  { %v974_v18 = vadd.f32 %v973_v15, %v961_v17 }
  0xe1   :  { %v986_v16 = vpop.f32.mrf.mxu1 }
  0xe2   :  { %v987_v22 = vadd.f32 %v986_v16, %v974_v18 }
  0xe5   :  { %v999_v19 = vpop.f32.mrf.mxu2 }
  0xe6   :  { %v1012_v20 = vpop.f32.mrf.mxu3  ;;  %v975_v21 = vpop.f32.mrf.mxu0  ;;  %v1000_v24 = vadd.f32 %v999_v19, %v987_v22 }
  0xe8   :  { %v1013_v26 = vadd.f32 %v1012_v20, %v1000_v24 }
  0xe9   :  { %v988_v23 = vpop.f32.mrf.mxu1 }
  0xed   :  { %v1001_v25 = vpop.f32.mrf.mxu2 }
  0xee   :  { %v1014_v27 = vpop.f32.mrf.mxu3  ;;  %v1025_v28 = vpop.f32.mrf.mxu0 }
  0xef   :  { %v1026_v29 = vadd.f32 %v1025_v28, %v1013_v26 }
  0xf1   :  { %v1029_v30 = vmax.f32 %v1026_v29, 0.0 }
  0xf3   :  { %v1030_v31 = vpack.c.bf16 %v1029_v30, %v1029_v30 }
  0xf5   :  { %1517 = vmatmul.msk.bf16.vlgmr.msrb.gmra.mxu1 %vm857_vm0, %v1030_v31 }
  0xf6   :  { %v1027_v32 = vpop.f32.mrf.mxu0 }
 0x172   :  { %v1079_v34 = vpop.f32.mrf.mxu1 }
 0x173   :  { %v1080_v35 = vadd.f32 %v1624_v33, %v1079_v34 }
 0x175   :  { %1083 = vst [vmem:[#allocation2] sm:$0x3] %v1080_v35 }
 0x176   :  { %1094 = dma.vmem_to_hbm [thread:$0]  %s1090_s27, 32, %s1092_s30, [#allocation3]  }
 0x17a   :  { %v1081_v36 = vpop.f32.mrf.mxu1 }
 0x17b   :  { %1649 = dma.done.wait [#allocation3], 32  }
 0x17c   :  { %1650 = vsyncadd [#allocation3], 4294967264 }
 0x17d   :  { %1099 = vsyncpa [#allocation3], 1 }

</bundles_post_ra>
